<compile_context>
chip_gen: v5e
topology: v5e:2x2
jax: 0.10.0
libtpu: 0.0.40
codegen_flags: <defaults>
</compile_context>

<pallas_src>
import functools

import jax
import jax.numpy as jnp
from jax.experimental import pallas as pl
from jax.experimental.pallas import tpu as pltpu

MXU_DTYPE = jnp.bfloat16          # matmul operands
ACT_DTYPE = jnp.bfloat16          # inter-layer activations in HBM
BN_EPS = 1e-5
LRELU_SLOPE = 0.2
VMEM_LIMIT = 32 * 1024 * 1024     # safe on v5e/v6e (128 MiB) and v7x (64 MiB physical)

# (cin, cout, kernel, stride, fallback row tile)  -- tiles sized so double-buffered
# A/Y tiles stay ~2-8 MiB (well under scoped VMEM on every generation).
CONV_DEFS = [
    (3, 16, 2, 2, 8192),
    (16, 64, 4, 2, 4096),
    (64, 128, 4, 1, 2048),
    (128, 256, 4, 1, 1024),
]


# --------------------------------------------------------------------- fused (grid-less)
def _fused_conv_bn_lrelu_kernel(a_ref, w_ref, gamma_ref, beta_ref, o_ref, *, inv_m):
    """Whole-batch-in-one-tile: matmul + batch stats + BN + LeakyReLU, single pass."""
    acc = jnp.dot(a_ref[...], w_ref[...], preferred_element_type=jnp.float32)  # (M, Cout) f32
    s0 = jnp.sum(acc, axis=0, keepdims=True)
    s1 = jnp.sum(acc * acc, axis=0, keepdims=True)
    mean = s0 * inv_m
    var = jnp.maximum(s1 * inv_m - mean * mean, 0.0)
    scale = gamma_ref[...] * jax.lax.rsqrt(var + BN_EPS)
    shift = beta_ref[...] - mean * scale
    y = acc * scale + shift
    o_ref[...] = jnp.where(y > 0, y, LRELU_SLOPE * y).astype(o_ref.dtype)


def _fused_conv_bn_lrelu_dense_sigmoid_kernel(a_ref, w_ref, gamma_ref, beta_ref,
                                              dw_ref, db_ref, o_ref, *, inv_m):
    """Final block fully fused: matmul + stats + BN + LeakyReLU + Linear(256->1) + Sigmoid."""
    acc = jnp.dot(a_ref[...], w_ref[...], preferred_element_type=jnp.float32)
    s0 = jnp.sum(acc, axis=0, keepdims=True)
    s1 = jnp.sum(acc * acc, axis=0, keepdims=True)
    mean = s0 * inv_m
    var = jnp.maximum(s1 * inv_m - mean * mean, 0.0)
    scale = gamma_ref[...] * jax.lax.rsqrt(var + BN_EPS)
    shift = beta_ref[...] - mean * scale
    z = acc * scale + shift
    z = jnp.where(z > 0, z, LRELU_SLOPE * z)
    logits = jnp.dot(z, dw_ref[...], preferred_element_type=jnp.float32) + db_ref[...]
    o_ref[...] = jax.nn.sigmoid(logits)


# --------------------------------------------------------------------- tiled fallback
def _matmul_pstats_kernel(a_ref, w_ref, y_ref, s0_ref, s1_ref):
    """Row tile of the im2col matmul; bf16 store + per-tile partial sum / sum-of-squares."""
    acc = jnp.dot(a_ref[...], w_ref[...], preferred_element_type=jnp.float32)
    y_ref[...] = acc.astype(y_ref.dtype)
    s0_ref[...] = jnp.sum(acc, axis=0, keepdims=True)[None]          # (1, 1, Cout)
    s1_ref[...] = jnp.sum(acc * acc, axis=0, keepdims=True)[None]    # (1, 1, Cout)


def _affine_lrelu_kernel(y_ref, scale_ref, shift_ref, o_ref):
    """BN folded to a per-channel affine (precomputed in glue) + LeakyReLU, lane-dense."""
    y = y_ref[...].astype(jnp.float32) * scale_ref[...] + shift_ref[...]
    o_ref[...] = jnp.where(y > 0, y, LRELU_SLOPE * y).astype(o_ref.dtype)


def _affine_lrelu_dense_sigmoid_kernel(y_ref, scale_ref, shift_ref, dw_ref, db_ref, o_ref):
    z = y_ref[...].astype(jnp.float32) * scale_ref[...] + shift_ref[...]
    z = jnp.where(z > 0, z, LRELU_SLOPE * z)
    logits = jnp.dot(z, dw_ref[...], preferred_element_type=jnp.float32) + db_ref[...]
    o_ref[...] = jax.nn.sigmoid(logits)


# --------------------------------------------------------------------- wrappers
def _fused_conv_block(patches, w_mat, gamma, beta):
    m, _ = patches.shape
    cout = w_mat.shape[1]
    kern = functools.partial(_fused_conv_bn_lrelu_kernel, inv_m=1.0 / float(m))
    return pl.pallas_call(
        kern,
        out_shape=jax.ShapeDtypeStruct((m, cout), ACT_DTYPE),
        compiler_params=pltpu.CompilerParams(vmem_limit_bytes=VMEM_LIMIT),
    )(patches, w_mat, gamma, beta)


def _fused_final_block(patches, w_mat, gamma, beta, dw, db):
    m, _ = patches.shape
    kern = functools.partial(_fused_conv_bn_lrelu_dense_sigmoid_kernel, inv_m=1.0 / float(m))
    return pl.pallas_call(
        kern,
        out_shape=jax.ShapeDtypeStruct((m, 1), jnp.float32),
        compiler_params=pltpu.CompilerParams(vmem_limit_bytes=VMEM_LIMIT),
    )(patches, w_mat, gamma, beta, dw, db)


def _tiled_matmul_pstats(patches, w_mat, tile_m):
    """Row-tiled matmul with per-tile partial stats (parallel M axis -> megacore-friendly)."""
    m, k = patches.shape
    cout = w_mat.shape[1]
    grid_m = -(-m // tile_m)
    mpad = grid_m * tile_m
    if mpad != m:
        # Zero rows contribute nothing to sum / sumsq; stats divide by the true M.
        patches = jnp.pad(patches, ((0, mpad - m), (0, 0)))
    y, s0, s1 = pl.pallas_call(
        _matmul_pstats_kernel,
        out_shape=(jax.ShapeDtypeStruct((mpad, cout), ACT_DTYPE),
                   jax.ShapeDtypeStruct((grid_m, 1, cout), jnp.float32),
                   jax.ShapeDtypeStruct((grid_m, 1, cout), jnp.float32)),
        grid=(grid_m,),
        in_specs=[pl.BlockSpec((tile_m, k), lambda i: (i, 0)),
                  pl.BlockSpec((k, cout), lambda i: (0, 0))],
        out_specs=(pl.BlockSpec((tile_m, cout), lambda i: (i, 0)),
                   pl.BlockSpec((1, 1, cout), lambda i: (i, 0, 0)),
                   pl.BlockSpec((1, 1, cout), lambda i: (i, 0, 0))),
        compiler_params=pltpu.CompilerParams(
            dimension_semantics=("parallel",),
            vmem_limit_bytes=VMEM_LIMIT),
    )(patches, w_mat)
    return y, s0.sum(axis=0), s1.sum(axis=0), mpad    # stats reduced in tiny XLA glue


def _bn_scale_shift(s0, s1, gamma, beta, m_true):
    """Fold batch-stat BatchNorm into per-channel scale/shift (tiny, done in XLA glue)."""
    inv_m = 1.0 / float(m_true)
    mean = s0 * inv_m
    var = jnp.maximum(s1 * inv_m - mean * mean, 0.0)
    scale = gamma * jax.lax.rsqrt(var + BN_EPS)
    shift = beta - mean * scale
    return scale, shift


def _tiled_bn_lrelu(y_pad, scale, shift, tile_m, cout):
    """Lane-dense BN+LeakyReLU: operate on a (Mpad/r, r*Cout) view so stores are unmasked."""
    mpad = y_pad.shape[0]
    r = 1
    while r * cout < 128 and (tile_m % (2 * r) == 0):
        r *= 2
    rows = mpad // r
    tile_rows = tile_m // r
    y_view = y_pad.reshape(rows, r * cout)
    scale_t = jnp.tile(scale, (1, r))
    shift_t = jnp.tile(shift, (1, r))
    out = pl.pallas_call(
        _affine_lrelu_kernel,
        out_shape=jax.ShapeDtypeStruct((rows, r * cout), ACT_DTYPE),
        grid=(rows // tile_rows,),
        in_specs=[pl.BlockSpec((tile_rows, r * cout), lambda i: (i, 0)),
                  pl.BlockSpec((1, r * cout), lambda i: (0, 0)),
                  pl.BlockSpec((1, r * cout), lambda i: (0, 0))],
        out_specs=pl.BlockSpec((tile_rows, r * cout), lambda i: (i, 0)),
        compiler_params=pltpu.CompilerParams(
            dimension_semantics=("parallel",),
            vmem_limit_bytes=VMEM_LIMIT),
    )(y_view, scale_t, shift_t)
    return out.reshape(mpad, cout)


def _tiled_bn_lrelu_dense_sigmoid(y_pad, scale, shift, dw, db, tile_m):
    mpad, cout = y_pad.shape
    grid_m = mpad // tile_m
    return pl.pallas_call(
        _affine_lrelu_dense_sigmoid_kernel,
        out_shape=jax.ShapeDtypeStruct((mpad, 1), jnp.float32),
        grid=(grid_m,),
        in_specs=[pl.BlockSpec((tile_m, cout), lambda i: (i, 0)),
                  pl.BlockSpec((1, cout), lambda i: (0, 0)),
                  pl.BlockSpec((1, cout), lambda i: (0, 0)),
                  pl.BlockSpec((cout, 1), lambda i: (0, 0)),
                  pl.BlockSpec((1, 1), lambda i: (0, 0))],
        out_specs=pl.BlockSpec((tile_m, 1), lambda i: (i, 0)),
        compiler_params=pltpu.CompilerParams(
            dimension_semantics=("parallel",),
            vmem_limit_bytes=VMEM_LIMIT),
    )(y_pad, scale, shift, dw, db)


# --------------------------------------------------------------------- XLA glue (layout)
def _space_to_depth_nhwc(x, k):
    """Non-overlapping k x k patches (stride == k): a pure reshape, no gather."""
    n, h, w, c = x.shape
    ho, wo = h // k, w // k
    x = x.reshape(n, ho, k, wo, k, c).transpose(0, 1, 3, 2, 4, 5)
    return x.reshape(n * ho * wo, k * k * c), ho, wo


def _im2col_nhwc(x, k, s):
    """NHWC im2col in bf16; patch columns ordered (kh, kw, c) — channels on the lane axis."""
    n, h, w, c = x.shape
    ho = (h - k) // s + 1
    wo = (w - k) // s + 1
    cols = []
    for i in range(k):
        for j in range(k):
            cols.append(x[:, i:i + s * ho:s, j:j + s * wo:s, :])   # (n, ho, wo, c)
    patches = jnp.concatenate(cols, axis=-1)                       # (n, ho, wo, k*k*c)
    return patches.reshape(n * ho * wo, k * k * c), ho, wo


# --------------------------------------------------------------------- model
def init_params(key):
    params = {}
    keys = jax.random.split(key, 3 * len(CONV_DEFS) + 2)
    ki = 0
    for idx, (cin, cout, k, s, _) in enumerate(CONV_DEFS):
        fan_in = cin * k * k
        params[f"conv{idx}_w"] = (
            jax.random.normal(keys[ki], (cout, cin, k, k), jnp.float32) / jnp.sqrt(fan_in))
        # NOTE: conv bias intentionally omitted — training-mode BatchNorm subtracts the
        # batch mean immediately afterwards, so the bias cancels exactly.
        params[f"bn{idx}_g"] = 1.0 + 0.1 * jax.random.normal(keys[ki + 1], (cout,), jnp.float32)
        params[f"bn{idx}_b"] = 0.1 * jax.random.normal(keys[ki + 2], (cout,), jnp.float32)
        ki += 3
    params["dense_w"] = jax.random.normal(keys[ki], (1, 256), jnp.float32) / 16.0  # (out, in)
    params["dense_b"] = 0.1 * jax.random.normal(keys[ki + 1], (1,), jnp.float32)
    return params


def convd_forward(params, x_nchw):
    n = x_nchw.shape[0]
    z = jnp.transpose(x_nchw, (0, 2, 3, 1)).astype(ACT_DTYPE)   # NCHW -> NHWC bf16, once
    n_layers = len(CONV_DEFS)
    out = None
    for idx, (cin, cout, k, s, tile_m) in enumerate(CONV_DEFS):
        if k == s:                                               # conv0: space-to-depth reshape
            patches, ho, wo = _space_to_depth_nhwc(z, k)
        else:
            patches, ho, wo = _im2col_nhwc(z, k, s)
        m = patches.shape[0]
        # (Cout, Cin, kh, kw) -> (kh*kw*Cin, Cout) matching the (kh, kw, c) patch columns.
        w_mat = (jnp.transpose(params[f"conv{idx}_w"], (2, 3, 1, 0))
                 .reshape(-1, cout).astype(MXU_DTYPE))
        gamma = params[f"bn{idx}_g"].reshape(1, cout)
        beta = params[f"bn{idx}_b"].reshape(1, cout)
        is_last = idx == n_layers - 1
        if is_last:
            dw = params["dense_w"].T.astype(jnp.float32)         # (256, 1), kept f32
            db = params["dense_b"].reshape(1, 1)

        if m <= tile_m:
            # Whole batch fits one tile: one fused pallas_call per layer, no HBM round
            # trip of the f32 (M, Cout) activation and no second launch for batch stats.
            if is_last:
                out = _fused_final_block(patches, w_mat, gamma, beta, dw, db)
            else:
                zflat = _fused_conv_block(patches, w_mat, gamma, beta)
                z = zflat.reshape(n, ho, wo, cout)
        else:
            # Large-M fallback: tiled matmul (+ per-tile partial stats, parallel M axis),
            # tiny stats reduction in glue, lane-dense BN+LeakyReLU pass.
            y_pad, s0, s1, _ = _tiled_matmul_pstats(patches, w_mat, tile_m)
            scale, shift = _bn_scale_shift(s0, s1, gamma, beta, m)
            if is_last:
                out = _tiled_bn_lrelu_dense_sigmoid(y_pad, scale, shift, dw, db, tile_m)[:m]
            else:
                zflat = _tiled_bn_lrelu(y_pad, scale, shift, tile_m, cout)[:m]
                z = zflat.reshape(n, ho, wo, cout)
    return out                                                   # (N, 1) f32


if __name__ == "__main__":
    root = jax.random.PRNGKey(0)
    pkey, xkey = jax.random.split(root)
    params = init_params(pkey)
    x = jax.random.normal(xkey, (2, 3, 32, 32), jnp.float32)

    fwd = jax.jit(convd_forward)
    out = fwd(params, x)
    jax.block_until_ready(out)

    assert out.shape == (2, 1), out.shape
    assert bool(jnp.all(jnp.isfinite(out)))
    assert bool(jnp.all((out >= 0.0) & (out <= 1.0)))
    print("KERNEL_OK")
</pallas_src>

<mosaic_0001>
module attributes {stable_mosaic.version = 11 : i64} {
  func.func @_fused_conv_bn_lrelu_kernel(%arg0: memref<512x12xbf16, #tpu.memory_space<vmem>>, %arg1: memref<12x16xbf16, #tpu.memory_space<vmem>>, %arg2: memref<1x16xf32, #tpu.memory_space<vmem>>, %arg3: memref<1x16xf32, #tpu.memory_space<vmem>>, %arg4: memref<512x16xbf16, #tpu.memory_space<vmem>>) attributes {dimension_semantics = [], scalar_prefetch = 0 : i64, scratch_operands = 0 : i64, tpu.core_type = #tpu.core_type<tc>} {
    %c0 = arith.constant 0 : index
    %c0_0 = arith.constant 0 : index
    %0 = vector.load %arg0[%c0, %c0_0] : memref<512x12xbf16, #tpu.memory_space<vmem>>, vector<512x12xbf16>
    %c0_1 = arith.constant 0 : index
    %c0_2 = arith.constant 0 : index
    %1 = vector.load %arg1[%c0_1, %c0_2] : memref<12x16xbf16, #tpu.memory_space<vmem>>, vector<12x16xbf16>
    %cst = arith.constant dense<0.000000e+00> : vector<512x16xf32>
    %2 = tpu.matmul %0, %1, %cst {dimension_numbers = #tpu.dot_dimension_numbers<[1], [0], [0], [1], [0, 0, 1, 1], [], []>} : vector<512x12xbf16>, vector<12x16xbf16>, vector<512x16xf32> -> vector<512x16xf32>
    %cst_3 = arith.constant dense<0.000000e+00> : vector<16xf32>
    %3 = vector.multi_reduction <add>, %2, %cst_3 [0] : vector<512x16xf32> to vector<16xf32>
    %4 = vector.shape_cast %3 : vector<16xf32> to vector<1x16xf32>
    %5 = arith.mulf %2, %2 : vector<512x16xf32>
    %cst_4 = arith.constant dense<0.000000e+00> : vector<16xf32>
    %6 = vector.multi_reduction <add>, %5, %cst_4 [0] : vector<512x16xf32> to vector<16xf32>
    %7 = vector.shape_cast %6 : vector<16xf32> to vector<1x16xf32>
    %cst_5 = arith.constant 0.001953125 : f32
    %8 = vector.broadcast %cst_5 : f32 to vector<1x16xf32>
    %9 = arith.mulf %4, %8 : vector<1x16xf32>
    %cst_6 = arith.constant 0.001953125 : f32
    %10 = vector.broadcast %cst_6 : f32 to vector<1x16xf32>
    %11 = arith.mulf %7, %10 : vector<1x16xf32>
    %12 = arith.mulf %9, %9 : vector<1x16xf32>
    %13 = arith.subf %11, %12 : vector<1x16xf32>
    %cst_7 = arith.constant 0.000000e+00 : f32
    %14 = vector.broadcast %cst_7 : f32 to vector<1x16xf32>
    %15 = arith.maximumf %13, %14 : vector<1x16xf32>
    %c0_8 = arith.constant 0 : index
    %c0_9 = arith.constant 0 : index
    %16 = vector.load %arg2[%c0_8, %c0_9] : memref<1x16xf32, #tpu.memory_space<vmem>>, vector<1x16xf32>
    %cst_10 = arith.constant 9.99999974E-6 : f32
    %17 = vector.broadcast %cst_10 : f32 to vector<1x16xf32>
    %18 = arith.addf %15, %17 : vector<1x16xf32>
    %19 = math.rsqrt %18 : vector<1x16xf32>
    %20 = arith.mulf %16, %19 : vector<1x16xf32>
    %c0_11 = arith.constant 0 : index
    %c0_12 = arith.constant 0 : index
    %21 = vector.load %arg3[%c0_11, %c0_12] : memref<1x16xf32, #tpu.memory_space<vmem>>, vector<1x16xf32>
    %22 = arith.mulf %9, %20 : vector<1x16xf32>
    %23 = arith.subf %21, %22 : vector<1x16xf32>
    %24 = vector.broadcast %20 : vector<1x16xf32> to vector<512x16xf32>
    %25 = arith.mulf %2, %24 : vector<512x16xf32>
    %26 = vector.broadcast %23 : vector<1x16xf32> to vector<512x16xf32>
    %27 = arith.addf %25, %26 : vector<512x16xf32>
    %cst_13 = arith.constant 0.000000e+00 : f32
    %28 = vector.broadcast %cst_13 : f32 to vector<512x16xf32>
    %29 = arith.cmpf ogt, %27, %28 : vector<512x16xf32>
    %cst_14 = arith.constant 2.000000e-01 : f32
    %30 = vector.broadcast %cst_14 : f32 to vector<512x16xf32>
    %31 = arith.mulf %30, %27 : vector<512x16xf32>
    %32 = arith.select %29, %27, %31 : vector<512x16xi1>, vector<512x16xf32>
    %33 = arith.truncf %32 : vector<512x16xf32> to vector<512x16xbf16>
    %c0_15 = arith.constant 0 : index
    %c0_16 = arith.constant 0 : index
    %34 = vector.load %arg4[%c0_15, %c0_16] : memref<512x16xbf16, #tpu.memory_space<vmem>>, vector<512x16xbf16>
    tpu.vector_store %arg4[%c0_15, %c0_16], %33 {strides = array<i32>} : memref<512x16xbf16, #tpu.memory_space<vmem>>, vector<512x16xbf16>,
    return
  }
}

module attributes {stable_mosaic.version = 11 : i64} {
  func.func @_fused_conv_bn_lrelu_kernel(%arg0: memref<98x256xbf16, #tpu.memory_space<vmem>>, %arg1: memref<256x64xbf16, #tpu.memory_space<vmem>>, %arg2: memref<1x64xf32, #tpu.memory_space<vmem>>, %arg3: memref<1x64xf32, #tpu.memory_space<vmem>>, %arg4: memref<98x64xbf16, #tpu.memory_space<vmem>>) attributes {dimension_semantics = [], scalar_prefetch = 0 : i64, scratch_operands = 0 : i64, tpu.core_type = #tpu.core_type<tc>} {
    %c0 = arith.constant 0 : index
    %c0_0 = arith.constant 0 : index
    %0 = vector.load %arg0[%c0, %c0_0] : memref<98x256xbf16, #tpu.memory_space<vmem>>, vector<98x256xbf16>
    %c0_1 = arith.constant 0 : index
    %c0_2 = arith.constant 0 : index
    %1 = vector.load %arg1[%c0_1, %c0_2] : memref<256x64xbf16, #tpu.memory_space<vmem>>, vector<256x64xbf16>
    %cst = arith.constant dense<0.000000e+00> : vector<98x64xf32>
    %2 = tpu.matmul %0, %1, %cst {dimension_numbers = #tpu.dot_dimension_numbers<[1], [0], [0], [1], [0, 0, 1, 1], [], []>} : vector<98x256xbf16>, vector<256x64xbf16>, vector<98x64xf32> -> vector<98x64xf32>
    %cst_3 = arith.constant dense<0.000000e+00> : vector<64xf32>
    %3 = vector.multi_reduction <add>, %2, %cst_3 [0] : vector<98x64xf32> to vector<64xf32>
    %4 = vector.shape_cast %3 : vector<64xf32> to vector<1x64xf32>
    %5 = arith.mulf %2, %2 : vector<98x64xf32>
    %cst_4 = arith.constant dense<0.000000e+00> : vector<64xf32>
    %6 = vector.multi_reduction <add>, %5, %cst_4 [0] : vector<98x64xf32> to vector<64xf32>
    %7 = vector.shape_cast %6 : vector<64xf32> to vector<1x64xf32>
    %cst_5 = arith.constant 0.0102040814 : f32
    %8 = vector.broadcast %cst_5 : f32 to vector<1x64xf32>
    %9 = arith.mulf %4, %8 : vector<1x64xf32>
    %cst_6 = arith.constant 0.0102040814 : f32
    %10 = vector.broadcast %cst_6 : f32 to vector<1x64xf32>
    %11 = arith.mulf %7, %10 : vector<1x64xf32>
    %12 = arith.mulf %9, %9 : vector<1x64xf32>
    %13 = arith.subf %11, %12 : vector<1x64xf32>
    %cst_7 = arith.constant 0.000000e+00 : f32
    %14 = vector.broadcast %cst_7 : f32 to vector<1x64xf32>
    %15 = arith.maximumf %13, %14 : vector<1x64xf32>
    %c0_8 = arith.constant 0 : index
    %c0_9 = arith.constant 0 : index
    %16 = vector.load %arg2[%c0_8, %c0_9] : memref<1x64xf32, #tpu.memory_space<vmem>>, vector<1x64xf32>
    %cst_10 = arith.constant 9.99999974E-6 : f32
    %17 = vector.broadcast %cst_10 : f32 to vector<1x64xf32>
    %18 = arith.addf %15, %17 : vector<1x64xf32>
    %19 = math.rsqrt %18 : vector<1x64xf32>
    %20 = arith.mulf %16, %19 : vector<1x64xf32>
    %c0_11 = arith.constant 0 : index
    %c0_12 = arith.constant 0 : index
    %21 = vector.load %arg3[%c0_11, %c0_12] : memref<1x64xf32, #tpu.memory_space<vmem>>, vector<1x64xf32>
    %22 = arith.mulf %9, %20 : vector<1x64xf32>
    %23 = arith.subf %21, %22 : vector<1x64xf32>
    %24 = vector.broadcast %20 : vector<1x64xf32> to vector<98x64xf32>
    %25 = arith.mulf %2, %24 : vector<98x64xf32>
    %26 = vector.broadcast %23 : vector<1x64xf32> to vector<98x64xf32>
    %27 = arith.addf %25, %26 : vector<98x64xf32>
    %cst_13 = arith.constant 0.000000e+00 : f32
    %28 = vector.broadcast %cst_13 : f32 to vector<98x64xf32>
    %29 = arith.cmpf ogt, %27, %28 : vector<98x64xf32>
    %cst_14 = arith.constant 2.000000e-01 : f32
    %30 = vector.broadcast %cst_14 : f32 to vector<98x64xf32>
    %31 = arith.mulf %30, %27 : vector<98x64xf32>
    %32 = arith.select %29, %27, %31 : vector<98x64xi1>, vector<98x64xf32>
    %33 = arith.truncf %32 : vector<98x64xf32> to vector<98x64xbf16>
    %c0_15 = arith.constant 0 : index
    %c0_16 = arith.constant 0 : index
    %34 = vector.load %arg4[%c0_15, %c0_16] : memref<98x64xbf16, #tpu.memory_space<vmem>>, vector<98x64xbf16>
    tpu.vector_store %arg4[%c0_15, %c0_16], %33 {strides = array<i32>} : memref<98x64xbf16, #tpu.memory_space<vmem>>, vector<98x64xbf16>,
    return
  }
}

module attributes {stable_mosaic.version = 11 : i64} {
  func.func @_fused_conv_bn_lrelu_kernel(%arg0: memref<32x1024xbf16, #tpu.memory_space<vmem>>, %arg1: memref<1024x128xbf16, #tpu.memory_space<vmem>>, %arg2: memref<1x128xf32, #tpu.memory_space<vmem>>, %arg3: memref<1x128xf32, #tpu.memory_space<vmem>>, %arg4: memref<32x128xbf16, #tpu.memory_space<vmem>>) attributes {dimension_semantics = [], scalar_prefetch = 0 : i64, scratch_operands = 0 : i64, tpu.core_type = #tpu.core_type<tc>} {
    %c0 = arith.constant 0 : index
    %c0_0 = arith.constant 0 : index
    %0 = vector.load %arg0[%c0, %c0_0] : memref<32x1024xbf16, #tpu.memory_space<vmem>>, vector<32x1024xbf16>
    %c0_1 = arith.constant 0 : index
    %c0_2 = arith.constant 0 : index
    %1 = vector.load %arg1[%c0_1, %c0_2] : memref<1024x128xbf16, #tpu.memory_space<vmem>>, vector<1024x128xbf16>
    %cst = arith.constant dense<0.000000e+00> : vector<32x128xf32>
    %2 = tpu.matmul %0, %1, %cst {dimension_numbers = #tpu.dot_dimension_numbers<[1], [0], [0], [1], [0, 0, 1, 1], [], []>} : vector<32x1024xbf16>, vector<1024x128xbf16>, vector<32x128xf32> -> vector<32x128xf32>
    %cst_3 = arith.constant dense<0.000000e+00> : vector<128xf32>
    %3 = vector.multi_reduction <add>, %2, %cst_3 [0] : vector<32x128xf32> to vector<128xf32>
    %4 = vector.shape_cast %3 : vector<128xf32> to vector<1x128xf32>
    %5 = arith.mulf %2, %2 : vector<32x128xf32>
    %cst_4 = arith.constant dense<0.000000e+00> : vector<128xf32>
    %6 = vector.multi_reduction <add>, %5, %cst_4 [0] : vector<32x128xf32> to vector<128xf32>
    %7 = vector.shape_cast %6 : vector<128xf32> to vector<1x128xf32>
    %cst_5 = arith.constant 3.125000e-02 : f32
    %8 = vector.broadcast %cst_5 : f32 to vector<1x128xf32>
    %9 = arith.mulf %4, %8 : vector<1x128xf32>
    %cst_6 = arith.constant 3.125000e-02 : f32
    %10 = vector.broadcast %cst_6 : f32 to vector<1x128xf32>
    %11 = arith.mulf %7, %10 : vector<1x128xf32>
    %12 = arith.mulf %9, %9 : vector<1x128xf32>
    %13 = arith.subf %11, %12 : vector<1x128xf32>
    %cst_7 = arith.constant 0.000000e+00 : f32
    %14 = vector.broadcast %cst_7 : f32 to vector<1x128xf32>
    %15 = arith.maximumf %13, %14 : vector<1x128xf32>
    %c0_8 = arith.constant 0 : index
    %c0_9 = arith.constant 0 : index
    %16 = vector.load %arg2[%c0_8, %c0_9] : memref<1x128xf32, #tpu.memory_space<vmem>>, vector<1x128xf32>
    %cst_10 = arith.constant 9.99999974E-6 : f32
    %17 = vector.broadcast %cst_10 : f32 to vector<1x128xf32>
    %18 = arith.addf %15, %17 : vector<1x128xf32>
    %19 = math.rsqrt %18 : vector<1x128xf32>
    %20 = arith.mulf %16, %19 : vector<1x128xf32>
    %c0_11 = arith.constant 0 : index
    %c0_12 = arith.constant 0 : index
    %21 = vector.load %arg3[%c0_11, %c0_12] : memref<1x128xf32, #tpu.memory_space<vmem>>, vector<1x128xf32>
    %22 = arith.mulf %9, %20 : vector<1x128xf32>
    %23 = arith.subf %21, %22 : vector<1x128xf32>
    %24 = vector.broadcast %20 : vector<1x128xf32> to vector<32x128xf32>
    %25 = arith.mulf %2, %24 : vector<32x128xf32>
    %26 = vector.broadcast %23 : vector<1x128xf32> to vector<32x128xf32>
    %27 = arith.addf %25, %26 : vector<32x128xf32>
    %cst_13 = arith.constant 0.000000e+00 : f32
    %28 = vector.broadcast %cst_13 : f32 to vector<32x128xf32>
    %29 = arith.cmpf ogt, %27, %28 : vector<32x128xf32>
    %cst_14 = arith.constant 2.000000e-01 : f32
    %30 = vector.broadcast %cst_14 : f32 to vector<32x128xf32>
    %31 = arith.mulf %30, %27 : vector<32x128xf32>
    %32 = arith.select %29, %27, %31 : vector<32x128xi1>, vector<32x128xf32>
    %33 = arith.truncf %32 : vector<32x128xf32> to vector<32x128xbf16>
    %c0_15 = arith.constant 0 : index
    %c0_16 = arith.constant 0 : index
    %34 = vector.load %arg4[%c0_15, %c0_16] : memref<32x128xbf16, #tpu.memory_space<vmem>>, vector<32x128xbf16>
    tpu.vector_store %arg4[%c0_15, %c0_16], %33 {strides = array<i32>} : memref<32x128xbf16, #tpu.memory_space<vmem>>, vector<32x128xbf16>,
    return
  }
}

module attributes {stable_mosaic.version = 11 : i64} {
  func.func @_fused_conv_bn_lrelu_dense_sigmoid_kernel(%arg0: memref<2x2048xbf16, #tpu.memory_space<vmem>>, %arg1: memref<2048x256xbf16, #tpu.memory_space<vmem>>, %arg2: memref<1x256xf32, #tpu.memory_space<vmem>>, %arg3: memref<1x256xf32, #tpu.memory_space<vmem>>, %arg4: memref<256x1xf32, #tpu.memory_space<vmem>>, %arg5: memref<1x1xf32, #tpu.memory_space<vmem>>, %arg6: memref<2x1xf32, #tpu.memory_space<vmem>>) attributes {dimension_semantics = [], scalar_prefetch = 0 : i64, scratch_operands = 0 : i64, tpu.core_type = #tpu.core_type<tc>} {
    %c0 = arith.constant 0 : index
    %c0_0 = arith.constant 0 : index
    %0 = vector.load %arg0[%c0, %c0_0] : memref<2x2048xbf16, #tpu.memory_space<vmem>>, vector<2x2048xbf16>
    %c0_1 = arith.constant 0 : index
    %c0_2 = arith.constant 0 : index
    %1 = vector.load %arg1[%c0_1, %c0_2] : memref<2048x256xbf16, #tpu.memory_space<vmem>>, vector<2048x256xbf16>
    %cst = arith.constant dense<0.000000e+00> : vector<2x256xf32>
    %2 = tpu.matmul %0, %1, %cst {dimension_numbers = #tpu.dot_dimension_numbers<[1], [0], [0], [1], [0, 0, 1, 1], [], []>} : vector<2x2048xbf16>, vector<2048x256xbf16>, vector<2x256xf32> -> vector<2x256xf32>
    %cst_3 = arith.constant dense<0.000000e+00> : vector<256xf32>
    %3 = vector.multi_reduction <add>, %2, %cst_3 [0] : vector<2x256xf32> to vector<256xf32>
    %4 = vector.shape_cast %3 : vector<256xf32> to vector<1x256xf32>
    %5 = arith.mulf %2, %2 : vector<2x256xf32>
    %cst_4 = arith.constant dense<0.000000e+00> : vector<256xf32>
    %6 = vector.multi_reduction <add>, %5, %cst_4 [0] : vector<2x256xf32> to vector<256xf32>
    %7 = vector.shape_cast %6 : vector<256xf32> to vector<1x256xf32>
    %cst_5 = arith.constant 5.000000e-01 : f32
    %8 = vector.broadcast %cst_5 : f32 to vector<1x256xf32>
    %9 = arith.mulf %4, %8 : vector<1x256xf32>
    %cst_6 = arith.constant 5.000000e-01 : f32
    %10 = vector.broadcast %cst_6 : f32 to vector<1x256xf32>
    %11 = arith.mulf %7, %10 : vector<1x256xf32>
    %12 = arith.mulf %9, %9 : vector<1x256xf32>
    %13 = arith.subf %11, %12 : vector<1x256xf32>
    %cst_7 = arith.constant 0.000000e+00 : f32
    %14 = vector.broadcast %cst_7 : f32 to vector<1x256xf32>
    %15 = arith.maximumf %13, %14 : vector<1x256xf32>
    %c0_8 = arith.constant 0 : index
    %c0_9 = arith.constant 0 : index
    %16 = vector.load %arg2[%c0_8, %c0_9] : memref<1x256xf32, #tpu.memory_space<vmem>>, vector<1x256xf32>
    %cst_10 = arith.constant 9.99999974E-6 : f32
    %17 = vector.broadcast %cst_10 : f32 to vector<1x256xf32>
    %18 = arith.addf %15, %17 : vector<1x256xf32>
    %19 = math.rsqrt %18 : vector<1x256xf32>
    %20 = arith.mulf %16, %19 : vector<1x256xf32>
    %c0_11 = arith.constant 0 : index
    %c0_12 = arith.constant 0 : index
    %21 = vector.load %arg3[%c0_11, %c0_12] : memref<1x256xf32, #tpu.memory_space<vmem>>, vector<1x256xf32>
    %22 = arith.mulf %9, %20 : vector<1x256xf32>
    %23 = arith.subf %21, %22 : vector<1x256xf32>
    %24 = vector.broadcast %20 : vector<1x256xf32> to vector<2x256xf32>
    %25 = arith.mulf %2, %24 : vector<2x256xf32>
    %26 = vector.broadcast %23 : vector<1x256xf32> to vector<2x256xf32>
    %27 = arith.addf %25, %26 : vector<2x256xf32>
    %cst_13 = arith.constant 0.000000e+00 : f32
    %28 = vector.broadcast %cst_13 : f32 to vector<2x256xf32>
    %29 = arith.cmpf ogt, %27, %28 : vector<2x256xf32>
    %cst_14 = arith.constant 2.000000e-01 : f32
    %30 = vector.broadcast %cst_14 : f32 to vector<2x256xf32>
    %31 = arith.mulf %30, %27 : vector<2x256xf32>
    %32 = arith.select %29, %27, %31 : vector<2x256xi1>, vector<2x256xf32>
    %c0_15 = arith.constant 0 : index
    %c0_16 = arith.constant 0 : index
    %33 = vector.load %arg4[%c0_15, %c0_16] : memref<256x1xf32, #tpu.memory_space<vmem>>, vector<256x1xf32>
    %cst_17 = arith.constant dense<0.000000e+00> : vector<2x1xf32>
    %34 = tpu.matmul %32, %33, %cst_17 {dimension_numbers = #tpu.dot_dimension_numbers<[1], [0], [0], [1], [0, 0, 1, 1], [], []>} : vector<2x256xf32>, vector<256x1xf32>, vector<2x1xf32> -> vector<2x1xf32>
    %c0_18 = arith.constant 0 : index
    %c0_19 = arith.constant 0 : index
    %35 = vector.load %arg5[%c0_18, %c0_19] : memref<1x1xf32, #tpu.memory_space<vmem>>, vector<1x1xf32>
    %36 = vector.broadcast %35 : vector<1x1xf32> to vector<2x1xf32>
    %37 = arith.addf %34, %36 : vector<2x1xf32>
    %38 = arith.negf %37 : vector<2x1xf32>
    %39 = math.exp %38 : vector<2x1xf32>
    %cst_20 = arith.constant 1.000000e+00 : f32
    %40 = vector.broadcast %cst_20 : f32 to vector<2x1xf32>
    %41 = arith.addf %40, %39 : vector<2x1xf32>
    %42 = arith.divf %40, %41 : vector<2x1xf32>
    %c0_21 = arith.constant 0 : index
    %c0_22 = arith.constant 0 : index
    %43 = vector.load %arg6[%c0_21, %c0_22] : memref<2x1xf32, #tpu.memory_space<vmem>>, vector<2x1xf32>
    tpu.vector_store %arg6[%c0_21, %c0_22], %42 {strides = array<i32>} : memref<2x1xf32, #tpu.memory_space<vmem>>, vector<2x1xf32>,
    return
  }
}

</mosaic_0001>

<bundles_post_ra>
// kernel: convd_forward.4
= control target key start
LH: loop header
LB: loop body
LE: loop exit
PB: predicated region body
PF: predicated region fallthrough
CT: control target
= control target key end

     0   :  { %vm346_vm0 = vcmask 1045504   ;;  %vm249_vm1 = vcmask 97280   ;;  %vm519_vm2 = vcmask 130048   ;;  %s3210_s1 = inlined_call_operand.vmem [shape: bf16[12,16], index: 1, kind: input, shape index: {}]   ;;  %s3211_s0 = inlined_call_operand.vmem [shape: bf16[512,12], index: 0, kind: input, shape index: {}]   ;;  %s3212_s2 = inlined_call_operand.vmem [shape: f32[1,16], index: 2, kind: input, shape index: {}]   ;;  %s3213_s3 = inlined_call_operand.vmem [shape: f32[1,16], index: 3, kind: input, shape index: {}]   ;;  %s3214_s4 = inlined_call_operand.vmem [shape: bf16[512,16], index: 4, kind: output, shape index: {}]  }
   0x1   :  { %v1460_v0 = vld [vmem:[%s3210_s1] sm:$0xf]  ;;  %v1526_v1 = vld [vmem:[%s3210_s1] sm:$0x30]  ;;  %v1495_v6 = vld [vmem:[%s3211_s0 + $0x8] sm:$0xff] }
   0x2   :  { %v1461_v2 = vor.u32 %v1526_v1, %v1460_v0  ;;  %v1494_v4 = vld [vmem:[%s3211_s0] sm:$0xff]  ;;  %v1503_v7 = vld [vmem:[%s3211_s0 + $0x48] sm:$0xff]  ;;  %v1496_v9 = vld [vmem:[%s3211_s0 + $0x10] sm:$0xff] }
   0x3   :  { %v1502_v5 = vld [vmem:[%s3211_s0 + $0x40] sm:$0xff]  ;;  %v1504_v10 = vld [vmem:[%s3211_s0 + $0x50] sm:$0xff]  ;;  %v1511_v11 = vld [vmem:[%s3211_s0 + $0x88] sm:$0xff] }
   0x4   :  { %v348_v3 = vsel %vm346_vm0, %v1461_v2, 0  ;;  %v1510_v8 = vld [vmem:[%s3211_s0 + $0x80] sm:$0xff]  ;;  %v1497_v12 = vld [vmem:[%s3211_s0 + $0x18] sm:$0xff]  ;;  %v1512_v14 = vld [vmem:[%s3211_s0 + $0x90] sm:$0xff]  ;;  %vm1261_vm0 = vcmask 125952  }
   0x5   :  { %357 = vmatpush.bf16.msra.mxu0 %v348_v3  ;;  %1527 = vmatpush.bf16.msra.mxu1 %v348_v3  ;;  %v1505_v13 = vld [vmem:[%s3211_s0 + $0x58] sm:$0xff]  ;;  %v1518_v15 = vld [vmem:[%s3211_s0 + $0xc0] sm:$0xff]  ;;  %v1519_v19 = vld [vmem:[%s3211_s0 + $0xc8] sm:$0xff] }
   0x6   :  { %1528 = vmatpush.bf16.msra.mxu2 %v348_v3  ;;  %1529 = vmatpush.bf16.msra.mxu3 %v348_v3  ;;  %v1498_v16 = vld [vmem:[%s3211_s0 + $0x20] sm:$0xff]  ;;  %v1513_v18 = vld [vmem:[%s3211_s0 + $0x98] sm:$0xff]  ;;  %v1499_v20 = vld [vmem:[%s3211_s0 + $0x28] sm:$0xff] }
   0x7   :  { %v1506_v17 = vld [vmem:[%s3211_s0 + $0x60] sm:$0xff]  ;;  %v1507_v21 = vld [vmem:[%s3211_s0 + $0x68] sm:$0xff]  ;;  %v1520_v23 = vld [vmem:[%s3211_s0 + $0xd0] sm:$0xff] }
   0x8   :  { %1462 = vmatmul.msk.bf16.vlgmr.msra.gmra.mxu0 %vm249_vm1, %v1494_v4  ;;  %1470 = vmatmul.msk.bf16.vlgmr.msra.gmra.mxu1 %vm249_vm1, %v1502_v5  ;;  %v1514_v22 = vld [vmem:[%s3211_s0 + $0xa0] sm:$0xff]  ;;  %v1500_v24 = vld [vmem:[%s3211_s0 + $0x30] sm:$0xff]  ;;  %v1515_v26 = vld [vmem:[%s3211_s0 + $0xa8] sm:$0xff] }
   0x9   :  { %1478 = vmatmul.msk.bf16.vlgmr.msra.gmra.mxu2 %vm249_vm1, %v1510_v8  ;;  %1486 = vmatmul.msk.bf16.vlgmr.msra.gmra.mxu3 %vm249_vm1, %v1518_v15  ;;  %v1508_v25 = vld [vmem:[%s3211_s0 + $0x70] sm:$0xff]  ;;  %v1521_v27 = vld [vmem:[%s3211_s0 + $0xd8] sm:$0xff]  ;;  %v1522_v31 = vld [vmem:[%s3211_s0 + $0xe0] sm:$0xff] }
   0xa   :  { %v1501_v28 = vld [vmem:[%s3211_s0 + $0x38] sm:$0xff]  ;;  %v1516_v30 = vld [vmem:[%s3211_s0 + $0xb0] sm:$0xff]  ;;  %v1523_v35 = vld [vmem:[%s3211_s0 + $0xe8] sm:$0xff] }
   0xb   :  { %v1509_v29 = vld [vmem:[%s3211_s0 + $0x78] sm:$0xff]  ;;  %v1524_v40 = vld [vmem:[%s3211_s0 + $0xf0] sm:$0xff] }
   0xc   :  { %v1517_v34 = vld [vmem:[%s3211_s0 + $0xb8] sm:$0xff] }
   0xd   :  { %v1525_v45 = vld [vmem:[%s3211_s0 + $0xf8] sm:$0xff] }
  0x18   :  { %1463 = vmatmul.msk.bf16.gmra.mxu0 %vm249_vm1, %v1495_v6  ;;  %1471 = vmatmul.msk.bf16.gmra.mxu1 %vm249_vm1, %v1503_v7 }
  0x19   :  { %1479 = vmatmul.msk.bf16.gmra.mxu2 %vm249_vm1, %v1511_v11  ;;  %1487 = vmatmul.msk.bf16.gmra.mxu3 %vm249_vm1, %v1519_v19 }
  0x28   :  { %1464 = vmatmul.msk.bf16.gmra.mxu0 %vm249_vm1, %v1496_v9  ;;  %1472 = vmatmul.msk.bf16.gmra.mxu1 %vm249_vm1, %v1504_v10 }
  0x29   :  { %1480 = vmatmul.msk.bf16.gmra.mxu2 %vm249_vm1, %v1512_v14  ;;  %1488 = vmatmul.msk.bf16.gmra.mxu3 %vm249_vm1, %v1520_v23 }
  0x38   :  { %1465 = vmatmul.msk.bf16.gmra.mxu0 %vm249_vm1, %v1497_v12  ;;  %1473 = vmatmul.msk.bf16.gmra.mxu1 %vm249_vm1, %v1505_v13 }
  0x39   :  { %1481 = vmatmul.msk.bf16.gmra.mxu2 %vm249_vm1, %v1513_v18  ;;  %1489 = vmatmul.msk.bf16.gmra.mxu3 %vm249_vm1, %v1521_v27 }
  0x48   :  { %1466 = vmatmul.msk.bf16.gmra.mxu0 %vm249_vm1, %v1498_v16  ;;  %1474 = vmatmul.msk.bf16.gmra.mxu1 %vm249_vm1, %v1506_v17 }
  0x49   :  { %1482 = vmatmul.msk.bf16.gmra.mxu2 %vm249_vm1, %v1514_v22  ;;  %1490 = vmatmul.msk.bf16.gmra.mxu3 %vm249_vm1, %v1522_v31 }
  0x58   :  { %1467 = vmatmul.msk.bf16.gmra.mxu0 %vm249_vm1, %v1499_v20  ;;  %1475 = vmatmul.msk.bf16.gmra.mxu1 %vm249_vm1, %v1507_v21 }
  0x59   :  { %1483 = vmatmul.msk.bf16.gmra.mxu2 %vm249_vm1, %v1515_v26  ;;  %1491 = vmatmul.msk.bf16.gmra.mxu3 %vm249_vm1, %v1523_v35 }
  0x68   :  { %1468 = vmatmul.msk.bf16.gmra.mxu0 %vm249_vm1, %v1500_v24  ;;  %1476 = vmatmul.msk.bf16.gmra.mxu1 %vm249_vm1, %v1508_v25 }
  0x69   :  { %1484 = vmatmul.msk.bf16.gmra.mxu2 %vm249_vm1, %v1516_v30  ;;  %1492 = vmatmul.msk.bf16.gmra.mxu3 %vm249_vm1, %v1524_v40 }
  0x78   :  { %1469 = vmatmul.msk.bf16.gmra.mxu0 %vm249_vm1, %v1501_v28  ;;  %1477 = vmatmul.msk.bf16.gmra.mxu1 %vm249_vm1, %v1509_v29 }
  0x79   :  { %1485 = vmatmul.msk.bf16.gmra.mxu2 %vm249_vm1, %v1517_v34  ;;  %1493 = vmatmul.msk.bf16.gmra.mxu3 %vm249_vm1, %v1525_v45 }
  0x85   :  { %v1675_v32 = vpop.f32.mrf.mxu0  ;;  %v1677_v33 = vpop.f32.mrf.mxu1 }
  0x86   :  { %v653_v5 = vmul.f32 %v1675_v32, %v1675_v32  ;;  %v520_v9 = vsel %vm519_vm2, %v1675_v32, 0.0 }
  0x88   :  { %v717_v14 = vsel %vm519_vm2, %v653_v5, 0.0 }
  0x8c   :  { %v1703_v43 = vpop.f32.mrf.mxu2  ;;  %v1729_v55 = vpop.f32.mrf.mxu3 }
  0x8d   :  { %v1687_v36 = vpop.f32.mrf.mxu0  ;;  %v1689_v37 = vpop.f32.mrf.mxu1 }
  0x8e   :  { %v654_v3 = vmul.f32 %v1687_v36, %v1687_v36  ;;  %v521_v6 = vsel %vm519_vm2, %v1687_v36, 0.0 }
  0x8f   :  { %v522_v13 = vadd.f32 %v521_v6, %v520_v9 }
  0x90   :  { %v718_v10 = vsel %vm519_vm2, %v654_v3, 0.0 }
  0x91   :  { %v719_v18 = vadd.f32 %v718_v10, %v717_v14 }
  0x94   :  { %v1715_v48 = vpop.f32.mrf.mxu2  ;;  %v1739_v60 = vpop.f32.mrf.mxu3 }
  0x95   :  { %v1691_v38 = vpop.f32.mrf.mxu0  ;;  %v1693_v39 = vpop.f32.mrf.mxu1 }
  0x96   :  { %v655_v7 = vmul.f32 %v1691_v38, %v1691_v38  ;;  %v523_v11 = vsel %vm519_vm2, %v1691_v38, 0.0 }
  0x97   :  { %v524_v19 = vadd.f32 %v523_v11, %v522_v13 }
  0x98   :  { %v720_v15 = vsel %vm519_vm2, %v655_v7, 0.0 }
  0x99   :  { %v721_v24 = vadd.f32 %v720_v15, %v719_v18 }
  0x9c   :  { %v1721_v51 = vpop.f32.mrf.mxu2  ;;  %v1747_v0 = vpop.f32.mrf.mxu3 }
  0x9d   :  { %v1699_v41 = vpop.f32.mrf.mxu0  ;;  %v1701_v42 = vpop.f32.mrf.mxu1 }
  0x9e   :  { %v656_v12 = vmul.f32 %v1699_v41, %v1699_v41  ;;  %v525_v16 = vsel %vm519_vm2, %v1699_v41, 0.0 }
  0x9f   :  { %v526_v25 = vadd.f32 %v525_v16, %v524_v19 }
  0xa0   :  { %v722_v21 = vsel %vm519_vm2, %v656_v12, 0.0 }
  0xa1   :  { %v723_v30 = vadd.f32 %v722_v21, %v721_v24 }
  0xa4   :  { %v1727_v54 = vpop.f32.mrf.mxu2  ;;  %v1763_v8 = vpop.f32.mrf.mxu3 }
  0xa5   :  { %v1705_v44 = vpop.f32.mrf.mxu0  ;;  %v1711_v46 = vpop.f32.mrf.mxu1  ;;  %3254 = vst [vmem:[#allocation3_spill] sm:$0xff] %v1727_v54 }
  0xa6   :  { %3258 = vst [vmem:[#allocation7_spill] sm:$0xff] %v1763_v8  ;;  %v657_v17 = vmul.f32 %v1705_v44, %v1705_v44  ;;  %v527_v22 = vsel %vm519_vm2, %v1705_v44, 0.0 }
  0xa7   :  { %v528_v31 = vadd.f32 %v527_v22, %v526_v25 }
  0xa8   :  { %v724_v27 = vsel %vm519_vm2, %v657_v17, 0.0 }
  0xa9   :  { %v725_v3 = vadd.f32 %v724_v27, %v723_v30 }
  0xac   :  { %v1735_v58 = vpop.f32.mrf.mxu2  ;;  %v1799_v6 = vpop.f32.mrf.mxu3 }
  0xad   :  { %v1713_v47 = vpop.f32.mrf.mxu0  ;;  %v1719_v50 = vpop.f32.mrf.mxu1  ;;  %3255 = vst [vmem:[#allocation4_spill] sm:$0xff] %v1735_v58 }
  0xae   :  { %3253 = vst [vmem:[#allocation2_spill] sm:$0xff] %v1719_v50  ;;  %v658_v23 = vmul.f32 %v1713_v47, %v1713_v47  ;;  %v529_v28 = vsel %vm519_vm2, %v1713_v47, 0.0 }
  0xaf   :  { %v530_v5 = vadd.f32 %v529_v28, %v528_v31 }
  0xb0   :  { %v726_v35 = vsel %vm519_vm2, %v658_v23, 0.0 }
  0xb1   :  { %v727_v11 = vadd.f32 %v726_v35, %v725_v3 }
  0xb4   :  { %v1745_v63 = vpop.f32.mrf.mxu2 }
  0xb5   :  { %v1717_v49 = vpop.f32.mrf.mxu0  ;;  %v1725_v53 = vpop.f32.mrf.mxu1 }
  0xb6   :  { %v659_v29 = vmul.f32 %v1717_v49, %v1717_v49  ;;  %v531_v40 = vsel %vm519_vm2, %v1717_v49, 0.0 }
  0xb7   :  { %v532_v12 = vadd.f32 %v531_v40, %v530_v5 }
  0xb8   :  { %v728_v7 = vsel %vm519_vm2, %v659_v29, 0.0 }
  0xb9   :  { %v729_v17 = vadd.f32 %v728_v7, %v727_v11 }
  0xbc   :  { %v1755_v4 = vpop.f32.mrf.mxu2 }
  0xbd   :  { %v1723_v52 = vpop.f32.mrf.mxu0  ;;  %v1733_v57 = vpop.f32.mrf.mxu1 }
  0xbe   :  { %v660_v45 = vmul.f32 %v1723_v52, %v1723_v52  ;;  %v533_v9 = vsel %vm519_vm2, %v1723_v52, 0.0 }
  0xbf   :  { %v534_v18 = vadd.f32 %v533_v9, %v532_v12 }
  0xc0   :  { %v730_v14 = vsel %vm519_vm2, %v660_v45, 0.0 }
  0xc1   :  { %v731_v23 = vadd.f32 %v730_v14, %v729_v17 }
  0xc4   :  { %v1792_v34 = vpop.f32.mrf.mxu2 }
  0xc5   :  { %v1731_v56 = vpop.f32.mrf.mxu0  ;;  %v1741_v61 = vpop.f32.mrf.mxu1 }
  0xc6   :  { %3256 = vst [vmem:[#allocation5_spill] sm:$0xff] %v1741_v61  ;;  %v661_v10 = vmul.f32 %v1731_v56, %v1731_v56  ;;  %v535_v15 = vsel %vm519_vm2, %v1731_v56, 0.0 }
  0xc7   :  { %v536_v24 = vadd.f32 %v535_v15, %v534_v18 }
  0xc8   :  { %v732_v19 = vsel %vm519_vm2, %v661_v10, 0.0  ;;  %v1834_v10 = vpop.f32.mrf.mxu3 }
  0xc9   :  { %v733_v30 = vadd.f32 %v732_v19, %v731_v23  ;;  %3261 = vst [vmem:[#allocation10_spill] sm:$0xff] %v1834_v10 }
  0xcc   :  { %v1825_v35 = vpop.f32.mrf.mxu2 }
  0xcd   :  { %v1737_v59 = vpop.f32.mrf.mxu0  ;;  %v1751_v2 = vpop.f32.mrf.mxu1  ;;  %3260 = vst [vmem:[#allocation9_spill] sm:$0xff] %v1825_v35 }
  0xce   :  { %3257 = vst [vmem:[#allocation6_spill] sm:$0xff] %v1751_v2  ;;  %v662_v16 = vmul.f32 %v1737_v59, %v1737_v59  ;;  %v537_v21 = vsel %vm519_vm2, %v1737_v59, 0.0 }
  0xcf   :  { %v538_v31 = vadd.f32 %v537_v21, %v536_v24 }
  0xd0   :  { %v734_v27 = vsel %vm519_vm2, %v662_v16, 0.0 }
  0xd1   :  { %v735_v5 = vadd.f32 %v734_v27, %v733_v30 }
  0xd5   :  { %v1743_v62 = vpop.f32.mrf.mxu0  ;;  %v1785_v26 = vpop.f32.mrf.mxu1 }
  0xd6   :  { %3259 = vst [vmem:[#allocation8_spill] sm:$0xff] %v1785_v26  ;;  %v663_v22 = vmul.f32 %v1743_v62, %v1743_v62  ;;  %v539_v28 = vsel %vm519_vm2, %v1743_v62, 0.0 }
  0xd7   :  { %v540_v7 = vadd.f32 %v539_v28, %v538_v31 }
  0xd8   :  { %v736_v40 = vsel %vm519_vm2, %v663_v22, 0.0 }
  0xd9   :  { %v737_v15 = vadd.f32 %v736_v40, %v735_v5  ;;  %v669_v5 = vmul.f32 %v1677_v33, %v1677_v33 }
  0xdd   :  { %v1749_v1 = vpop.f32.mrf.mxu0  ;;  %v1818_v25 = vpop.f32.mrf.mxu1 }
  0xde   :  { %v664_v29 = vmul.f32 %v1749_v1, %v1749_v1  ;;  %v541_v45 = vsel %vm519_vm2, %v1749_v1, 0.0 }
  0xdf   :  { %v542_v16 = vadd.f32 %v541_v45, %v540_v7 }
  0xe0   :  { %v738_v11 = vsel %vm519_vm2, %v664_v29, 0.0 }
  0xe1   :  { %v739_v21 = vadd.f32 %v738_v11, %v737_v15  ;;  %v1862_v15 = vpop.f32.mrf.mxu3 }
  0xe2   :  { %3263 = vst [vmem:[#allocation12_spill] sm:$0xff] %v1862_v15 }
  0xe5   :  { %v1778_v20 = vpop.f32.mrf.mxu0  ;;  %v1849_v29 = vpop.f32.mrf.mxu1 }
  0xe6   :  { %v665_v3 = vmul.f32 %v1778_v20, %v1778_v20  ;;  %v543_v12 = vsel %vm519_vm2, %v1778_v20, 0.0 }
  0xe7   :  { %v544_v22 = vadd.f32 %v543_v12, %v542_v16  ;;  %v551_v16 = vsel %vm519_vm2, %v1677_v33, 0.0 }
  0xe8   :  { %v740_v17 = vsel %vm519_vm2, %v665_v3, 0.0  ;;  %v1854_v3 = vpop.f32.mrf.mxu2 }
  0xe9   :  { %v741_v27 = vadd.f32 %v740_v17, %v739_v21  ;;  %3262 = vst [vmem:[#allocation11_spill] sm:$0xff] %v1854_v3  ;;  %v670_v17 = vmul.f32 %v1689_v37, %v1689_v37 }
  0xed   :  { %v1806_v13 = vpop.f32.mrf.mxu0 }
  0xee   :  { %v666_v14 = vmul.f32 %v1806_v13, %v1806_v13  ;;  %v545_v18 = vsel %vm519_vm2, %v1806_v13, 0.0 }
  0xef   :  { %v546_v28 = vadd.f32 %v545_v18, %v544_v22  ;;  %v748_v22 = vsel %vm519_vm2, %v669_v5, 0.0 }
  0xf0   :  { %v742_v23 = vsel %vm519_vm2, %v666_v14, 0.0 }
  0xf1   :  { %v743_v31 = vadd.f32 %v742_v23, %v741_v27  ;;  %v553_v23 = vsel %vm519_vm2, %v1689_v37, 0.0 }
  0xf5   :  { %v1832_v9 = vpop.f32.mrf.mxu0 }
  0xf6   :  { %v667_v19 = vmul.f32 %v1832_v9, %v1832_v9  ;;  %v547_v24 = vsel %vm519_vm2, %v1832_v9, 0.0 }
  0xf7   :  { %v548_v40 = vadd.f32 %v547_v24, %v546_v28  ;;  %v671_v24 = vmul.f32 %v1693_v39, %v1693_v39 }
  0xf8   :  { %v744_v30 = vsel %vm519_vm2, %v667_v19, 0.0 }
  0xf9   :  { %v745_v12 = vadd.f32 %v744_v30, %v743_v31  ;;  %v750_v30 = vsel %vm519_vm2, %v670_v17, 0.0  ;;  %v555_v31 = vsel %vm519_vm2, %v1693_v39, 0.0  ;;  %v752_v5 = vsel %vm519_vm2, %v671_v24, 0.0 }
  0xfd   :  { %v1852_v45 = vpop.f32.mrf.mxu0 }
  0xfe   :  { %v549_v7 = vsel %vm519_vm2, %v1852_v45, 0.0  ;;  %v668_v11 = vmul.f32 %v1852_v45, %v1852_v45 }
  0xff   :  { %v550_v14 = vadd.f32 %v549_v7, %v548_v40  ;;  %v672_v40 = vmul.f32 %v1701_v42, %v1701_v42 }
 0x100   :  { %v746_v18 = vsel %vm519_vm2, %v668_v11, 0.0 }
 0x101   :  { %v552_v19 = vadd.f32 %v551_v16, %v550_v14  ;;  %v747_v21 = vadd.f32 %v746_v18, %v745_v12  ;;  %v1879_v12 = vpop.f32.mrf.mxu1  ;;  %v557_v14 = vsel %vm519_vm2, %v1701_v42, 0.0  ;;  %v673_v16 = vmul.f32 %v1711_v46, %v1711_v46 }
 0x102   :  { %3264 = vst [vmem:[#allocation13_spill] sm:$0xff] %v1879_v12 }
 0x103   :  { %v554_v27 = vadd.f32 %v553_v23, %v552_v19  ;;  %v749_v28 = vadd.f32 %v748_v22, %v747_v21  ;;  %v1886_v19 = vpop.f32.mrf.mxu2  ;;  %v754_v21 = vsel %vm519_vm2, %v672_v40, 0.0  ;;  %v559_v22 = vsel %vm519_vm2, %v1711_v46, 0.0 }
 0x104   :  { %v674_v23 = vmul.f32 %v1719_v50, %v1719_v50 }
 0x105   :  { %v556_v7 = vadd.f32 %v555_v31, %v554_v27  ;;  %v751_v11 = vadd.f32 %v750_v30, %v749_v28  ;;  %v1893_v28 = vpop.f32.mrf.mxu3  ;;  %v756_v30 = vsel %vm519_vm2, %v673_v16, 0.0  ;;  %v561_v31 = vsel %vm519_vm2, %v1719_v50, 0.0 }
 0x106   :  { %3265 = vst [vmem:[#allocation14_spill] sm:$0xff] %v1893_v28  ;;  %v677_v50 = vmul.f32 %v1741_v61, %v1741_v61 }
 0x107   :  { %v558_v18 = vadd.f32 %v557_v14, %v556_v7  ;;  %v753_v17 = vadd.f32 %v752_v5, %v751_v11  ;;  %v675_v7 = vmul.f32 %v1725_v53, %v1725_v53  ;;  %v758_v5 = vsel %vm519_vm2, %v674_v23, 0.0 }
 0x108   :  { %v563_v14 = vsel %vm519_vm2, %v1725_v53, 0.0 }
 0x109   :  { %v560_v27 = vadd.f32 %v559_v22, %v558_v18  ;;  %v755_v24 = vadd.f32 %v754_v21, %v753_v17  ;;  %v676_v18 = vmul.f32 %v1733_v57, %v1733_v57  ;;  %v760_v16 = vsel %vm519_vm2, %v675_v7, 0.0 }
 0x10a   :  { %v565_v22 = vsel %vm519_vm2, %v1733_v57, 0.0 }
 0x10b   :  { %v562_v11 = vadd.f32 %v561_v31, %v560_v27  ;;  %v757_v40 = vadd.f32 %v756_v30, %v755_v24  ;;  %v1910_v30 = vpop.f32.mrf.mxu1  ;;  %v762_v23 = vsel %vm519_vm2, %v676_v18, 0.0  ;;  %v567_v31 = vsel %vm519_vm2, %v1741_v61, 0.0 }
 0x10c   :  { %3266 = vst [vmem:[#allocation15_spill] sm:$0xff] %v1910_v30 }
 0x10d   :  { %v759_v17 = vadd.f32 %v758_v5, %v757_v40  ;;  %v564_v21 = vadd.f32 %v563_v14, %v562_v11  ;;  %v678_v11 = vmul.f32 %v1751_v2, %v1751_v2  ;;  %v1917_v5 = vpop.f32.mrf.mxu2  ;;  %v764_v14 = vsel %vm519_vm2, %v677_v50, 0.0 }
 0x10f   :  { %v566_v27 = vadd.f32 %v565_v22, %v564_v21  ;;  %v761_v24 = vadd.f32 %v760_v16, %v759_v17  ;;  %v569_v21 = vsel %vm519_vm2, %v1751_v2, 0.0  ;;  %v679_v17 = vmul.f32 %v1785_v26, %v1785_v26  ;;  %v1924_v22 = vpop.f32.mrf.mxu3 }
 0x110   :  { %3267 = vst [vmem:[#allocation16_spill] sm:$0xff] %v1924_v22  ;;  %v766_v61 = vsel %vm519_vm2, %v678_v11, 0.0  ;;  %v573_v2 = vsel %vm519_vm2, %v1818_v25, 0.0 }
 0x111   :  { %v568_v40 = vadd.f32 %v567_v31, %v566_v27  ;;  %v763_v7 = vadd.f32 %v762_v23, %v761_v24  ;;  %v571_v27 = vsel %vm519_vm2, %v1785_v26, 0.0  ;;  %v680_v24 = vmul.f32 %v1818_v25, %v1818_v25 }
 0x112   :  { %v768_v31 = vsel %vm519_vm2, %v679_v17, 0.0  ;;  %v682_v26 = vmul.f32 %v1879_v12, %v1879_v12 }
 0x113   :  { %v570_v16 = vadd.f32 %v569_v21, %v568_v40  ;;  %v765_v18 = vadd.f32 %v764_v14, %v763_v7  ;;  %v681_v40 = vmul.f32 %v1849_v29, %v1849_v29  ;;  %v770_v11 = vsel %vm519_vm2, %v680_v24, 0.0 }
 0x114   :  { %v575_v21 = vsel %vm519_vm2, %v1849_v29, 0.0 }
 0x115   :  { %v572_v23 = vadd.f32 %v571_v27, %v570_v16  ;;  %v767_v50 = vadd.f32 %v766_v61, %v765_v18  ;;  %v1941_v18 = vpop.f32.mrf.mxu1  ;;  %v772_v17 = vsel %vm519_vm2, %v681_v40, 0.0  ;;  %v577_v27 = vsel %vm519_vm2, %v1879_v12, 0.0 }
 0x116   :  { %3268 = vst [vmem:[#allocation17_spill] sm:$0xff] %v1941_v18  ;;  %v685_v12 = vmul.f32 %v1703_v43, %v1703_v43 }
 0x117   :  { %v574_v7 = vadd.f32 %v573_v2, %v572_v23  ;;  %v769_v14 = vadd.f32 %v768_v31, %v767_v50  ;;  %v683_v2 = vmul.f32 %v1910_v30, %v1910_v30  ;;  %v1948_v50 = vpop.f32.mrf.mxu2  ;;  %v774_v31 = vsel %vm519_vm2, %v682_v26, 0.0 }
 0x119   :  { %v576_v16 = vadd.f32 %v575_v21, %v574_v7  ;;  %v771_v61 = vadd.f32 %v770_v11, %v769_v14  ;;  %v579_v7 = vsel %vm519_vm2, %v1910_v30, 0.0  ;;  %v684_v14 = vmul.f32 %v1941_v18, %v1941_v18  ;;  %v1955_v21 = vpop.f32.mrf.mxu3 }
 0x11a   :  { %3269 = vst [vmem:[#allocation18_spill] sm:$0xff] %v1955_v21  ;;  %v686_v30 = vmul.f32 %v1715_v48, %v1715_v48 }
 0x11b   :  { %v773_v23 = vadd.f32 %v772_v17, %v771_v61  ;;  %v578_v24 = vadd.f32 %v577_v27, %v576_v16  ;;  %v776_v61 = vsel %vm519_vm2, %v683_v2, 0.0  ;;  %v581_v16 = vsel %vm519_vm2, %v1941_v18, 0.0 }
 0x11c   :  { %v583_v27 = vsel %vm519_vm2, %v1703_v43, 0.0  ;;  %v585_v2 = vsel %vm519_vm2, %v1715_v48, 0.0  ;;  %v687_v18 = vmul.f32 %v1721_v51, %v1721_v51 }
 0x11d   :  { %v775_v11 = vadd.f32 %v774_v31, %v773_v23  ;;  %v580_v40 = vadd.f32 %v579_v7, %v578_v24  ;;  %v778_v23 = vsel %vm519_vm2, %v684_v14, 0.0  ;;  %v780_v7 = vsel %vm519_vm2, %v685_v12, 0.0 }
 0x11e   :  { %v688_v14 = vmul.f32 %v1727_v54, %v1727_v54  ;;  %v784_v12 = vsel %vm519_vm2, %v687_v18, 0.0 }
 0x11f   :  { %v777_v17 = vadd.f32 %v776_v61, %v775_v11  ;;  %v582_v26 = vadd.f32 %v581_v16, %v580_v40  ;;  %v782_v61 = vsel %vm519_vm2, %v686_v30, 0.0  ;;  %v587_v16 = vsel %vm519_vm2, %v1721_v51, 0.0 }
 0x121   :  { %v584_v24 = vadd.f32 %v583_v27, %v582_v26  ;;  %v779_v31 = vadd.f32 %v778_v23, %v777_v17  ;;  %v1977_v27 = vpop.f32.mrf.mxu2  ;;  %v589_v23 = vsel %vm519_vm2, %v1727_v54, 0.0  ;;  %v593_v54 = vsel %vm519_vm2, %v1745_v63, 0.0 }
 0x122   :  { %3270 = vst [vmem:[#allocation19_spill] sm:$0xff] %v1977_v27 }
 0x123   :  { %v586_v11 = vadd.f32 %v585_v2, %v584_v24  ;;  %v781_v40 = vadd.f32 %v780_v7, %v779_v31  ;;  %v689_v24 = vmul.f32 %v1735_v58, %v1735_v58  ;;  %v1984_v7 = vpop.f32.mrf.mxu3  ;;  %v786_v2 = vsel %vm519_vm2, %v688_v14, 0.0 }
 0x124   :  { %3271 = vst [vmem:[#allocation20_spill] sm:$0xff] %v1984_v7 }
 0x125   :  { %v588_v26 = vadd.f32 %v587_v16, %v586_v11  ;;  %v783_v17 = vadd.f32 %v782_v61, %v781_v40  ;;  %v591_v11 = vsel %vm519_vm2, %v1735_v58, 0.0  ;;  %v690_v40 = vmul.f32 %v1745_v63, %v1745_v63 }
 0x126   :  { %v788_v16 = vsel %vm519_vm2, %v689_v24, 0.0  ;;  %v692_v58 = vmul.f32 %v1792_v34, %v1792_v34 }
 0x127   :  { %v590_v31 = vadd.f32 %v589_v23, %v588_v26  ;;  %v785_v30 = vadd.f32 %v784_v12, %v783_v17  ;;  %v691_v26 = vmul.f32 %v1755_v4, %v1755_v4  ;;  %v790_v14 = vsel %vm519_vm2, %v690_v40, 0.0 }
 0x128   :  { %v595_v23 = vsel %vm519_vm2, %v1755_v4, 0.0  ;;  %v794_v40 = vsel %vm519_vm2, %v692_v58, 0.0 }
 0x129   :  { %v592_v61 = vadd.f32 %v591_v11, %v590_v31  ;;  %v787_v18 = vadd.f32 %v786_v2, %v785_v30  ;;  %v792_v24 = vsel %vm519_vm2, %v691_v26, 0.0  ;;  %v597_v2 = vsel %vm519_vm2, %v1792_v34, 0.0 }
 0x12a   :  { %v693_v11 = vmul.f32 %v1825_v35, %v1825_v35 }
 0x12b   :  { %v594_v17 = vadd.f32 %v593_v54, %v592_v61  ;;  %v789_v12 = vadd.f32 %v788_v16, %v787_v18  ;;  %v2006_v18 = vpop.f32.mrf.mxu2  ;;  %v599_v16 = vsel %vm519_vm2, %v1825_v35, 0.0  ;;  %v603_v35 = vsel %vm519_vm2, %v1886_v19, 0.0 }
 0x12c   :  { %3272 = vst [vmem:[#allocation21_spill] sm:$0xff] %v2006_v18 }
 0x12d   :  { %v791_v31 = vadd.f32 %v790_v14, %v789_v12  ;;  %v596_v30 = vadd.f32 %v595_v23, %v594_v17  ;;  %v694_v17 = vmul.f32 %v1854_v3, %v1854_v3  ;;  %v2013_v14 = vpop.f32.mrf.mxu3  ;;  %v796_v23 = vsel %vm519_vm2, %v693_v11, 0.0 }
 0x12e   :  { %3273 = vst [vmem:[#allocation22_spill] sm:$0xff] %v2013_v14 }
 0x12f   :  { %v598_v54 = vadd.f32 %v597_v2, %v596_v30  ;;  %v793_v61 = vadd.f32 %v792_v24, %v791_v31  ;;  %v601_v30 = vsel %vm519_vm2, %v1854_v3, 0.0  ;;  %v695_v31 = vmul.f32 %v1886_v19, %v1886_v19 }
 0x130   :  { %v798_v2 = vsel %vm519_vm2, %v694_v17, 0.0  ;;  %v697_v3 = vmul.f32 %v1948_v50, %v1948_v50 }
 0x131   :  { %v600_v12 = vadd.f32 %v599_v16, %v598_v54  ;;  %v795_v26 = vadd.f32 %v794_v40, %v793_v61  ;;  %v696_v54 = vmul.f32 %v1917_v5, %v1917_v5  ;;  %v800_v11 = vsel %vm519_vm2, %v695_v31, 0.0 }
 0x132   :  { %v605_v16 = vsel %vm519_vm2, %v1917_v5, 0.0  ;;  %v804_v31 = vsel %vm519_vm2, %v697_v3, 0.0 }
 0x133   :  { %v602_v24 = vadd.f32 %v601_v30, %v600_v12  ;;  %v797_v58 = vadd.f32 %v796_v23, %v795_v26  ;;  %v802_v17 = vsel %vm519_vm2, %v696_v54, 0.0  ;;  %v607_v23 = vsel %vm519_vm2, %v1948_v50, 0.0 }
 0x134   :  { %v698_v30 = vmul.f32 %v1977_v27, %v1977_v27 }
 0x135   :  { %v604_v61 = vadd.f32 %v603_v35, %v602_v24  ;;  %v799_v40 = vadd.f32 %v798_v2, %v797_v58  ;;  %v2035_v58 = vpop.f32.mrf.mxu2  ;;  %v609_v2 = vsel %vm519_vm2, %v1977_v27, 0.0 }
 0x137   :  { %v606_v12 = vadd.f32 %v605_v16, %v604_v61  ;;  %v801_v26 = vadd.f32 %v800_v11, %v799_v40  ;;  %v699_v61 = vmul.f32 %v2006_v18, %v2006_v18  ;;  %v2042_v11 = vpop.f32.mrf.mxu3  ;;  %v806_v16 = vsel %vm519_vm2, %v698_v30, 0.0 }
 0x138   :  { %3274 = vst [vmem:[#allocation23_spill] sm:$0xff] %v2042_v11  ;;  %v615_v30 = vsel %vm519_vm2, %v1729_v55, 0.0 }
 0x139   :  { %v803_v35 = vadd.f32 %v802_v17, %v801_v26  ;;  %v608_v24 = vadd.f32 %v607_v23, %v606_v12  ;;  %v611_v26 = vsel %vm519_vm2, %v2006_v18, 0.0  ;;  %v700_v12 = vmul.f32 %v2035_v58, %v2035_v58 }
 0x13a   :  { %v701_v23 = vmul.f32 %v1729_v55, %v1729_v55  ;;  %v808_v27 = vsel %vm519_vm2, %v699_v61, 0.0  ;;  %v617_v61 = vsel %vm519_vm2, %v1739_v60, 0.0 }
 0x13b   :  { %v805_v40 = vadd.f32 %v804_v31, %v803_v35  ;;  %v610_v54 = vadd.f32 %v609_v2, %v608_v24  ;;  %v613_v35 = vsel %vm519_vm2, %v2035_v58, 0.0  ;;  %v702_v2 = vmul.f32 %v1739_v60, %v1739_v60 }
 0x13c   :  { %v810_v18 = vsel %vm519_vm2, %v700_v12, 0.0  ;;  %v704_v12 = vmul.f32 %v1763_v8, %v1763_v8 }
 0x13d   :  { %v807_v17 = vadd.f32 %v806_v16, %v805_v40  ;;  %v612_v3 = vadd.f32 %v611_v26, %v610_v54  ;;  %v812_v16 = vsel %vm519_vm2, %v701_v23, 0.0  ;;  %v703_v26 = vmul.f32 %v1747_v0, %v1747_v0 }
 0x13f   :  { %v809_v24 = vadd.f32 %v808_v27, %v807_v17  ;;  %v614_v31 = vadd.f32 %v613_v35, %v612_v3  ;;  %v814_v3 = vsel %vm519_vm2, %v702_v2, 0.0  ;;  %v619_v35 = vsel %vm519_vm2, %v1747_v0, 0.0 }
 0x140   :  { %v816_v23 = vsel %vm519_vm2, %v703_v26, 0.0 }
 0x141   :  { %v616_v40 = vadd.f32 %v615_v30, %v614_v31  ;;  %v811_v54 = vadd.f32 %v810_v18, %v809_v24  ;;  %v2069_v24 = vpop.f32.mrf.mxu3  ;;  %v621_v30 = vsel %vm519_vm2, %v1763_v8, 0.0  ;;  %v707_v8 = vmul.f32 %v1862_v15, %v1862_v15 }
 0x142   :  { %3275 = vst [vmem:[#allocation24_spill] sm:$0xff] %v2069_v24 }
 0x143   :  { %v618_v27 = vadd.f32 %v617_v61, %v616_v40  ;;  %v813_v17 = vadd.f32 %v812_v16, %v811_v54  ;;  %v705_v40 = vmul.f32 %v1799_v6, %v1799_v6  ;;  %v818_v16 = vsel %vm519_vm2, %v704_v12, 0.0 }
 0x144   :  { %v623_v61 = vsel %vm519_vm2, %v1799_v6, 0.0 }
 0x145   :  { %v620_v31 = vadd.f32 %v619_v35, %v618_v27  ;;  %v815_v18 = vadd.f32 %v814_v3, %v813_v17  ;;  %v706_v27 = vmul.f32 %v1834_v10, %v1834_v10  ;;  %v820_v26 = vsel %vm519_vm2, %v705_v40, 0.0 }
 0x146   :  { %v625_v35 = vsel %vm519_vm2, %v1834_v10, 0.0  ;;  %v824_v40 = vsel %vm519_vm2, %v707_v8, 0.0 }
 0x147   :  { %v622_v54 = vadd.f32 %v621_v30, %v620_v31  ;;  %v817_v2 = vadd.f32 %v816_v23, %v815_v18  ;;  %v822_v12 = vsel %vm519_vm2, %v706_v27, 0.0  ;;  %v627_v23 = vsel %vm519_vm2, %v1862_v15, 0.0 }
 0x148   :  { %v708_v30 = vmul.f32 %v1893_v28, %v1893_v28 }
 0x149   :  { %v624_v17 = vadd.f32 %v623_v61, %v622_v54  ;;  %v819_v3 = vadd.f32 %v818_v16, %v817_v2  ;;  %v629_v16 = vsel %vm519_vm2, %v1893_v28, 0.0  ;;  %v709_v61 = vmul.f32 %v1924_v22, %v1924_v22 }
 0x14a   :  { %v826_v27 = vsel %vm519_vm2, %v708_v30, 0.0 }
 0x14b   :  { %v626_v31 = vadd.f32 %v625_v35, %v624_v17  ;;  %v821_v18 = vadd.f32 %v820_v26, %v819_v3  ;;  %v2096_v26 = vpop.f32.mrf.mxu3  ;;  %v631_v35 = vsel %vm519_vm2, %v1924_v22, 0.0  ;;  %v712_v22 = vmul.f32 %v2013_v14, %v2013_v14 }
 0x14c   :  { %3276 = vst [vmem:[#allocation25_spill] sm:$0xff] %v2096_v26 }
 0x14d   :  { %v823_v54 = vadd.f32 %v822_v12, %v821_v18  ;;  %v628_v2 = vadd.f32 %v627_v23, %v626_v31  ;;  %v710_v31 = vmul.f32 %v1955_v21, %v1955_v21  ;;  %v828_v12 = vsel %vm519_vm2, %v709_v61, 0.0 }
 0x14e   :  { %v633_v23 = vsel %vm519_vm2, %v1955_v21, 0.0 }
 0x14f   :  { %v630_v17 = vadd.f32 %v629_v16, %v628_v2  ;;  %v825_v3 = vadd.f32 %v824_v40, %v823_v54  ;;  %v711_v54 = vmul.f32 %v1984_v7, %v1984_v7  ;;  %v830_v30 = vsel %vm519_vm2, %v710_v31, 0.0 }
 0x150   :  { %v635_v16 = vsel %vm519_vm2, %v1984_v7, 0.0  ;;  %v834_v31 = vsel %vm519_vm2, %v712_v22, 0.0 }
 0x151   :  { %v632_v18 = vadd.f32 %v631_v35, %v630_v17  ;;  %v827_v8 = vadd.f32 %v826_v27, %v825_v3  ;;  %v832_v61 = vsel %vm519_vm2, %v711_v54, 0.0  ;;  %v637_v27 = vsel %vm519_vm2, %v2013_v14, 0.0 }
 0x152   :  { %v713_v35 = vmul.f32 %v2042_v11, %v2042_v11 }
 0x153   :  { %v634_v2 = vadd.f32 %v633_v23, %v632_v18  ;;  %v829_v40 = vadd.f32 %v828_v12, %v827_v8  ;;  %v639_v12 = vsel %vm519_vm2, %v2042_v11, 0.0  ;;  %v714_v23 = vmul.f32 %v2069_v24, %v2069_v24 }
 0x154   :  { %v836_v54 = vsel %vm519_vm2, %v713_v35, 0.0 }
 0x155   :  { %v636_v17 = vadd.f32 %v635_v16, %v634_v2  ;;  %v831_v3 = vadd.f32 %v830_v30, %v829_v40  ;;  %v516_v30 = vpop.f32.mrf.mxu3  ;;  %v641_v16 = vsel %vm519_vm2, %v2069_v24, 0.0  ;;  %v838_v22 = vsel %vm519_vm2, %v714_v23, 0.0 }
 0x156   :  { %v716_v11 = vmul.f32 %v516_v30, %v516_v30  ;;  %v645_v35 = vsel %vm519_vm2, %v516_v30, 0.0 }
 0x157   :  { %v638_v18 = vadd.f32 %v637_v27, %v636_v17  ;;  %v833_v8 = vadd.f32 %v832_v61, %v831_v3  ;;  %v715_v17 = vmul.f32 %v2096_v26, %v2096_v26  ;;  %v643_v27 = vsel %vm519_vm2, %v2096_v26, 0.0 }
 0x158   :  { %v842_v24 = vsel %vm519_vm2, %v716_v11, 0.0 }
 0x159   :  { %v835_v2 = vadd.f32 %v834_v31, %v833_v8  ;;  %v640_v40 = vadd.f32 %v639_v12, %v638_v18  ;;  %v840_v18 = vsel %vm519_vm2, %v715_v17, 0.0 }
 0x15b   :  { %v837_v3 = vadd.f32 %v836_v54, %v835_v2  ;;  %v642_v61 = vadd.f32 %v641_v16, %v640_v40 }
 0x15d   :  { %v839_v14 = vadd.f32 %v838_v22, %v837_v3  ;;  %v644_v8 = vadd.f32 %v643_v27, %v642_v61 }
 0x15f   :  { %v841_v31 = vadd.f32 %v840_v18, %v839_v14  ;;  %v646_v12 = vadd.f32 %v645_v35, %v644_v8 }
 0x161   :  { %v647_v7 = vrot.slane %v646_v12, 4  ;;  %v843_v21 = vadd.f32 %v842_v24, %v841_v31 }
 0x163   :  { %v648_v2 = vadd.f32 %v647_v7, %v646_v12  ;;  %v844_v40 = vrot.slane %v843_v21, 4 }
 0x165   :  { %v649_v54 = vrot.slane %v648_v2, 2  ;;  %v845_v23 = vadd.f32 %v844_v40, %v843_v21 }
 0x167   :  { %v650_v16 = vadd.f32 %v649_v54, %v648_v2  ;;  %v846_v28 = vrot.slane %v845_v23, 2 }
 0x169   :  { %v651_v26 = vrot.slane %v650_v16, 1  ;;  %v847_v15 = vadd.f32 %v846_v28, %v845_v23 }
 0x16b   :  { %v652_v3 = vadd.f32 %v651_v26, %v650_v16  ;;  %v848_v61 = vrot.slane %v847_v15, 1 }
 0x16d   :  { %v849_v22 = vadd.f32 %v848_v61, %v847_v15  ;;  %v850_v17 = vmul.f32 0.001953125, %v652_v3  ;;  %v855_v15 = vld [vmem:[%s3212_s2] sm:$0x1] }
 0x16f   :  { %v851_v27 = vmul.f32 0.001953125, %v849_v22  ;;  %v852_v10 = vmul.f32 %v850_v17, %v850_v17 }
 0x171   :  { %v853_v14 = vsub.f32 %v851_v27, %v852_v10  ;;  %v868_v10 = vld [vmem:[%s3213_s3] sm:$0x1] }
 0x172   :  { %v3278_v27 = vld [vmem:[#allocation2_spill] sm:$0xff] }
 0x173   :  { %v854_v8 = vmax.f32 %v853_v14, 0.0  ;;  %v3279_v14 = vld [vmem:[#allocation5_spill] sm:$0xff] }
 0x175   :  { %v856_v18 = vadd.f32 1e-05, %v854_v8  ;;  %v3280_v8 = vld [vmem:[#allocation6_spill] sm:$0xff] }
 0x177   :  { %1530 = vrsqrt.f32 %v856_v18  ;;  %vm863_vm4 = vweird.f32 %v856_v18 }
 0x17d   :  { %v1531_v11 = vpop.eup %1530 }
 0x17e   :  { %v858_v24 = vmul.f32 %v1531_v11, %v856_v18  ;;  %vm864_vm3 = vweird.f32 %v1531_v11  ;;  %v3281_v18 = vld [vmem:[#allocation8_spill] sm:$0xff] }
 0x17f   :  { %vm865_vm5 = vmor %vm863_vm4, %vm864_vm3 }
 0x180   :  { %v859_v7 = vmul.f32 %v1531_v11, %v858_v24  ;;  %v3282_v24 = vld [vmem:[#allocation13_spill] sm:$0xff] }
 0x182   :  { %v860_v35 = vmul.f32 0.5, %v859_v7 }
 0x184   :  { %v861_v31 = vsub.f32 1.5, %v860_v35  ;;  %v3283_v35 = vld [vmem:[#allocation15_spill] sm:$0xff] }
 0x186   :  { %v862_v21 = vmul.f32 %v1531_v11, %v861_v31 }
 0x188   :  { %v866_v28 = vsel %vm865_vm5, %v1531_v11, %v862_v21  ;;  %v3284_v21 = vld [vmem:[#allocation17_spill] sm:$0xff] }
 0x189   :  { %v867_v26 = vmul.f32 %v866_v28, %v855_v15 }
 0x18b   :  { %v869_v12 = vmul.f32 %v867_v26, %v850_v17  ;;  %v2140_v40 = vperm.slane %v867_v26, 0  ;;  %v3285_v26 = vld [vmem:[#allocation3_spill] sm:$0xff] }
 0x18d   :  { %v870_v2 = vsub.f32 %v868_v10, %v869_v12  ;;  %v937_v23 = vmul.f32 %v2140_v40, %v516_v30  ;;  %v2150_v3 = vmul.f32 %v2140_v40, %v1675_v32  ;;  %v2154_v61 = vmul.f32 %v2140_v40, %v1687_v36  ;;  %v3286_v10 = vld [vmem:[#allocation4_spill] sm:$0xff] }
 0x18e   :  { %v2158_v22 = vmul.f32 %v2140_v40, %v1691_v38  ;;  %v2162_v17 = vmul.f32 %v2140_v40, %v1699_v41  ;;  %v2166_v30 = vmul.f32 %v2140_v40, %v1705_v44  ;;  %v2170_v32 = vmul.f32 %v2140_v40, %v1713_v47 }
 0x18f   :  { %v2142_v54 = vperm.slane %v870_v2, 0  ;;  %v2174_v36 = vmul.f32 %v2140_v40, %v1717_v49  ;;  %v2178_v38 = vmul.f32 %v2140_v40, %v1723_v52  ;;  %v2182_v41 = vmul.f32 %v2140_v40, %v1731_v56 }
 0x190   :  { %v2186_v44 = vmul.f32 %v2140_v40, %v1737_v59  ;;  %v2190_v47 = vmul.f32 %v2140_v40, %v1743_v62  ;;  %v2194_v49 = vmul.f32 %v2140_v40, %v1749_v1  ;;  %v2198_v52 = vmul.f32 %v2140_v40, %v1778_v20 }
 0x191   :  { %v2146_v16 = vadd.f32 %v2142_v54, %v937_v23  ;;  %v2202_v56 = vmul.f32 %v2140_v40, %v1806_v13  ;;  %v2206_v59 = vmul.f32 %v2140_v40, %v1832_v9  ;;  %v2210_v62 = vmul.f32 %v2140_v40, %v1852_v45  ;;  %v3287_v23 = vld [vmem:[#allocation9_spill] sm:$0xff] }
 0x192   :  { %v2214_v1 = vmul.f32 %v2140_v40, %v1677_v33  ;;  %v2218_v20 = vmul.f32 %v2140_v40, %v1689_v37  ;;  %v2222_v13 = vmul.f32 %v2140_v40, %v1693_v39  ;;  %v2226_v9 = vmul.f32 %v2140_v40, %v1701_v42 }
 0x193   :  { %3277 = vst [vmem:[#allocation26_spill] sm:$0xff] %v2146_v16  ;;  %v2230_v45 = vmul.f32 %v2140_v40, %v1711_v46  ;;  %v2234_v33 = vmul.f32 %v2140_v40, %v3278_v27  ;;  %v2238_v37 = vmul.f32 %v2140_v40, %v1725_v53  ;;  %v2242_v39 = vmul.f32 %v2140_v40, %v1733_v57  ;;  %v3300_v16 = vld [vmem:[#allocation16_spill] sm:$0xff] }
 0x194   :  { %v2246_v42 = vmul.f32 %v2140_v40, %v3279_v14  ;;  %v2250_v46 = vmul.f32 %v2140_v40, %v3280_v8  ;;  %v2254_v11 = vmul.f32 %v2140_v40, %v3281_v18  ;;  %v2258_v53 = vmul.f32 %v2140_v40, %v1818_v25  ;;  %v3288_v14 = vld [vmem:[#allocation11_spill] sm:$0xff] }
 0x195   :  { %v2262_v57 = vmul.f32 %v2140_v40, %v1849_v29  ;;  %v2266_v7 = vmul.f32 %v2140_v40, %v3282_v24  ;;  %v2270_v31 = vmul.f32 %v2140_v40, %v3283_v35  ;;  %v2274_v15 = vmul.f32 %v2140_v40, %v3284_v21  ;;  %v3289_v18 = vld [vmem:[#allocation19_spill] sm:$0xff]  ;;  %v3290_v35 = vld [vmem:[#allocation21_spill] sm:$0xff] }
 0x196   :  { %v2278_v25 = vmul.f32 %v2140_v40, %v1703_v43  ;;  %v2282_v29 = vmul.f32 %v2140_v40, %v1715_v48  ;;  %v2286_v28 = vmul.f32 %v2140_v40, %v1721_v51  ;;  %v2290_v12 = vmul.f32 %v2140_v40, %v3285_v26 }
 0x197   :  { %v2294_v2 = vmul.f32 %v2140_v40, %v3286_v10  ;;  %v2298_v43 = vmul.f32 %v2140_v40, %v1745_v63  ;;  %v2302_v48 = vmul.f32 %v2140_v40, %v1755_v4  ;;  %v2306_v51 = vmul.f32 %v2140_v40, %v1792_v34  ;;  %v3291_v10 = vld [vmem:[#allocation7_spill] sm:$0xff] }
 0x198   :  { %v2310_v27 = vmul.f32 %v2140_v40, %v3287_v23  ;;  %v2314_v8 = vmul.f32 %v2140_v40, %v3288_v14  ;;  %v2318_v63 = vmul.f32 %v2140_v40, %v1886_v19  ;;  %v2322_v4 = vmul.f32 %v2140_v40, %v1917_v5  ;;  %v3294_v14 = vld [vmem:[#allocation10_spill] sm:$0xff] }
 0x199   :  { %v2326_v34 = vmul.f32 %v2140_v40, %v1948_v50  ;;  %v2330_v24 = vmul.f32 %v2140_v40, %v3289_v18  ;;  %v2334_v21 = vmul.f32 %v2140_v40, %v3290_v35  ;;  %v2338_v19 = vmul.f32 %v2140_v40, %v2035_v58  ;;  %v3296_v18 = vld [vmem:[#allocation12_spill] sm:$0xff]  ;;  %v3298_v35 = vld [vmem:[#allocation14_spill] sm:$0xff] }
 0x19a   :  { %v2342_v5 = vmul.f32 %v2140_v40, %v1729_v55  ;;  %v2346_v50 = vmul.f32 %v2140_v40, %v1739_v60  ;;  %v2350_v26 = vmul.f32 %v2140_v40, %v1747_v0  ;;  %v2354_v23 = vmul.f32 %v2140_v40, %v3291_v10 }
 0x19b   :  { %v2358_v58 = vmul.f32 %v2140_v40, %v1799_v6  ;;  %v2362_v55 = vmul.f32 %v2140_v40, %v3294_v14  ;;  %v2366_v60 = vmul.f32 %v2140_v40, %v3296_v18  ;;  %v2370_v0 = vmul.f32 %v2140_v40, %v3298_v35 }
 0x19c   :  { %3292 = vst [vmem:[#allocation2_spill] sm:$0xff] %v2354_v23  ;;  %v2374_v10 = vmul.f32 %v2140_v40, %v3300_v16  ;;  %v3302_v23 = vld [vmem:[#allocation18_spill] sm:$0xff] }
 0x19d   :  { %3293 = vst [vmem:[#allocation5_spill] sm:$0xff] %v2358_v58  ;;  %v2378_v6 = vmul.f32 %v2140_v40, %v3302_v23  ;;  %v3303_v58 = vld [vmem:[#allocation20_spill] sm:$0xff] }
 0x19e   :  { %3295 = vst [vmem:[#allocation6_spill] sm:$0xff] %v2362_v55  ;;  %v2382_v14 = vmul.f32 %v2140_v40, %v3303_v58  ;;  %v3304_v55 = vld [vmem:[#allocation22_spill] sm:$0xff]  ;;  %v2402_v58 = vadd.f32 %v2142_v54, %v2150_v3  ;;  %v2422_v3 = vadd.f32 %v2142_v54, %v2170_v32  ;;  %v2442_v32 = vadd.f32 %v2142_v54, %v2190_v47 }
 0x19f   :  { %3297 = vst [vmem:[#allocation8_spill] sm:$0xff] %v2366_v60  ;;  %v2386_v18 = vmul.f32 %v2140_v40, %v3304_v55  ;;  %v3305_v60 = vld [vmem:[#allocation23_spill] sm:$0xff]  ;;  %v2406_v55 = vadd.f32 %v2142_v54, %v2154_v61  ;;  %v2426_v61 = vadd.f32 %v2142_v54, %v2174_v36  ;;  %v2446_v36 = vadd.f32 %v2142_v54, %v2194_v49 }
 0x1a0   :  { %3299 = vst [vmem:[#allocation13_spill] sm:$0xff] %v2370_v0  ;;  %v2390_v35 = vmul.f32 %v2140_v40, %v3305_v60  ;;  %v3306_v0 = vld [vmem:[#allocation24_spill] sm:$0xff]  ;;  %v2410_v60 = vadd.f32 %v2142_v54, %v2158_v22  ;;  %v2430_v22 = vadd.f32 %v2142_v54, %v2178_v38  ;;  %v2450_v38 = vadd.f32 %v2142_v54, %v2198_v52 }
 0x1a1   :  { %3301 = vst [vmem:[#allocation15_spill] sm:$0xff] %v2374_v10  ;;  %v2394_v16 = vmul.f32 %v2140_v40, %v3306_v0  ;;  %v3307_v10 = vld [vmem:[#allocation25_spill] sm:$0xff]  ;;  %v2414_v0 = vadd.f32 %v2142_v54, %v2162_v17  ;;  %v2434_v17 = vadd.f32 %v2142_v54, %v2182_v41  ;;  %v2454_v41 = vadd.f32 %v2142_v54, %v2202_v56 }
 0x1a2   :  { %v2398_v23 = vmul.f32 %v2140_v40, %v3307_v10  ;;  %v2418_v40 = vadd.f32 %v2142_v54, %v2166_v30  ;;  %v2438_v30 = vadd.f32 %v2142_v54, %v2186_v44  ;;  %v2458_v44 = vadd.f32 %v2142_v54, %v2206_v59 }
 0x1a3   :  { %v2462_v47 = vadd.f32 %v2142_v54, %v2210_v62  ;;  %v2466_v49 = vadd.f32 %v2142_v54, %v2214_v1  ;;  %v2470_v52 = vadd.f32 %v2142_v54, %v2218_v20  ;;  %v2474_v56 = vadd.f32 %v2142_v54, %v2222_v13  ;;  %v3313_v10 = vld [vmem:[#allocation2_spill] sm:$0xff] }
 0x1a4   :  { %v2478_v59 = vadd.f32 %v2142_v54, %v2226_v9  ;;  %v2482_v62 = vadd.f32 %v2142_v54, %v2230_v45  ;;  %v2486_v1 = vadd.f32 %v2142_v54, %v2234_v33  ;;  %v2490_v20 = vadd.f32 %v2142_v54, %v2238_v37 }
 0x1a5   :  { %v2494_v13 = vadd.f32 %v2142_v54, %v2242_v39  ;;  %v2498_v9 = vadd.f32 %v2142_v54, %v2246_v42  ;;  %v2502_v45 = vadd.f32 %v2142_v54, %v2250_v46  ;;  %v2506_v33 = vadd.f32 %v2142_v54, %v2254_v11 }
 0x1a6   :  { %v2510_v37 = vadd.f32 %v2142_v54, %v2258_v53  ;;  %v2514_v39 = vadd.f32 %v2142_v54, %v2262_v57  ;;  %v2518_v42 = vadd.f32 %v2142_v54, %v2266_v7  ;;  %v2522_v46 = vadd.f32 %v2142_v54, %v2270_v31 }
 0x1a7   :  { %v2526_v11 = vadd.f32 %v2142_v54, %v2274_v15  ;;  %v2530_v53 = vadd.f32 %v2142_v54, %v2278_v25  ;;  %v2534_v57 = vadd.f32 %v2142_v54, %v2282_v29  ;;  %v2538_v7 = vadd.f32 %v2142_v54, %v2286_v28 }
 0x1a8   :  { %v2542_v31 = vadd.f32 %v2142_v54, %v2290_v12  ;;  %v2546_v15 = vadd.f32 %v2142_v54, %v2294_v2  ;;  %v2550_v25 = vadd.f32 %v2142_v54, %v2298_v43  ;;  %v2554_v29 = vadd.f32 %v2142_v54, %v2302_v48 }
 0x1a9   :  { %v2558_v28 = vadd.f32 %v2142_v54, %v2306_v51  ;;  %v2562_v12 = vadd.f32 %v2142_v54, %v2310_v27  ;;  %v2566_v2 = vadd.f32 %v2142_v54, %v2314_v8  ;;  %v2570_v43 = vadd.f32 %v2142_v54, %v2318_v63 }
 0x1aa   :  { %v2574_v48 = vadd.f32 %v2142_v54, %v2322_v4  ;;  %v2578_v51 = vadd.f32 %v2142_v54, %v2326_v34  ;;  %v2582_v27 = vadd.f32 %v2142_v54, %v2330_v24  ;;  %v2586_v8 = vadd.f32 %v2142_v54, %v2334_v21 }
 0x1ab   :  { %v2590_v63 = vadd.f32 %v2142_v54, %v2338_v19  ;;  %v2594_v4 = vadd.f32 %v2142_v54, %v2342_v5  ;;  %v2598_v34 = vadd.f32 %v2142_v54, %v2346_v50  ;;  %v2602_v24 = vadd.f32 %v2142_v54, %v2350_v26  ;;  %v3318_v26 = vld [vmem:[#allocation13_spill] sm:$0xff] }
 0x1ac   :  { %3308 = vst [vmem:[#allocation17_spill] sm:$0xff] %v2586_v8  ;;  %v2606_v21 = vadd.f32 %v2142_v54, %v3313_v10  ;;  %v3315_v8 = vld [vmem:[#allocation5_spill] sm:$0xff]  ;;  %v3319_v10 = vld [vmem:[#allocation15_spill] sm:$0xff]  ;;  %vm1005_vm6 = vcmp.gt.f32.partialorder %v2402_v58, 0.0  ;;  %vm1006_vm7 = vcmp.gt.f32.partialorder %v2406_v55, 0.0  ;;  %vm1007_vm8 = vcmp.gt.f32.partialorder %v2410_v60, 0.0 }
 0x1ad   :  { %3309 = vst [vmem:[#allocation3_spill] sm:$0xff] %v2590_v63  ;;  %v2610_v19 = vadd.f32 %v2142_v54, %v3315_v8  ;;  %v3316_v63 = vld [vmem:[#allocation6_spill] sm:$0xff]  ;;  %v1070_v8 = vmul.f32 0.2, %v2406_v55  ;;  %vm1008_vm9 = vcmp.gt.f32.partialorder %v2414_v0, 0.0  ;;  %vm1009_vm10 = vcmp.gt.f32.partialorder %v2418_v40, 0.0 }
 0x1ae   :  { %3310 = vst [vmem:[#allocation4_spill] sm:$0xff] %v2594_v4  ;;  %v2614_v5 = vadd.f32 %v2142_v54, %v3316_v63  ;;  %v3317_v4 = vld [vmem:[#allocation8_spill] sm:$0xff]  ;;  %v2633_v63 = vadd.f32 %v2142_v54, %v2378_v6  ;;  %v1072_v6 = vmul.f32 0.2, %v2414_v0  ;;  %vm1010_vm11 = vcmp.gt.f32.partialorder %v2422_v3, 0.0 }
 0x1af   :  { %3311 = vst [vmem:[#allocation9_spill] sm:$0xff] %v2598_v34  ;;  %v2618_v50 = vadd.f32 %v2142_v54, %v3317_v4  ;;  %v1069_v34 = vmul.f32 0.2, %v2402_v58  ;;  %v2637_v4 = vadd.f32 %v2142_v54, %v2382_v14  ;;  %v2653_v14 = vadd.f32 %v2142_v54, %v2394_v16 }
 0x1b0   :  { %3312 = vst [vmem:[#allocation11_spill] sm:$0xff] %v2602_v24  ;;  %v2623_v24 = vadd.f32 %v2142_v54, %v3318_v26  ;;  %v1071_v26 = vmul.f32 0.2, %v2410_v60  ;;  %vm1011_vm12 = vcmp.gt.f32.partialorder %v2426_v61, 0.0  ;;  %v1075_v16 = vmul.f32 0.2, %v2426_v61 }
 0x1b1   :  { %3314 = vst [vmem:[#allocation19_spill] sm:$0xff] %v2606_v21  ;;  %v2627_v21 = vadd.f32 %v2142_v54, %v3319_v10  ;;  %v2643_v10 = vadd.f32 %v2142_v54, %v2386_v18  ;;  %v2660_v18 = vadd.f32 %v2142_v54, %v2398_v23  ;;  %vm1012_vm13 = vcmp.gt.f32.partialorder %v2430_v22, 0.0 }
 0x1b2   :  { %3321 = vst [vmem:[#allocation7_spill] sm:$0xff] %v2633_v63  ;;  %v1133_v63 = vsel %vm1005_vm6, %v2402_v58, %v1069_v34  ;;  %v1076_v58 = vmul.f32 0.2, %v2430_v22  ;;  %vm1013_vm14 = vcmp.gt.f32.partialorder %v2434_v17, 0.0  ;;  %v1077_v34 = vmul.f32 0.2, %v2434_v17 }
 0x1b3   :  { %3320 = vst [vmem:[#allocation21_spill] sm:$0xff] %v2627_v21  ;;  %v2647_v21 = vadd.f32 %v2142_v54, %v2390_v35  ;;  %v1074_v35 = vmul.f32 0.2, %v2422_v3  ;;  %v1136_v54 = vsel %vm1008_vm9, %v2414_v0, %v1072_v6  ;;  %v1197_v23 = vpack.c.bf16 %v1133_v63, %v1133_v63 }
 0x1b4   :  { %3322 = vst [vmem:[#allocation10_spill] sm:$0xff] %v2637_v4  ;;  %v1073_v4 = vmul.f32 0.2, %v2418_v40  ;;  %vm1014_vm15 = vcmp.gt.f32.partialorder %v2438_v30, 0.0  ;;  %v1139_v0 = vsel %vm1011_vm12, %v2426_v61, %v1075_v16  ;;  %v1200_v63 = vpack.c.bf16 %v1136_v54, %v1136_v54 }
 0x1b5   :  { %3323 = vst [vmem:[#allocation12_spill] sm:$0xff] %v2643_v10  ;;  %v1079_v10 = vmul.f32 0.2, %v2442_v32  ;;  %vm1015_vm1 = vcmp.gt.f32.partialorder %v2442_v32, 0.0  ;;  %vm1016_vm2 = vcmp.gt.f32.partialorder %v2446_v36, 0.0  ;;  %v1141_v61 = vsel %vm1013_vm14, %v2434_v17, %v1077_v34 }
 0x1b6   :  { %3324 = vst [vmem:[#allocation14_spill] sm:$0xff] %v2647_v21  ;;  %v1134_v21 = vsel %vm1006_vm7, %v2406_v55, %v1070_v8  ;;  %v1137_v55 = vsel %vm1009_vm10, %v2418_v40, %v1073_v4  ;;  %v1080_v40 = vmul.f32 0.2, %v2446_v36  ;;  %vm1017_vm3 = vcmp.gt.f32.partialorder %v2450_v38, 0.0 }
 0x1b7   :  { %3325 = vst [vmem:[#allocation16_spill] sm:$0xff] %v2653_v14  ;;  %v1135_v14 = vsel %vm1007_vm8, %v2410_v60, %v1071_v26  ;;  %v1198_v8 = vpack.c.bf16 %v1134_v21, %v1134_v21  ;;  %v1138_v60 = vsel %vm1010_vm11, %v2422_v3, %v1074_v35  ;;  %v1140_v21 = vsel %vm1012_vm13, %v2430_v22, %v1076_v58 }
 0x1b8   :  { %3326 = vst [vmem:[#allocation18_spill] sm:$0xff] %v2660_v18  ;;  %v1078_v18 = vmul.f32 0.2, %v2438_v30  ;;  %v1199_v26 = vpack.c.bf16 %v1135_v14, %v1135_v14  ;;  %v1201_v4 = vpack.c.bf16 %v1137_v55, %v1137_v55  ;;  %v1081_v3 = vmul.f32 0.2, %v2450_v38 }
 0x1b9   :  { %1262 = vst.msk [vmem:[%s3214_s4] sm:$0xf] %vm1261_vm0, %v1197_v23  ;;  %v1202_v6 = vpack.c.bf16 %v1138_v60, %v1138_v60  ;;  %v1082_v22 = vmul.f32 0.2, %v2454_v41  ;;  %v1203_v35 = vpack.c.bf16 %v1139_v0, %v1139_v0  ;;  %vm1018_vm4 = vcmp.gt.f32.partialorder %v2454_v41, 0.0 }
 0x1ba   :  { %1263 = vst.msk [vmem:[%s3214_s4 + $0x4] sm:$0xf] %vm1261_vm0, %v1198_v8  ;;  %v1142_v14 = vsel %vm1014_vm15, %v2438_v30, %v1078_v18  ;;  %v1083_v17 = vmul.f32 0.2, %v2458_v44  ;;  %v1143_v16 = vsel %vm1015_vm1, %v2442_v32, %v1079_v10  ;;  %v1204_v58 = vpack.c.bf16 %v1140_v21, %v1140_v21 }
 0x1bb   :  { %1264 = vst.msk [vmem:[%s3214_s4 + $0x8] sm:$0xf] %vm1261_vm0, %v1199_v26  ;;  %vm1019_vm5 = vcmp.gt.f32.partialorder %v2458_v44, 0.0  ;;  %v1084_v30 = vmul.f32 0.2, %v2462_v47  ;;  %v1144_v18 = vsel %vm1016_vm2, %v2446_v36, %v1080_v40  ;;  %v1205_v54 = vpack.c.bf16 %v1141_v61, %v1141_v61 }
 0x1bc   :  { %1265 = vst.msk [vmem:[%s3214_s4 + $0xc] sm:$0xf] %vm1261_vm0, %v1200_v63  ;;  %vm1020_vm6 = vcmp.gt.f32.partialorder %v2462_v47, 0.0  ;;  %v1085_v32 = vmul.f32 0.2, %v2466_v49  ;;  %v1145_v10 = vsel %vm1017_vm3, %v2450_v38, %v1081_v3  ;;  %v1206_v23 = vpack.c.bf16 %v1142_v14, %v1142_v14 }
 0x1bd   :  { %1266 = vst.msk [vmem:[%s3214_s4 + $0x10] sm:$0xf] %vm1261_vm0, %v1201_v4  ;;  %vm1021_vm7 = vcmp.gt.f32.partialorder %v2466_v49, 0.0  ;;  %v1086_v36 = vmul.f32 0.2, %v2470_v52  ;;  %v1146_v34 = vsel %vm1018_vm4, %v2454_v41, %v1082_v22  ;;  %v1207_v55 = vpack.c.bf16 %v1143_v16, %v1143_v16 }
 0x1be   :  { %1267 = vst.msk [vmem:[%s3214_s4 + $0x14] sm:$0xf] %vm1261_vm0, %v1202_v6  ;;  %vm1022_vm8 = vcmp.gt.f32.partialorder %v2470_v52, 0.0  ;;  %v1087_v38 = vmul.f32 0.2, %v2474_v56  ;;  %v1147_v8 = vsel %vm1019_vm5, %v2458_v44, %v1083_v17  ;;  %v1208_v60 = vpack.c.bf16 %v1144_v18, %v1144_v18 }
 0x1bf   :  { %1268 = vst.msk [vmem:[%s3214_s4 + $0x18] sm:$0xf] %vm1261_vm0, %v1203_v35  ;;  %vm1023_vm9 = vcmp.gt.f32.partialorder %v2474_v56, 0.0  ;;  %v1088_v41 = vmul.f32 0.2, %v2478_v59  ;;  %v1148_v26 = vsel %vm1020_vm6, %v2462_v47, %v1084_v30  ;;  %v1209_v0 = vpack.c.bf16 %v1145_v10, %v1145_v10 }
 0x1c0   :  { %1269 = vst.msk [vmem:[%s3214_s4 + $0x1c] sm:$0xf] %vm1261_vm0, %v1204_v58  ;;  %vm1024_vm10 = vcmp.gt.f32.partialorder %v2478_v59, 0.0  ;;  %v1089_v44 = vmul.f32 0.2, %v2482_v62  ;;  %v1149_v63 = vsel %vm1021_vm7, %v2466_v49, %v1085_v32  ;;  %v1210_v40 = vpack.c.bf16 %v1146_v34, %v1146_v34 }
 0x1c1   :  { %1270 = vst.msk [vmem:[%s3214_s4 + $0x20] sm:$0xf] %vm1261_vm0, %v1205_v54  ;;  %vm1025_vm11 = vcmp.gt.f32.partialorder %v2482_v62, 0.0  ;;  %v1090_v47 = vmul.f32 0.2, %v2486_v1  ;;  %v1150_v21 = vsel %vm1022_vm8, %v2470_v52, %v1086_v36  ;;  %v1211_v4 = vpack.c.bf16 %v1147_v8, %v1147_v8 }
 0x1c2   :  { %1271 = vst.msk [vmem:[%s3214_s4 + $0x24] sm:$0xf] %vm1261_vm0, %v1206_v23  ;;  %vm1026_vm12 = vcmp.gt.f32.partialorder %v2486_v1, 0.0  ;;  %v1091_v49 = vmul.f32 0.2, %v2490_v20  ;;  %v1151_v3 = vsel %vm1023_vm9, %v2474_v56, %v1087_v38  ;;  %v1212_v61 = vpack.c.bf16 %v1148_v26, %v1148_v26 }
 0x1c3   :  { %1272 = vst.msk [vmem:[%s3214_s4 + $0x28] sm:$0xf] %vm1261_vm0, %v1207_v55  ;;  %vm1027_vm13 = vcmp.gt.f32.partialorder %v2490_v20, 0.0  ;;  %v1092_v52 = vmul.f32 0.2, %v2494_v13  ;;  %v1152_v6 = vsel %vm1024_vm10, %v2478_v59, %v1088_v41  ;;  %v1213_v22 = vpack.c.bf16 %v1149_v63, %v1149_v63 }
 0x1c4   :  { %1273 = vst.msk [vmem:[%s3214_s4 + $0x2c] sm:$0xf] %vm1261_vm0, %v1208_v60  ;;  %vm1028_vm14 = vcmp.gt.f32.partialorder %v2494_v13, 0.0  ;;  %v1093_v56 = vmul.f32 0.2, %v2498_v9  ;;  %v1153_v14 = vsel %vm1025_vm11, %v2482_v62, %v1089_v44  ;;  %v1214_v35 = vpack.c.bf16 %v1150_v21, %v1150_v21 }
 0x1c5   :  { %1274 = vst.msk [vmem:[%s3214_s4 + $0x30] sm:$0xf] %vm1261_vm0, %v1209_v0  ;;  %vm1029_vm15 = vcmp.gt.f32.partialorder %v2498_v9, 0.0  ;;  %v1094_v59 = vmul.f32 0.2, %v2502_v45  ;;  %v1154_v17 = vsel %vm1026_vm12, %v2486_v1, %v1090_v47  ;;  %v1215_v16 = vpack.c.bf16 %v1151_v3, %v1151_v3 }
 0x1c6   :  { %1275 = vst.msk [vmem:[%s3214_s4 + $0x34] sm:$0xf] %vm1261_vm0, %v1210_v40  ;;  %vm1030_vm1 = vcmp.gt.f32.partialorder %v2502_v45, 0.0  ;;  %v1095_v62 = vmul.f32 0.2, %v2506_v33  ;;  %v1155_v58 = vsel %vm1027_vm13, %v2490_v20, %v1091_v49  ;;  %v1216_v30 = vpack.c.bf16 %v1152_v6, %v1152_v6 }
 0x1c7   :  { %1276 = vst.msk [vmem:[%s3214_s4 + $0x38] sm:$0xf] %vm1261_vm0, %v1211_v4  ;;  %vm1031_vm2 = vcmp.gt.f32.partialorder %v2506_v33, 0.0  ;;  %v1096_v1 = vmul.f32 0.2, %v2510_v37  ;;  %v1156_v18 = vsel %vm1028_vm14, %v2494_v13, %v1092_v52  ;;  %v1217_v54 = vpack.c.bf16 %v1153_v14, %v1153_v14 }
 0x1c8   :  { %1277 = vst.msk [vmem:[%s3214_s4 + $0x3c] sm:$0xf] %vm1261_vm0, %v1212_v61  ;;  %vm1032_vm3 = vcmp.gt.f32.partialorder %v2510_v37, 0.0  ;;  %v1097_v20 = vmul.f32 0.2, %v2514_v39  ;;  %v1157_v32 = vsel %vm1029_vm15, %v2498_v9, %v1093_v56  ;;  %v1218_v10 = vpack.c.bf16 %v1154_v17, %v1154_v17 }
 0x1c9   :  { %1278 = vst.msk [vmem:[%s3214_s4 + $0x40] sm:$0xf] %vm1261_vm0, %v1213_v22  ;;  %vm1033_vm4 = vcmp.gt.f32.partialorder %v2514_v39, 0.0  ;;  %v1098_v13 = vmul.f32 0.2, %v2518_v42  ;;  %v1158_v23 = vsel %vm1030_vm1, %v2502_v45, %v1094_v59  ;;  %v1219_v36 = vpack.c.bf16 %v1155_v58, %v1155_v58 }
 0x1ca   :  { %1279 = vst.msk [vmem:[%s3214_s4 + $0x44] sm:$0xf] %vm1261_vm0, %v1214_v35  ;;  %vm1034_vm5 = vcmp.gt.f32.partialorder %v2518_v42, 0.0  ;;  %v1099_v9 = vmul.f32 0.2, %v2522_v46  ;;  %v1159_v34 = vsel %vm1031_vm2, %v2506_v33, %v1095_v62  ;;  %v1220_v55 = vpack.c.bf16 %v1156_v18, %v1156_v18 }
 0x1cb   :  { %1280 = vst.msk [vmem:[%s3214_s4 + $0x48] sm:$0xf] %vm1261_vm0, %v1215_v16  ;;  %vm1035_vm6 = vcmp.gt.f32.partialorder %v2522_v46, 0.0  ;;  %v1100_v45 = vmul.f32 0.2, %v2526_v11  ;;  %v1160_v38 = vsel %vm1032_vm3, %v2510_v37, %v1096_v1  ;;  %v1221_v8 = vpack.c.bf16 %v1157_v32, %v1157_v32 }
 0x1cc   :  { %1281 = vst.msk [vmem:[%s3214_s4 + $0x4c] sm:$0xf] %vm1261_vm0, %v1216_v30  ;;  %vm1036_vm7 = vcmp.gt.f32.partialorder %v2526_v11, 0.0  ;;  %v1101_v33 = vmul.f32 0.2, %v2530_v53  ;;  %v1161_v60 = vsel %vm1033_vm4, %v2514_v39, %v1097_v20  ;;  %v1222_v41 = vpack.c.bf16 %v1158_v23, %v1158_v23 }
 0x1cd   :  { %1282 = vst.msk [vmem:[%s3214_s4 + $0x50] sm:$0xf] %vm1261_vm0, %v1217_v54  ;;  %vm1037_vm8 = vcmp.gt.f32.partialorder %v2530_v53, 0.0  ;;  %v1102_v37 = vmul.f32 0.2, %v2534_v57  ;;  %v1162_v26 = vsel %vm1034_vm5, %v2518_v42, %v1098_v13  ;;  %v1223_v0 = vpack.c.bf16 %v1159_v34, %v1159_v34 }
 0x1ce   :  { %1283 = vst.msk [vmem:[%s3214_s4 + $0x54] sm:$0xf] %vm1261_vm0, %v1218_v10  ;;  %vm1038_vm9 = vcmp.gt.f32.partialorder %v2534_v57, 0.0  ;;  %v1103_v39 = vmul.f32 0.2, %v2538_v7  ;;  %v1163_v44 = vsel %vm1035_vm6, %v2522_v46, %v1099_v9  ;;  %v1224_v63 = vpack.c.bf16 %v1160_v38, %v1160_v38 }
 0x1cf   :  { %1284 = vst.msk [vmem:[%s3214_s4 + $0x58] sm:$0xf] %vm1261_vm0, %v1219_v36  ;;  %vm1039_vm10 = vcmp.gt.f32.partialorder %v2538_v7, 0.0  ;;  %v1104_v42 = vmul.f32 0.2, %v2542_v31  ;;  %v1164_v40 = vsel %vm1036_vm7, %v2526_v11, %v1100_v45  ;;  %v1225_v47 = vpack.c.bf16 %v1161_v60, %v1161_v60 }
 0x1d0   :  { %1285 = vst.msk [vmem:[%s3214_s4 + $0x5c] sm:$0xf] %vm1261_vm0, %v1220_v55  ;;  %vm1040_vm11 = vcmp.gt.f32.partialorder %v2542_v31, 0.0  ;;  %v1105_v46 = vmul.f32 0.2, %v2546_v15  ;;  %v1165_v21 = vsel %vm1037_vm8, %v2530_v53, %v1101_v33  ;;  %v1226_v4 = vpack.c.bf16 %v1162_v26, %v1162_v26 }
 0x1d1   :  { %1286 = vst.msk [vmem:[%s3214_s4 + $0x60] sm:$0xf] %vm1261_vm0, %v1221_v8  ;;  %vm1041_vm12 = vcmp.gt.f32.partialorder %v2546_v15, 0.0  ;;  %v1106_v11 = vmul.f32 0.2, %v2550_v25  ;;  %v1166_v49 = vsel %vm1038_vm9, %v2534_v57, %v1102_v37  ;;  %v1227_v3 = vpack.c.bf16 %v1163_v44, %v1163_v44 }
 0x1d2   :  { %1287 = vst.msk [vmem:[%s3214_s4 + $0x64] sm:$0xf] %vm1261_vm0, %v1222_v41  ;;  %vm1042_vm13 = vcmp.gt.f32.partialorder %v2550_v25, 0.0  ;;  %v1107_v53 = vmul.f32 0.2, %v2554_v29  ;;  %v1167_v61 = vsel %vm1039_vm10, %v2538_v7, %v1103_v39  ;;  %v1228_v52 = vpack.c.bf16 %v1164_v40, %v1164_v40 }
 0x1d3   :  { %1288 = vst.msk [vmem:[%s3214_s4 + $0x68] sm:$0xf] %vm1261_vm0, %v1223_v0  ;;  %vm1043_vm14 = vcmp.gt.f32.partialorder %v2554_v29, 0.0  ;;  %v1108_v57 = vmul.f32 0.2, %v2558_v28  ;;  %v1168_v6 = vsel %vm1040_vm11, %v2542_v31, %v1104_v42  ;;  %v1229_v22 = vpack.c.bf16 %v1165_v21, %v1165_v21 }
 0x1d4   :  { %1289 = vst.msk [vmem:[%s3214_s4 + $0x6c] sm:$0xf] %vm1261_vm0, %v1224_v63  ;;  %vm1044_vm15 = vcmp.gt.f32.partialorder %v2558_v28, 0.0  ;;  %v1109_v7 = vmul.f32 0.2, %v2562_v12  ;;  %v1169_v56 = vsel %vm1041_vm12, %v2546_v15, %v1105_v46  ;;  %v1230_v14 = vpack.c.bf16 %v1166_v49, %v1166_v49 }
 0x1d5   :  { %1290 = vst.msk [vmem:[%s3214_s4 + $0x70] sm:$0xf] %vm1261_vm0, %v1225_v47  ;;  %vm1045_vm1 = vcmp.gt.f32.partialorder %v2562_v12, 0.0  ;;  %v1110_v31 = vmul.f32 0.2, %v2566_v2  ;;  %v1170_v35 = vsel %vm1042_vm13, %v2550_v25, %v1106_v11  ;;  %v1231_v59 = vpack.c.bf16 %v1167_v61, %v1167_v61 }
 0x1d6   :  { %1291 = vst.msk [vmem:[%s3214_s4 + $0x74] sm:$0xf] %vm1261_vm0, %v1226_v4  ;;  %vm1046_vm2 = vcmp.gt.f32.partialorder %v2566_v2, 0.0  ;;  %v1111_v15 = vmul.f32 0.2, %v2570_v43  ;;  %v1171_v17 = vsel %vm1043_vm14, %v2554_v29, %v1107_v53  ;;  %v1232_v16 = vpack.c.bf16 %v1168_v6, %v1168_v6  ;;  %v3333_v53 = vld [vmem:[#allocation21_spill] sm:$0xff] }
 0x1d7   :  { %1292 = vst.msk [vmem:[%s3214_s4 + $0x78] sm:$0xf] %vm1261_vm0, %v1227_v3  ;;  %vm1047_vm3 = vcmp.gt.f32.partialorder %v2570_v43, 0.0  ;;  %v1112_v25 = vmul.f32 0.2, %v2574_v48  ;;  %v1172_v62 = vsel %vm1044_vm15, %v2558_v28, %v1108_v57  ;;  %v1233_v58 = vpack.c.bf16 %v1169_v56, %v1169_v56  ;;  %v3334_v6 = vld [vmem:[#allocation7_spill] sm:$0xff] }
 0x1d8   :  { %1293 = vst.msk [vmem:[%s3214_s4 + $0x7c] sm:$0xf] %vm1261_vm0, %v1228_v52  ;;  %vm1048_vm4 = vcmp.gt.f32.partialorder %v2574_v48, 0.0  ;;  %v1113_v29 = vmul.f32 0.2, %v2578_v51  ;;  %v1173_v30 = vsel %vm1045_vm1, %v2562_v12, %v1109_v7  ;;  %v1234_v1 = vpack.c.bf16 %v1170_v35, %v1170_v35  ;;  %v3327_v12 = vld [vmem:[#allocation17_spill] sm:$0xff] }
 0x1d9   :  { %1294 = vst.msk [vmem:[%s3214_s4 + $0x80] sm:$0xf] %vm1261_vm0, %v1229_v22  ;;  %vm1049_vm5 = vcmp.gt.f32.partialorder %v2578_v51, 0.0  ;;  %v1114_v28 = vmul.f32 0.2, %v2582_v27  ;;  %v1174_v18 = vsel %vm1046_vm2, %v2566_v2, %v1110_v31  ;;  %v1235_v54 = vpack.c.bf16 %v1171_v17, %v1171_v17  ;;  %v3328_v2 = vld [vmem:[#allocation3_spill] sm:$0xff] }
 0x1da   :  { %1295 = vst.msk [vmem:[%s3214_s4 + $0x84] sm:$0xf] %vm1261_vm0, %v1230_v14  ;;  %vm1050_vm6 = vcmp.gt.f32.partialorder %v2582_v27, 0.0  ;;  %v1115_v20 = vmul.f32 0.2, %v3327_v12  ;;  %v1175_v32 = vsel %vm1047_vm3, %v2570_v43, %v1111_v15  ;;  %v1236_v10 = vpack.c.bf16 %v1172_v62, %v1172_v62  ;;  %v3329_v43 = vld [vmem:[#allocation4_spill] sm:$0xff] }
 0x1db   :  { %1296 = vst.msk [vmem:[%s3214_s4 + $0x88] sm:$0xf] %vm1261_vm0, %v1231_v59  ;;  %vm1051_vm7 = vcmp.gt.f32.partialorder %v3327_v12, 0.0  ;;  %v1116_v13 = vmul.f32 0.2, %v3328_v2  ;;  %v1176_v23 = vsel %vm1048_vm4, %v2574_v48, %v1112_v25  ;;  %v1237_v36 = vpack.c.bf16 %v1173_v30, %v1173_v30  ;;  %v3330_v48 = vld [vmem:[#allocation9_spill] sm:$0xff] }
 0x1dc   :  { %1297 = vst.msk [vmem:[%s3214_s4 + $0x8c] sm:$0xf] %vm1261_vm0, %v1232_v16  ;;  %vm1052_vm8 = vcmp.gt.f32.partialorder %v3328_v2, 0.0  ;;  %v1117_v9 = vmul.f32 0.2, %v3329_v43  ;;  %v1177_v34 = vsel %vm1049_vm5, %v2578_v51, %v1113_v29  ;;  %v1238_v55 = vpack.c.bf16 %v1174_v18, %v1174_v18  ;;  %v3331_v51 = vld [vmem:[#allocation11_spill] sm:$0xff] }
 0x1dd   :  { %1298 = vst.msk [vmem:[%s3214_s4 + $0x90] sm:$0xf] %vm1261_vm0, %v1233_v58  ;;  %vm1053_vm9 = vcmp.gt.f32.partialorder %v3329_v43, 0.0  ;;  %v1118_v45 = vmul.f32 0.2, %v3330_v48  ;;  %v1178_v38 = vsel %vm1050_vm6, %v2582_v27, %v1114_v28  ;;  %v1239_v8 = vpack.c.bf16 %v1175_v32, %v1175_v32  ;;  %v3332_v27 = vld [vmem:[#allocation19_spill] sm:$0xff] }
 0x1de   :  { %1299 = vst.msk [vmem:[%s3214_s4 + $0x94] sm:$0xf] %vm1261_vm0, %v1234_v1  ;;  %vm1054_vm10 = vcmp.gt.f32.partialorder %v3330_v48, 0.0  ;;  %v1119_v33 = vmul.f32 0.2, %v3331_v51  ;;  %v1179_v60 = vsel %vm1051_vm7, %v3327_v12, %v1115_v20  ;;  %v1240_v41 = vpack.c.bf16 %v1176_v23, %v1176_v23  ;;  %v3339_v1 = vld [vmem:[#allocation18_spill] sm:$0xff] }
 0x1df   :  { %1300 = vst.msk [vmem:[%s3214_s4 + $0x98] sm:$0xf] %vm1261_vm0, %v1235_v54  ;;  %vm1055_vm11 = vcmp.gt.f32.partialorder %v3331_v51, 0.0  ;;  %v1120_v37 = vmul.f32 0.2, %v3332_v27  ;;  %v1180_v26 = vsel %vm1052_vm8, %v3328_v2, %v1116_v13  ;;  %v1241_v0 = vpack.c.bf16 %v1177_v34, %v1177_v34  ;;  %v3340_v12 = vld [vmem:[#allocation26_spill] sm:$0xff] }
 0x1e0   :  { %1301 = vst.msk [vmem:[%s3214_s4 + $0x9c] sm:$0xf] %vm1261_vm0, %v1236_v10  ;;  %vm1056_vm12 = vcmp.gt.f32.partialorder %v3332_v27, 0.0  ;;  %v1121_v39 = vmul.f32 0.2, %v2610_v19  ;;  %v1181_v44 = vsel %vm1053_vm9, %v3329_v43, %v1117_v9  ;;  %v1242_v63 = vpack.c.bf16 %v1178_v38, %v1178_v38 }
 0x1e1   :  { %1302 = vst.msk [vmem:[%s3214_s4 + $0xa0] sm:$0xf] %vm1261_vm0, %v1237_v36  ;;  %vm1057_vm13 = vcmp.gt.f32.partialorder %v2610_v19, 0.0  ;;  %v1122_v42 = vmul.f32 0.2, %v2614_v5  ;;  %v1182_v40 = vsel %vm1054_vm10, %v3330_v48, %v1118_v45  ;;  %v1243_v47 = vpack.c.bf16 %v1179_v60, %v1179_v60 }
 0x1e2   :  { %1303 = vst.msk [vmem:[%s3214_s4 + $0xa4] sm:$0xf] %vm1261_vm0, %v1238_v55  ;;  %vm1058_vm14 = vcmp.gt.f32.partialorder %v2614_v5, 0.0  ;;  %v1123_v46 = vmul.f32 0.2, %v2618_v50  ;;  %v1183_v21 = vsel %vm1055_vm11, %v3331_v51, %v1119_v33  ;;  %v1244_v4 = vpack.c.bf16 %v1180_v26, %v1180_v26 }
 0x1e3   :  { %1304 = vst.msk [vmem:[%s3214_s4 + $0xa8] sm:$0xf] %vm1261_vm0, %v1239_v8  ;;  %vm1059_vm15 = vcmp.gt.f32.partialorder %v2618_v50, 0.0  ;;  %v1124_v11 = vmul.f32 0.2, %v2623_v24  ;;  %v1184_v49 = vsel %vm1056_vm12, %v3332_v27, %v1120_v37  ;;  %v1245_v3 = vpack.c.bf16 %v1181_v44, %v1181_v44 }
 0x1e4   :  { %1305 = vst.msk [vmem:[%s3214_s4 + $0xac] sm:$0xf] %vm1261_vm0, %v1240_v41  ;;  %vm1060_vm1 = vcmp.gt.f32.partialorder %v2623_v24, 0.0  ;;  %v1125_v61 = vmul.f32 0.2, %v3333_v53  ;;  %v1185_v52 = vsel %vm1057_vm13, %v2610_v19, %v1121_v39  ;;  %v1246_v57 = vpack.c.bf16 %v1182_v40, %v1182_v40  ;;  %v3335_v19 = vld [vmem:[#allocation10_spill] sm:$0xff] }
 0x1e5   :  { %1306 = vst.msk [vmem:[%s3214_s4 + $0xb0] sm:$0xf] %vm1261_vm0, %v1241_v0  ;;  %vm1061_vm2 = vcmp.gt.f32.partialorder %v3333_v53, 0.0  ;;  %v1126_v22 = vmul.f32 0.2, %v3334_v6  ;;  %v1186_v7 = vsel %vm1058_vm14, %v2614_v5, %v1122_v42  ;;  %v1247_v56 = vpack.c.bf16 %v1183_v21, %v1183_v21  ;;  %v3336_v5 = vld [vmem:[#allocation12_spill] sm:$0xff] }
 0x1e6   :  { %1307 = vst.msk [vmem:[%s3214_s4 + $0xb4] sm:$0xf] %vm1261_vm0, %v1242_v63  ;;  %vm1062_vm3 = vcmp.gt.f32.partialorder %v3334_v6, 0.0  ;;  %v1127_v14 = vmul.f32 0.2, %v3335_v19  ;;  %v1187_v31 = vsel %vm1059_vm15, %v2618_v50, %v1123_v46  ;;  %v1248_v35 = vpack.c.bf16 %v1184_v49, %v1184_v49  ;;  %v3337_v50 = vld [vmem:[#allocation14_spill] sm:$0xff] }
 0x1e7   :  { %1308 = vst.msk [vmem:[%s3214_s4 + $0xb8] sm:$0xf] %vm1261_vm0, %v1243_v47  ;;  %vm1063_vm4 = vcmp.gt.f32.partialorder %v3335_v19, 0.0  ;;  %v1128_v59 = vmul.f32 0.2, %v3336_v5  ;;  %v1188_v15 = vsel %vm1060_vm1, %v2623_v24, %v1124_v11  ;;  %v1249_v17 = vpack.c.bf16 %v1185_v52, %v1185_v52  ;;  %v3338_v24 = vld [vmem:[#allocation16_spill] sm:$0xff] }
 0x1e8   :  { %1309 = vst.msk [vmem:[%s3214_s4 + $0xbc] sm:$0xf] %vm1261_vm0, %v1244_v4  ;;  %vm1064_vm5 = vcmp.gt.f32.partialorder %v3336_v5, 0.0  ;;  %v1129_v16 = vmul.f32 0.2, %v3337_v50  ;;  %v1189_v25 = vsel %vm1061_vm2, %v3333_v53, %v1125_v61  ;;  %v1250_v62 = vpack.c.bf16 %v1186_v7, %v1186_v7 }
 0x1e9   :  { %1310 = vst.msk [vmem:[%s3214_s4 + $0xc0] sm:$0xf] %vm1261_vm0, %v1245_v3  ;;  %vm1065_vm6 = vcmp.gt.f32.partialorder %v3337_v50, 0.0  ;;  %v1130_v58 = vmul.f32 0.2, %v3338_v24  ;;  %v1190_v29 = vsel %vm1062_vm3, %v3334_v6, %v1126_v22  ;;  %v1251_v30 = vpack.c.bf16 %v1187_v31, %v1187_v31 }
 0x1ea   :  { %1311 = vst.msk [vmem:[%s3214_s4 + $0xc4] sm:$0xf] %vm1261_vm0, %v1246_v57  ;;  %vm1066_vm7 = vcmp.gt.f32.partialorder %v3338_v24, 0.0  ;;  %v1131_v28 = vmul.f32 0.2, %v3339_v1  ;;  %v1191_v18 = vsel %vm1063_vm4, %v3335_v19, %v1127_v14  ;;  %v1252_v54 = vpack.c.bf16 %v1188_v15, %v1188_v15 }
 0x1eb   :  { %1312 = vst.msk [vmem:[%s3214_s4 + $0xc8] sm:$0xf] %vm1261_vm0, %v1247_v56  ;;  %vm1067_vm8 = vcmp.gt.f32.partialorder %v3339_v1, 0.0  ;;  %v1132_v20 = vmul.f32 0.2, %v3340_v12  ;;  %v1192_v32 = vsel %vm1064_vm5, %v3336_v5, %v1128_v59  ;;  %v1253_v10 = vpack.c.bf16 %v1189_v25, %v1189_v25 }
 0x1ec   :  { %1313 = vst.msk [vmem:[%s3214_s4 + $0xcc] sm:$0xf] %vm1261_vm0, %v1248_v35  ;;  %vm1068_vm9 = vcmp.gt.f32.partialorder %v3340_v12, 0.0  ;;  %v1193_v2 = vsel %vm1065_vm6, %v3337_v50, %v1129_v16  ;;  %v1254_v13 = vpack.c.bf16 %v1190_v29, %v1190_v29  ;;  %v1194_v23 = vsel %vm1066_vm7, %v3338_v24, %v1130_v58 }
 0x1ed   :  { %1314 = vst.msk [vmem:[%s3214_s4 + $0xd0] sm:$0xf] %vm1261_vm0, %v1249_v17  ;;  %v1255_v36 = vpack.c.bf16 %v1191_v18, %v1191_v18  ;;  %v1195_v43 = vsel %vm1067_vm8, %v3339_v1, %v1131_v28  ;;  %v1256_v9 = vpack.c.bf16 %v1192_v32, %v1192_v32  ;;  %v1196_v34 = vsel %vm1068_vm9, %v3340_v12, %v1132_v20 }
 0x1ee   :  { %1315 = vst.msk [vmem:[%s3214_s4 + $0xd4] sm:$0xf] %vm1261_vm0, %v1250_v62  ;;  %v1257_v55 = vpack.c.bf16 %v1193_v2, %v1193_v2  ;;  %v1258_v48 = vpack.c.bf16 %v1194_v23, %v1194_v23  ;;  %v1259_v45 = vpack.c.bf16 %v1195_v43, %v1195_v43  ;;  %v1260_v38 = vpack.c.bf16 %v1196_v34, %v1196_v34 }
 0x1ef   :  { %1316 = vst.msk [vmem:[%s3214_s4 + $0xd8] sm:$0xf] %vm1261_vm0, %v1251_v30 }
 0x1f0   :  { %1317 = vst.msk [vmem:[%s3214_s4 + $0xdc] sm:$0xf] %vm1261_vm0, %v1252_v54 }
 0x1f1   :  { %1318 = vst.msk [vmem:[%s3214_s4 + $0xe0] sm:$0xf] %vm1261_vm0, %v1253_v10 }
 0x1f2   :  { %1319 = vst.msk [vmem:[%s3214_s4 + $0xe4] sm:$0xf] %vm1261_vm0, %v1254_v13 }
 0x1f3   :  { %1320 = vst.msk [vmem:[%s3214_s4 + $0xe8] sm:$0xf] %vm1261_vm0, %v1255_v36 }
 0x1f4   :  { %1321 = vst.msk [vmem:[%s3214_s4 + $0xec] sm:$0xf] %vm1261_vm0, %v1256_v9 }
 0x1f5   :  { %1322 = vst.msk [vmem:[%s3214_s4 + $0xf0] sm:$0xf] %vm1261_vm0, %v1257_v55 }
 0x1f6   :  { %1323 = vst.msk [vmem:[%s3214_s4 + $0xf4] sm:$0xf] %vm1261_vm0, %v1258_v48 }
 0x1f7   :  { %1324 = vst.msk [vmem:[%s3214_s4 + $0xf8] sm:$0xf] %vm1261_vm0, %v1259_v45 }
 0x1f8   :  { %1325 = vst.msk [vmem:[%s3214_s4 + $0xfc] sm:$0xf] %vm1261_vm0, %v1260_v38 }

// kernel: convd_forward.5
= control target key start
LH: loop header
LB: loop body
LE: loop exit
PB: predicated region body
PF: predicated region fallthrough
CT: control target
= control target key end

     0   :  { %vm311_vm0 = vcmask 523264   ;;  %vm335_vm1 = vcmask 517120   ;;  %vm493_vm5 = vcmask 519168   ;;  %s983_s1 = inlined_call_operand.vmem [shape: bf16[256,64], index: 1, kind: input, shape index: {}]   ;;  %s984_s0 = inlined_call_operand.vmem [shape: bf16[98,256], index: 0, kind: input, shape index: {}]   ;;  %s985_s2 = inlined_call_operand.vmem [shape: f32[1,64], index: 2, kind: input, shape index: {}]   ;;  %s986_s3 = inlined_call_operand.vmem [shape: f32[1,64], index: 3, kind: input, shape index: {}]   ;;  %s987_s4 = inlined_call_operand.vmem [shape: bf16[98,64], index: 4, kind: output, shape index: {}]  }
   0x1   :  { %v643_v0 = vld [vmem:[%s983_s1 + $0x38] sm:$0xff]  ;;  %v642_v2 = vld [vmem:[%s983_s1 + $0x30] sm:$0xff]  ;;  %v641_v4 = vld [vmem:[%s983_s1 + $0x28] sm:$0xff] }
   0x2   :  { %v651_v1 = vld [vmem:[%s983_s1 + $0x78] sm:$0xff]  ;;  %225 = vmatpush.bf16.msra.mxu0 %v643_v0  ;;  %v650_v3 = vld [vmem:[%s983_s1 + $0x70] sm:$0xff]  ;;  %652 = vmatpush.bf16.msra.mxu2 %v643_v0  ;;  %v649_v5 = vld [vmem:[%s983_s1 + $0x68] sm:$0xff] }
   0x3   :  { %268 = vmatpush.bf16.msra.mxu1 %v651_v1  ;;  %660 = vmatpush.bf16.msra.mxu3 %v651_v1  ;;  %v640_v6 = vld [vmem:[%s983_s1 + $0x20] sm:$0xff]  ;;  %v639_v8 = vld [vmem:[%s983_s1 + $0x18] sm:$0xff]  ;;  %v638_v10 = vld [vmem:[%s983_s1 + $0x10] sm:$0xff] }
   0x4   :  { %v648_v7 = vld [vmem:[%s983_s1 + $0x60] sm:$0xff]  ;;  %v647_v9 = vld [vmem:[%s983_s1 + $0x58] sm:$0xff]  ;;  %v646_v11 = vld [vmem:[%s983_s1 + $0x50] sm:$0xff] }
   0x5   :  { %v637_v12 = vld [vmem:[%s983_s1 + $0x8] sm:$0xff]  ;;  %v636_v14 = vld [vmem:[%s983_s1] sm:$0xff]  ;;  %v538_v20 = vld [vmem:[%s984_s0 + $0x30] sm:$0xf] }
   0x6   :  { %226 = vmatpush.bf16.msra.mxu0 %v642_v2  ;;  %653 = vmatpush.bf16.msra.mxu2 %v642_v2  ;;  %v645_v13 = vld [vmem:[%s983_s1 + $0x48] sm:$0xff]  ;;  %v644_v15 = vld [vmem:[%s983_s1 + $0x40] sm:$0xff]  ;;  %v631_v21 = vld [vmem:[%s984_s0 + $0x34] sm:$0xf0] }
   0x7   :  { %269 = vmatpush.bf16.msra.mxu1 %v650_v3  ;;  %661 = vmatpush.bf16.msra.mxu3 %v650_v3  ;;  %v514_v16 = vld [vmem:[%s984_s0] sm:$0xf]  ;;  %v625_v17 = vld [vmem:[%s984_s0 + $0x4] sm:$0xf0]  ;;  %v624_v18 = vld [vmem:[%s984_s0 + $0x4] sm:$0xf]  ;;  %v539_v26 = vor.u32 %v631_v21, %v538_v20 }
   0x8   :  { %v516_v19 = vld [vmem:[%s984_s0 + $0x8] sm:$0xf0]  ;;  %v632_v22 = vld [vmem:[%s984_s0 + $0x44] sm:$0xf]  ;;  %v515_v24 = vor.u32 %v625_v17, %v514_v16  ;;  %v522_v28 = vld [vmem:[%s984_s0 + $0x10] sm:$0xf] }
   0x9   :  { %v548_v23 = vld [vmem:[%s984_s0 + $0x48] sm:$0xf0]  ;;  %v519_v25 = vor.u32 %v624_v18, %v516_v19  ;;  %v627_v29 = vld [vmem:[%s984_s0 + $0x14] sm:$0xf0]  ;;  %v626_v30 = vld [vmem:[%s984_s0 + $0x14] sm:$0xf] }
   0xa   :  { %227 = vmatpush.bf16.msra.mxu0 %v641_v4  ;;  %654 = vmatpush.bf16.msra.mxu2 %v641_v4  ;;  %v551_v27 = vor.u32 %v632_v22, %v548_v23  ;;  %v524_v31 = vld [vmem:[%s984_s0 + $0x18] sm:$0xf0]  ;;  %v546_v32 = vld [vmem:[%s984_s0 + $0x40] sm:$0xf]  ;;  %v633_v33 = vld [vmem:[%s984_s0 + $0x44] sm:$0xf0]  ;;  %v523_v36 = vor.u32 %v627_v29, %v522_v28 }
   0xb   :  { %270 = vmatpush.bf16.msra.mxu1 %v649_v5  ;;  %662 = vmatpush.bf16.msra.mxu3 %v649_v5  ;;  %v634_v34 = vld [vmem:[%s984_s0 + $0x54] sm:$0xf]  ;;  %v556_v35 = vld [vmem:[%s984_s0 + $0x58] sm:$0xf0]  ;;  %v527_v37 = vor.u32 %v626_v30, %v524_v31  ;;  %v547_v38 = vor.u32 %v633_v33, %v546_v32  ;;  %v29_v40 = vld [vmem:[%s984_s0 + $0x60] sm:$0x11] }
   0xc   :  { %v559_v39 = vor.u32 %v634_v34, %v556_v35  ;;  %v530_v41 = vld [vmem:[%s984_s0 + $0x20] sm:$0xf]  ;;  %v629_v42 = vld [vmem:[%s984_s0 + $0x24] sm:$0xf0]  ;;  %v628_v43 = vld [vmem:[%s984_s0 + $0x24] sm:$0xf]  ;;  %v100_v45 = vunpack.c.h.b16 %v29_v40  ;;  %v99_v54 = vunpack.c.l.b16 %v29_v40 }
   0xd   :  { %v532_v44 = vld [vmem:[%s984_s0 + $0x28] sm:$0xf0]  ;;  %v554_v46 = vld [vmem:[%s984_s0 + $0x50] sm:$0xf]  ;;  %v635_v47 = vld [vmem:[%s984_s0 + $0x54] sm:$0xf0]  ;;  %v531_v48 = vor.u32 %v629_v42, %v530_v41 }
   0xe   :  { %228 = vmatpush.bf16.msra.mxu0 %v640_v6  ;;  %655 = vmatpush.bf16.msra.mxu2 %v640_v6  ;;  %v535_v49 = vor.u32 %v628_v43, %v532_v44  ;;  %v555_v50 = vor.u32 %v635_v47, %v554_v46  ;;  %v114_v51 = vpack.c.b16 %v100_v45, %v100_v45  ;;  %v630_v52 = vld [vmem:[%s984_s0 + $0x34] sm:$0xf]  ;;  %v540_v53 = vld [vmem:[%s984_s0 + $0x38] sm:$0xf0] }
   0xf   :  { %271 = vmatpush.bf16.msra.mxu1 %v648_v7  ;;  %663 = vmatpush.bf16.msra.mxu3 %v648_v7  ;;  %v543_v55 = vor.u32 %v630_v52, %v540_v53  ;;  %v113_v56 = vpack.c.b16 %v99_v54, %v99_v54 }
  0x12   :  { %229 = vmatpush.bf16.msra.mxu0 %v639_v8  ;;  %656 = vmatpush.bf16.msra.mxu2 %v639_v8 }
  0x13   :  { %272 = vmatpush.bf16.msra.mxu1 %v647_v9  ;;  %664 = vmatpush.bf16.msra.mxu3 %v647_v9 }
  0x16   :  { %230 = vmatpush.bf16.msra.mxu0 %v638_v10  ;;  %657 = vmatpush.bf16.msra.mxu2 %v638_v10 }
  0x17   :  { %273 = vmatpush.bf16.msra.mxu1 %v646_v11  ;;  %665 = vmatpush.bf16.msra.mxu3 %v646_v11 }
  0x1a   :  { %231 = vmatpush.bf16.msra.mxu0 %v637_v12  ;;  %658 = vmatpush.bf16.msra.mxu2 %v637_v12 }
  0x1b   :  { %274 = vmatpush.bf16.msra.mxu1 %v645_v13  ;;  %666 = vmatpush.bf16.msra.mxu3 %v645_v13 }
  0x1e   :  { %232 = vmatpush.bf16.msra.mxu0 %v636_v14  ;;  %659 = vmatpush.bf16.msra.mxu2 %v636_v14 }
  0x1f   :  { %275 = vmatpush.bf16.msra.mxu1 %v644_v15  ;;  %667 = vmatpush.bf16.msra.mxu3 %v644_v15 }
  0x21   :  { %233 = vmatmul.bf16.vlgmr.msra.gmra.mxu0 %v515_v24  ;;  %248 = vmatmul.bf16.vlgmr.msra.gmra.mxu2 %v539_v26 }
  0x22   :  { %276 = vmatmul.bf16.vlgmr.msra.gmra.mxu1 %v519_v25  ;;  %296 = vmatmul.bf16.vlgmr.msra.gmra.mxu3 %v551_v27 }
  0x31   :  { %238 = vmatmul.bf16.gmra.mxu0 %v523_v36  ;;  %253 = vmatmul.bf16.gmra.mxu2 %v547_v38 }
  0x32   :  { %281 = vmatmul.bf16.gmra.mxu1 %v527_v37  ;;  %301 = vmatmul.bf16.gmra.mxu3 %v559_v39 }
  0x41   :  { %243 = vmatmul.bf16.gmra.mxu0 %v531_v48  ;;  %258 = vmatmul.bf16.gmra.mxu2 %v555_v50 }
  0x42   :  { %286 = vmatmul.bf16.gmra.mxu1 %v535_v49  ;;  %306 = vmatmul.bf16.gmra.mxu3 %v114_v51 }
  0x51   :  { %263 = vmatmul.bf16.gmra.mxu2 %v113_v56 }
  0x52   :  { %291 = vmatmul.bf16.gmra.mxu1 %v543_v55 }
  0x9e   :  { %v234_v57 = vpop.f32.mrf.mxu0 }
  0x9f   :  { %v277_v58 = vpop.f32.mrf.mxu1 }
  0xa0   :  { %v822_v14 = vadd.f32 %v277_v58, %v234_v57 }
  0xa2   :  { %v344_v19 = vmul.f32 %v822_v14, %v822_v14  ;;  %v312_v24 = vsel %vm311_vm0, %v822_v14, 0.0 }
  0xa4   :  { %v249_v59 = vpop.f32.mrf.mxu2  ;;  %v357_v31 = vsel %vm311_vm0, %v344_v19, 0.0 }
  0xa5   :  { %v297_v60 = vpop.f32.mrf.mxu3 }
  0xa6   :  { %v236_v61 = vpop.f32.mrf.mxu0 }
  0xa7   :  { %v279_v62 = vpop.f32.mrf.mxu1 }
  0xa8   :  { %v820_v11 = vadd.f32 %v279_v62, %v236_v61 }
  0xaa   :  { %v345_v17 = vmul.f32 %v820_v11, %v820_v11  ;;  %v313_v21 = vsel %vm311_vm0, %v820_v11, 0.0 }
  0xab   :  { %v314_v32 = vadd.f32 %v313_v21, %v312_v24 }
  0xac   :  { %v251_v63 = vpop.f32.mrf.mxu2  ;;  %v358_v25 = vsel %vm311_vm0, %v345_v17, 0.0 }
  0xad   :  { %v299_v0 = vpop.f32.mrf.mxu3  ;;  %v359_v38 = vadd.f32 %v358_v25, %v357_v31 }
  0xae   :  { %v239_v1 = vpop.f32.mrf.mxu0 }
  0xaf   :  { %v282_v2 = vpop.f32.mrf.mxu1 }
  0xb0   :  { %v824_v16 = vadd.f32 %v282_v2, %v239_v1 }
  0xb2   :  { %v346_v22 = vmul.f32 %v824_v16, %v824_v16  ;;  %v315_v26 = vsel %vm311_vm0, %v824_v16, 0.0 }
  0xb3   :  { %v316_v39 = vadd.f32 %v315_v26, %v314_v32 }
  0xb4   :  { %v254_v3 = vpop.f32.mrf.mxu2  ;;  %v360_v34 = vsel %vm311_vm0, %v346_v22, 0.0 }
  0xb5   :  { %v302_v4 = vpop.f32.mrf.mxu3  ;;  %v361_v43 = vadd.f32 %v360_v34, %v359_v38  ;;  %v865_v50 = vadd.f32 %v297_v60, %v254_v3 }
  0xb6   :  { %v241_v5 = vpop.f32.mrf.mxu0 }
  0xb7   :  { %v284_v6 = vpop.f32.mrf.mxu1  ;;  %v352_v60 = vmul.f32 %v865_v50, %v865_v50 }
  0xb8   :  { %v828_v18 = vadd.f32 %v284_v6, %v241_v5 }
  0xba   :  { %v347_v27 = vmul.f32 %v828_v18, %v828_v18  ;;  %v317_v35 = vsel %vm311_vm0, %v828_v18, 0.0 }
  0xbb   :  { %v318_v44 = vadd.f32 %v317_v35, %v316_v39 }
  0xbc   :  { %v256_v7 = vpop.f32.mrf.mxu2  ;;  %v362_v40 = vsel %vm311_vm0, %v347_v27, 0.0 }
  0xbd   :  { %v818_v8 = vpop.f32.mrf.mxu3  ;;  %v363_v48 = vadd.f32 %v362_v40, %v361_v43  ;;  %v870_v57 = vadd.f32 %v299_v0, %v256_v7  ;;  %v327_v0 = vsel %vm311_vm0, %v865_v50, 0.0 }
  0xbe   :  { %v244_v10 = vpop.f32.mrf.mxu0 }
  0xbf   :  { %v287_v9 = vpop.f32.mrf.mxu1  ;;  %v329_v17 = vsel %vm311_vm0, %v870_v57, 0.0 }
  0xc0   :  { %v836_v23 = vadd.f32 %v287_v9, %v244_v10 }
  0xc2   :  { %v348_v36 = vmul.f32 %v836_v23, %v836_v23  ;;  %v319_v41 = vsel %vm311_vm0, %v836_v23, 0.0 }
  0xc3   :  { %v320_v49 = vadd.f32 %v319_v41, %v318_v44 }
  0xc4   :  { %v259_v12 = vpop.f32.mrf.mxu2  ;;  %v364_v45 = vsel %vm311_vm0, %v348_v36, 0.0 }
  0xc5   :  { %v307_v13 = vpop.f32.mrf.mxu3  ;;  %v365_v54 = vadd.f32 %v364_v45, %v363_v48  ;;  %v877_v1 = vadd.f32 %v302_v4, %v259_v12 }
  0xc6   :  { %v246_v20 = vpop.f32.mrf.mxu0 }
  0xc7   :  { %v289_v15 = vpop.f32.mrf.mxu1  ;;  %v354_v19 = vmul.f32 %v877_v1, %v877_v1 }
  0xc8   :  { %v845_v28 = vadd.f32 %v289_v15, %v246_v20  ;;  %v372_v15 = vsel %vm311_vm0, %v352_v60, 0.0 }
  0xca   :  { %v349_v42 = vmul.f32 %v845_v28, %v845_v28  ;;  %v321_v46 = vsel %vm311_vm0, %v845_v28, 0.0 }
  0xcb   :  { %v322_v55 = vadd.f32 %v321_v46, %v320_v49 }
  0xcc   :  { %v261_v29 = vpop.f32.mrf.mxu2  ;;  %v366_v51 = vsel %vm311_vm0, %v349_v42, 0.0 }
  0xcd   :  { %v309_v30 = vpop.f32.mrf.mxu3  ;;  %v367_v61 = vadd.f32 %v366_v51, %v365_v54  ;;  %v888_v7 = vadd.f32 %v818_v8, %v261_v29  ;;  %v376_v29 = vsel %vm311_vm0, %v354_v19, 0.0 }
  0xcf   :  { %v292_v33 = vpop.f32.mrf.mxu1  ;;  %v355_v24 = vmul.f32 %v888_v7, %v888_v7  ;;  %v333_v30 = vsel %vm311_vm0, %v888_v7, 0.0 }
  0xd0   :  { %v853_v37 = vadd.f32 %v292_v33, %v249_v59 }
  0xd1   :  { %v378_v34 = vsel %vm311_vm0, %v355_v24, 0.0 }
  0xd2   :  { %v350_v47 = vmul.f32 %v853_v37, %v853_v37  ;;  %v323_v52 = vsel %vm311_vm0, %v853_v37, 0.0 }
  0xd3   :  { %v324_v62 = vadd.f32 %v323_v52, %v322_v55 }
  0xd4   :  { %v264_v53 = vpop.f32.mrf.mxu2  ;;  %v368_v58 = vsel %vm311_vm0, %v350_v47, 0.0 }
  0xd5   :  { %v369_v5 = vadd.f32 %v368_v58, %v367_v61  ;;  %v891_v9 = vadd.f32 %v307_v13, %v264_v53  ;;  %v331_v13 = vsel %vm311_vm0, %v877_v1, 0.0 }
  0xd7   :  { %v294_v56 = vpop.f32.mrf.mxu1  ;;  %v356_v25 = vmul.f32 %v891_v9, %v891_v9  ;;  %v336_v31 = vsel %vm335_vm1, %v891_v9, 0.0 }
  0xd8   :  { %v873_v59 = vadd.f32 %v294_v56, %v251_v63  ;;  %v353_v63 = vmul.f32 %v870_v57, %v870_v57 }
  0xd9   :  { %v380_v35 = vsel %vm335_vm1, %v356_v25, 0.0 }
  0xda   :  { %v325_v2 = vsel %vm311_vm0, %v873_v59, 0.0  ;;  %v351_v3 = vmul.f32 %v873_v59, %v873_v59  ;;  %v374_v8 = vsel %vm311_vm0, %v353_v63, 0.0 }
  0xdb   :  { %v326_v6 = vadd.f32 %v325_v2, %v324_v62 }
  0xdc   :  { %v370_v4 = vsel %vm311_vm0, %v351_v3, 0.0  ;;  %v266_v20 = vpop.f32.mrf.mxu2 }
  0xdd   :  { %v328_v10 = vadd.f32 %v327_v0, %v326_v6  ;;  %v371_v12 = vadd.f32 %v370_v4, %v369_v5  ;;  %v393_v5 = vld [vmem:[%s985_s2] sm:$0x1] }
  0xdf   :  { %v330_v21 = vadd.f32 %v329_v17, %v328_v10  ;;  %v373_v22 = vadd.f32 %v372_v15, %v371_v12  ;;  %v406_v10 = vld [vmem:[%s986_s3] sm:$0x1] }
  0xe1   :  { %v375_v26 = vadd.f32 %v374_v8, %v373_v22  ;;  %v332_v27 = vadd.f32 %v331_v13, %v330_v21 }
  0xe3   :  { %v334_v32 = vadd.f32 %v333_v30, %v332_v27  ;;  %v377_v33 = vadd.f32 %v376_v29, %v375_v26 }
  0xe5   :  { %v337_v36 = vadd.f32 %v336_v31, %v334_v32  ;;  %v379_v38 = vadd.f32 %v378_v34, %v377_v33 }
  0xe7   :  { %v338_v39 = vrot.slane %v337_v36, 4  ;;  %v381_v40 = vadd.f32 %v380_v35, %v379_v38 }
  0xe9   :  { %v339_v41 = vadd.f32 %v338_v39, %v337_v36  ;;  %v382_v42 = vrot.slane %v381_v40, 4 }
  0xeb   :  { %v340_v43 = vrot.slane %v339_v41, 2  ;;  %v383_v44 = vadd.f32 %v382_v42, %v381_v40 }
  0xed   :  { %v341_v45 = vadd.f32 %v340_v43, %v339_v41  ;;  %v384_v46 = vrot.slane %v383_v44, 2 }
  0xef   :  { %v342_v47 = vrot.slane %v341_v45, 1  ;;  %v385_v48 = vadd.f32 %v384_v46, %v383_v44 }
  0xf1   :  { %v343_v49 = vadd.f32 %v342_v47, %v341_v45  ;;  %v386_v51 = vrot.slane %v385_v48, 1 }
  0xf3   :  { %v387_v52 = vadd.f32 %v386_v51, %v385_v48  ;;  %v388_v53 = vmul.f32 0.010204081, %v343_v49 }
  0xf5   :  { %v389_v54 = vmul.f32 0.010204081, %v387_v52  ;;  %v390_v55 = vmul.f32 %v388_v53, %v388_v53 }
  0xf7   :  { %v391_v56 = vsub.f32 %v389_v54, %v390_v55 }
  0xf9   :  { %v392_v58 = vmax.f32 %v391_v56, 0.0 }
  0xfb   :  { %v394_v61 = vadd.f32 1e-05, %v392_v58 }
  0xfd   :  { %668 = vrsqrt.f32 %v394_v61  ;;  %vm401_vm3 = vweird.f32 %v394_v61 }
 0x103   :  { %v669_v62 = vpop.eup %668 }
 0x104   :  { %v396_v60 = vmul.f32 %v669_v62, %v394_v61  ;;  %vm402_vm2 = vweird.f32 %v669_v62 }
 0x105   :  { %vm403_vm4 = vmor %vm401_vm3, %vm402_vm2  ;;  %vm506_vm3 = vcmask 516096  }
 0x106   :  { %v397_v2 = vmul.f32 %v669_v62, %v396_v60 }
 0x108   :  { %v398_v3 = vmul.f32 0.5, %v397_v2 }
 0x10a   :  { %v399_v0 = vsub.f32 1.5, %v398_v3 }
 0x10c   :  { %v400_v6 = vmul.f32 %v669_v62, %v399_v0 }
 0x10e   :  { %v404_v63 = vsel %vm403_vm4, %v669_v62, %v400_v6 }
 0x10f   :  { %v405_v4 = vmul.f32 %v404_v63, %v393_v5 }
 0x111   :  { %v407_v12 = vmul.f32 %v405_v4, %v388_v53  ;;  %v410_v17 = vperm.slane %v405_v4, 0 }
 0x113   :  { %v408_v15 = vsub.f32 %v406_v10, %v407_v12  ;;  %v412_v20 = vmul.f32 %v410_v17, %v822_v14  ;;  %v413_v21 = vmul.f32 %v410_v17, %v820_v11  ;;  %v414_v22 = vmul.f32 %v410_v17, %v824_v16 }
 0x114   :  { %v415_v8 = vmul.f32 %v410_v17, %v828_v18  ;;  %v416_v13 = vmul.f32 %v410_v17, %v836_v23  ;;  %v417_v24 = vmul.f32 %v410_v17, %v845_v28  ;;  %v418_v25 = vmul.f32 %v410_v17, %v853_v37 }
 0x115   :  { %v426_v19 = vperm.slane %v408_v15, 0  ;;  %v419_v26 = vmul.f32 %v410_v17, %v873_v59  ;;  %v420_v30 = vmul.f32 %v410_v17, %v865_v50  ;;  %v421_v14 = vmul.f32 %v410_v17, %v870_v57 }
 0x116   :  { %v422_v16 = vmul.f32 %v410_v17, %v877_v1  ;;  %v423_v18 = vmul.f32 %v410_v17, %v888_v7  ;;  %v424_v23 = vmul.f32 %v410_v17, %v891_v9 }
 0x117   :  { %v428_v27 = vadd.f32 %v426_v19, %v412_v20  ;;  %v429_v29 = vadd.f32 %v426_v19, %v413_v21  ;;  %v430_v31 = vadd.f32 %v426_v19, %v414_v22  ;;  %v431_v11 = vadd.f32 %v426_v19, %v415_v8 }
 0x118   :  { %v432_v32 = vadd.f32 %v426_v19, %v416_v13  ;;  %v433_v28 = vadd.f32 %v426_v19, %v417_v24  ;;  %v434_v37 = vadd.f32 %v426_v19, %v418_v25  ;;  %v435_v33 = vadd.f32 %v426_v19, %v419_v26 }
 0x119   :  { %v436_v59 = vadd.f32 %v426_v19, %v420_v30  ;;  %v437_v34 = vadd.f32 %v426_v19, %v421_v14  ;;  %vm441_vm6 = vcmp.gt.f32.partialorder %v428_v27, 0.0  ;;  %v454_v35 = vmul.f32 0.2, %v428_v27 }
 0x11a   :  { %v455_v50 = vmul.f32 0.2, %v429_v29  ;;  %vm442_vm7 = vcmp.gt.f32.partialorder %v429_v29, 0.0  ;;  %vm443_vm8 = vcmp.gt.f32.partialorder %v430_v31, 0.0  ;;  %v456_v57 = vmul.f32 0.2, %v430_v31 }
 0x11b   :  { %v457_v36 = vmul.f32 0.2, %v431_v11  ;;  %v438_v38 = vadd.f32 %v426_v19, %v422_v16  ;;  %v439_v1 = vadd.f32 %v426_v19, %v423_v18  ;;  %vm444_vm9 = vcmp.gt.f32.partialorder %v431_v11, 0.0 }
 0x11c   :  { %v458_v7 = vmul.f32 0.2, %v432_v32  ;;  %v440_v39 = vadd.f32 %v426_v19, %v424_v23  ;;  %vm445_vm10 = vcmp.gt.f32.partialorder %v432_v32, 0.0  ;;  %vm446_vm11 = vcmp.gt.f32.partialorder %v433_v28, 0.0 }
 0x11d   :  { %v459_v9 = vmul.f32 0.2, %v433_v28  ;;  %v460_v40 = vmul.f32 0.2, %v434_v37  ;;  %v467_v41 = vsel %vm441_vm6, %v428_v27, %v454_v35  ;;  %v468_v42 = vsel %vm442_vm7, %v429_v29, %v455_v50 }
 0x11e   :  { %v469_v43 = vsel %vm443_vm8, %v430_v31, %v456_v57  ;;  %vm447_vm12 = vcmp.gt.f32.partialorder %v434_v37, 0.0  ;;  %vm448_vm13 = vcmp.gt.f32.partialorder %v435_v33, 0.0  ;;  %v461_v44 = vmul.f32 0.2, %v435_v33 }
 0x11f   :  { %v470_v45 = vsel %vm444_vm9, %v431_v11, %v457_v36  ;;  %vm449_vm14 = vcmp.gt.f32.partialorder %v436_v59, 0.0  ;;  %v462_v46 = vmul.f32 0.2, %v436_v59  ;;  %v463_v47 = vmul.f32 0.2, %v437_v34 }
 0x120   :  { %v471_v48 = vsel %vm445_vm10, %v432_v32, %v458_v7  ;;  %v472_v49 = vsel %vm446_vm11, %v433_v28, %v459_v9  ;;  %v480_v51 = vpack.c.bf16 %v467_v41, %v467_v41  ;;  %v481_v52 = vpack.c.bf16 %v468_v42, %v468_v42 }
 0x121   :  { %v482_v53 = vpack.c.bf16 %v469_v43, %v469_v43  ;;  %vm450_vm15 = vcmp.gt.f32.partialorder %v437_v34, 0.0  ;;  %v464_v54 = vmul.f32 0.2, %v438_v38  ;;  %v473_v55 = vsel %vm447_vm12, %v434_v37, %v460_v40 }
 0x122   :  { %v483_v56 = vpack.c.bf16 %v470_v45, %v470_v45  ;;  %vm451_vm0 = vcmp.gt.f32.partialorder %v438_v38, 0.0  ;;  %v465_v58 = vmul.f32 0.2, %v439_v1  ;;  %v474_v61 = vsel %vm448_vm13, %v435_v33, %v461_v44  ;;  %494 = vst.msk [vmem:[%s987_s4] sm:$0xf] %vm493_vm5, %v480_v51 }
 0x123   :  { %v484_v62 = vpack.c.bf16 %v471_v48, %v471_v48  ;;  %vm452_vm1 = vcmp.gt.f32.partialorder %v439_v1, 0.0  ;;  %v466_v60 = vmul.f32 0.2, %v440_v39  ;;  %v475_v2 = vsel %vm449_vm14, %v436_v59, %v462_v46  ;;  %495 = vst.msk [vmem:[%s987_s4 + $0x4] sm:$0xf] %vm493_vm5, %v481_v52 }
 0x124   :  { %v485_v3 = vpack.c.bf16 %v472_v49, %v472_v49  ;;  %vm453_vm2 = vcmp.gt.f32.partialorder %v440_v39, 0.0  ;;  %v476_v0 = vsel %vm450_vm15, %v437_v34, %v463_v47  ;;  %v486_v5 = vpack.c.bf16 %v473_v55, %v473_v55  ;;  %496 = vst.msk [vmem:[%s987_s4 + $0x8] sm:$0xf] %vm493_vm5, %v482_v53 }
 0x125   :  { %v477_v6 = vsel %vm451_vm0, %v438_v38, %v464_v54  ;;  %v487_v63 = vpack.c.bf16 %v474_v61, %v474_v61  ;;  %497 = vst.msk [vmem:[%s987_s4 + $0xc] sm:$0xf] %vm493_vm5, %v483_v56  ;;  %v478_v4 = vsel %vm452_vm1, %v439_v1, %v465_v58  ;;  %v488_v10 = vpack.c.bf16 %v475_v2, %v475_v2 }
 0x126   :  { %498 = vst.msk [vmem:[%s987_s4 + $0x10] sm:$0xf] %vm493_vm5, %v484_v62  ;;  %v479_v12 = vsel %vm453_vm2, %v440_v39, %v466_v60  ;;  %v489_v15 = vpack.c.bf16 %v476_v0, %v476_v0  ;;  %v490_v17 = vpack.c.bf16 %v477_v6, %v477_v6  ;;  %v491_v19 = vpack.c.bf16 %v478_v4, %v478_v4 }
 0x127   :  { %499 = vst.msk [vmem:[%s987_s4 + $0x14] sm:$0xf] %vm493_vm5, %v485_v3  ;;  %v492_v20 = vpack.c.bf16 %v479_v12, %v479_v12 }
 0x128   :  { %500 = vst.msk [vmem:[%s987_s4 + $0x18] sm:$0xf] %vm493_vm5, %v486_v5 }
 0x129   :  { %501 = vst.msk [vmem:[%s987_s4 + $0x1c] sm:$0xf] %vm493_vm5, %v487_v63 }
 0x12a   :  { %502 = vst.msk [vmem:[%s987_s4 + $0x20] sm:$0xf] %vm493_vm5, %v488_v10 }
 0x12b   :  { %503 = vst.msk [vmem:[%s987_s4 + $0x24] sm:$0xf] %vm493_vm5, %v489_v15 }
 0x12c   :  { %504 = vst.msk [vmem:[%s987_s4 + $0x28] sm:$0xf] %vm493_vm5, %v490_v17 }
 0x12d   :  { %505 = vst.msk [vmem:[%s987_s4 + $0x2c] sm:$0xf] %vm493_vm5, %v491_v19 }
 0x12e   :  { %507 = vst.msk [vmem:[%s987_s4 + $0x30] sm:$0x1] %vm506_vm3, %v492_v20 }

// kernel: convd_forward.6
= control target key start
LH: loop header
LB: loop body
LE: loop exit
PB: predicated region body
PF: predicated region fallthrough
CT: control target
= control target key end

     0   :  { %s1596_s1 = inlined_call_operand.vmem [shape: bf16[1024,128], index: 1, kind: input, shape index: {}]   ;;  %s1597_s0 = inlined_call_operand.vmem [shape: bf16[32,1024], index: 0, kind: input, shape index: {}]   ;;  %s1598_s2 = inlined_call_operand.vmem [shape: f32[1,128], index: 2, kind: input, shape index: {}]   ;;  %s1599_s3 = inlined_call_operand.vmem [shape: f32[1,128], index: 3, kind: input, shape index: {}]   ;;  %s1600_s4 = inlined_call_operand.vmem [shape: bf16[32,128], index: 4, kind: output, shape index: {}]  }
   0x1   :  { %v1201_v0 = vld [vmem:[%s1596_s1 + $0x38] sm:$0xff]  ;;  %v1200_v4 = vld [vmem:[%s1596_s1 + $0x30] sm:$0xff]  ;;  %v1199_v8 = vld [vmem:[%s1596_s1 + $0x28] sm:$0xff] }
   0x2   :  { %v1209_v1 = vld [vmem:[%s1596_s1 + $0x78] sm:$0xff]  ;;  %625 = vmatpush.bf16.msra.mxu0 %v1201_v0  ;;  %v1208_v5 = vld [vmem:[%s1596_s1 + $0x70] sm:$0xff]  ;;  %v1207_v9 = vld [vmem:[%s1596_s1 + $0x68] sm:$0xff] }
   0x3   :  { %v1217_v2 = vld [vmem:[%s1596_s1 + $0xb8] sm:$0xff]  ;;  %644 = vmatpush.bf16.msra.mxu1 %v1209_v1  ;;  %v1216_v6 = vld [vmem:[%s1596_s1 + $0xb0] sm:$0xff]  ;;  %v1215_v10 = vld [vmem:[%s1596_s1 + $0xa8] sm:$0xff] }
   0x4   :  { %v1225_v3 = vld [vmem:[%s1596_s1 + $0xf8] sm:$0xff]  ;;  %663 = vmatpush.bf16.msra.mxu2 %v1217_v2  ;;  %v1224_v7 = vld [vmem:[%s1596_s1 + $0xf0] sm:$0xff]  ;;  %v1223_v11 = vld [vmem:[%s1596_s1 + $0xe8] sm:$0xff] }
   0x5   :  { %682 = vmatpush.bf16.msra.mxu3 %v1225_v3  ;;  %v1198_v12 = vld [vmem:[%s1596_s1 + $0x20] sm:$0xff]  ;;  %v1197_v16 = vld [vmem:[%s1596_s1 + $0x18] sm:$0xff]  ;;  %v1196_v20 = vld [vmem:[%s1596_s1 + $0x10] sm:$0xff] }
   0x6   :  { %626 = vmatpush.bf16.msra.mxu0 %v1200_v4  ;;  %v1206_v13 = vld [vmem:[%s1596_s1 + $0x60] sm:$0xff]  ;;  %v1205_v17 = vld [vmem:[%s1596_s1 + $0x58] sm:$0xff]  ;;  %v1204_v21 = vld [vmem:[%s1596_s1 + $0x50] sm:$0xff] }
   0x7   :  { %645 = vmatpush.bf16.msra.mxu1 %v1208_v5  ;;  %v1214_v14 = vld [vmem:[%s1596_s1 + $0xa0] sm:$0xff]  ;;  %v1213_v18 = vld [vmem:[%s1596_s1 + $0x98] sm:$0xff]  ;;  %v1212_v22 = vld [vmem:[%s1596_s1 + $0x90] sm:$0xff] }
   0x8   :  { %664 = vmatpush.bf16.msra.mxu2 %v1216_v6  ;;  %v1222_v15 = vld [vmem:[%s1596_s1 + $0xe0] sm:$0xff]  ;;  %v1221_v19 = vld [vmem:[%s1596_s1 + $0xd8] sm:$0xff]  ;;  %v1220_v23 = vld [vmem:[%s1596_s1 + $0xd0] sm:$0xff] }
   0x9   :  { %683 = vmatpush.bf16.msra.mxu3 %v1224_v7  ;;  %v1195_v24 = vld [vmem:[%s1596_s1 + $0x8] sm:$0xff]  ;;  %v1194_v28 = vld [vmem:[%s1596_s1] sm:$0xff]  ;;  %v1249_v40 = vld [vmem:[%s1596_s1 + $0x1b8] sm:$0xff] }
   0xa   :  { %627 = vmatpush.bf16.msra.mxu0 %v1199_v8  ;;  %v1203_v25 = vld [vmem:[%s1596_s1 + $0x48] sm:$0xff]  ;;  %v1202_v29 = vld [vmem:[%s1596_s1 + $0x40] sm:$0xff]  ;;  %v1233_v41 = vld [vmem:[%s1596_s1 + $0x138] sm:$0xff] }
   0xb   :  { %646 = vmatpush.bf16.msra.mxu1 %v1207_v9  ;;  %v1211_v26 = vld [vmem:[%s1596_s1 + $0x88] sm:$0xff]  ;;  %v1210_v30 = vld [vmem:[%s1596_s1 + $0x80] sm:$0xff]  ;;  %v1241_v46 = vld [vmem:[%s1596_s1 + $0x178] sm:$0xff] }
   0xc   :  { %665 = vmatpush.bf16.msra.mxu2 %v1215_v10  ;;  %v1219_v27 = vld [vmem:[%s1596_s1 + $0xc8] sm:$0xff]  ;;  %v1218_v31 = vld [vmem:[%s1596_s1 + $0xc0] sm:$0xff]  ;;  %v1257_v47 = vld [vmem:[%s1596_s1 + $0x1f8] sm:$0xff] }
   0xd   :  { %684 = vmatpush.bf16.msra.mxu3 %v1223_v11  ;;  %v860_v32 = vld [vmem:[%s1597_s0] sm:$0xf]  ;;  %v1178_v34 = vld [vmem:[%s1597_s0 + $0x4] sm:$0xf]  ;;  %v868_v36 = vld [vmem:[%s1597_s0 + $0x8] sm:$0xf] }
   0xe   :  { %628 = vmatpush.bf16.msra.mxu0 %v1198_v12  ;;  %v1182_v33 = vld [vmem:[%s1597_s0 + $0x1c] sm:$0xf0]  ;;  %v862_v35 = vld [vmem:[%s1597_s0 + $0x20] sm:$0xf0]  ;;  %v1183_v37 = vld [vmem:[%s1597_s0 + $0x24] sm:$0xf0] }
   0xf   :  { %647 = vmatpush.bf16.msra.mxu1 %v1206_v13  ;;  %v1179_v38 = vld [vmem:[%s1597_s0 + $0xc] sm:$0xf]  ;;  %v861_v42 = vor.u32 %v1182_v33, %v860_v32  ;;  %v865_v43 = vor.u32 %v1178_v34, %v862_v35  ;;  %v869_v44 = vor.u32 %v1183_v37, %v868_v36  ;;  %v1248_v48 = vld [vmem:[%s1596_s1 + $0x1b0] sm:$0xff]  ;;  %v1246_v56 = vld [vmem:[%s1596_s1 + $0x1a0] sm:$0xff] }
  0x10   :  { %666 = vmatpush.bf16.msra.mxu2 %v1214_v14  ;;  %v870_v39 = vld [vmem:[%s1597_s0 + $0x28] sm:$0xf0]  ;;  %v1232_v49 = vld [vmem:[%s1596_s1 + $0x130] sm:$0xff]  ;;  %v1230_v57 = vld [vmem:[%s1596_s1 + $0x120] sm:$0xff] }
  0x11   :  { %685 = vmatpush.bf16.msra.mxu3 %v1222_v15  ;;  %v873_v45 = vor.u32 %v1179_v38, %v870_v39  ;;  %v1240_v50 = vld [vmem:[%s1596_s1 + $0x170] sm:$0xff]  ;;  %v1247_v52 = vld [vmem:[%s1596_s1 + $0x1a8] sm:$0xff]  ;;  %v1238_v58 = vld [vmem:[%s1596_s1 + $0x160] sm:$0xff] }
  0x12   :  { %629 = vmatpush.bf16.msra.mxu0 %v1197_v16  ;;  %v1256_v51 = vld [vmem:[%s1596_s1 + $0x1f0] sm:$0xff]  ;;  %v1231_v53 = vld [vmem:[%s1596_s1 + $0x128] sm:$0xff]  ;;  %v1254_v59 = vld [vmem:[%s1596_s1 + $0x1e0] sm:$0xff] }
  0x13   :  { %648 = vmatpush.bf16.msra.mxu1 %v1205_v17  ;;  %v1239_v54 = vld [vmem:[%s1596_s1 + $0x168] sm:$0xff]  ;;  %v892_v60 = vld [vmem:[%s1597_s0 + $0x40] sm:$0xf]  ;;  %v1186_v62 = vld [vmem:[%s1597_s0 + $0x44] sm:$0xf] }
  0x14   :  { %667 = vmatpush.bf16.msra.mxu2 %v1213_v18  ;;  %v1255_v55 = vld [vmem:[%s1596_s1 + $0x1e8] sm:$0xff]  ;;  %v1190_v61 = vld [vmem:[%s1597_s0 + $0x5c] sm:$0xf0]  ;;  %v894_v63 = vld [vmem:[%s1597_s0 + $0x60] sm:$0xf0] }
  0x15   :  { %686 = vmatpush.bf16.msra.mxu3 %v1221_v19  ;;  %v900_v0 = vld [vmem:[%s1597_s0 + $0x48] sm:$0xf]  ;;  %v1187_v2 = vld [vmem:[%s1597_s0 + $0x4c] sm:$0xf]  ;;  %v1245_v4 = vld [vmem:[%s1596_s1 + $0x198] sm:$0xff]  ;;  %v893_v6 = vor.u32 %v1190_v61, %v892_v60  ;;  %v897_v7 = vor.u32 %v1186_v62, %v894_v63 }
  0x16   :  { %630 = vmatpush.bf16.msra.mxu0 %v1196_v20  ;;  %v1191_v1 = vld [vmem:[%s1597_s0 + $0x64] sm:$0xf0]  ;;  %v902_v3 = vld [vmem:[%s1597_s0 + $0x68] sm:$0xf0]  ;;  %v1229_v5 = vld [vmem:[%s1596_s1 + $0x118] sm:$0xff] }
  0x17   :  { %649 = vmatpush.bf16.msra.mxu1 %v1204_v21  ;;  %v901_v8 = vor.u32 %v1191_v1, %v900_v0  ;;  %v905_v9 = vor.u32 %v1187_v2, %v902_v3  ;;  %v1237_v10 = vld [vmem:[%s1596_s1 + $0x158] sm:$0xff]  ;;  %v1244_v12 = vld [vmem:[%s1596_s1 + $0x190] sm:$0xff]  ;;  %v1243_v16 = vld [vmem:[%s1596_s1 + $0x188] sm:$0xff] }
  0x18   :  { %668 = vmatpush.bf16.msra.mxu2 %v1212_v22  ;;  %v1253_v11 = vld [vmem:[%s1596_s1 + $0x1d8] sm:$0xff]  ;;  %v1228_v13 = vld [vmem:[%s1596_s1 + $0x110] sm:$0xff]  ;;  %v1227_v17 = vld [vmem:[%s1596_s1 + $0x108] sm:$0xff] }
  0x19   :  { %687 = vmatpush.bf16.msra.mxu3 %v1220_v23  ;;  %v1236_v14 = vld [vmem:[%s1596_s1 + $0x150] sm:$0xff]  ;;  %v1235_v18 = vld [vmem:[%s1596_s1 + $0x148] sm:$0xff]  ;;  %v1242_v20 = vld [vmem:[%s1596_s1 + $0x180] sm:$0xff] }
  0x1a   :  { %631 = vmatpush.bf16.msra.mxu0 %v1195_v24  ;;  %v1252_v15 = vld [vmem:[%s1596_s1 + $0x1d0] sm:$0xff]  ;;  %v1251_v19 = vld [vmem:[%s1596_s1 + $0x1c8] sm:$0xff]  ;;  %v1226_v21 = vld [vmem:[%s1596_s1 + $0x100] sm:$0xff] }
  0x1b   :  { %650 = vmatpush.bf16.msra.mxu1 %v1203_v25  ;;  %v1234_v22 = vld [vmem:[%s1596_s1 + $0x140] sm:$0xff]  ;;  %v876_v24 = vld [vmem:[%s1597_s0 + $0x10] sm:$0xf]  ;;  %v1188_v38 = vld [vmem:[%s1597_s0 + $0x54] sm:$0xf] }
  0x1c   :  { %669 = vmatpush.bf16.msra.mxu2 %v1211_v26  ;;  %v1250_v23 = vld [vmem:[%s1596_s1 + $0x1c0] sm:$0xff]  ;;  %v1184_v25 = vld [vmem:[%s1597_s0 + $0x2c] sm:$0xf0]  ;;  %v1180_v26 = vld [vmem:[%s1597_s0 + $0x14] sm:$0xf] }
  0x1d   :  { %688 = vmatpush.bf16.msra.mxu3 %v1219_v27  ;;  %v878_v27 = vld [vmem:[%s1597_s0 + $0x30] sm:$0xf0]  ;;  %v877_v32 = vor.u32 %v1184_v25, %v876_v24  ;;  %v908_v36 = vld [vmem:[%s1597_s0 + $0x50] sm:$0xf] }
  0x1e   :  { %632 = vmatpush.bf16.msra.mxu0 %v1194_v28  ;;  %v884_v28 = vld [vmem:[%s1597_s0 + $0x18] sm:$0xf]  ;;  %v881_v33 = vor.u32 %v1180_v26, %v878_v27  ;;  %v1192_v37 = vld [vmem:[%s1597_s0 + $0x6c] sm:$0xf0]  ;;  %v910_v39 = vld [vmem:[%s1597_s0 + $0x70] sm:$0xf0] }
  0x1f   :  { %651 = vmatpush.bf16.msra.mxu1 %v1202_v29  ;;  %v1185_v29 = vld [vmem:[%s1597_s0 + $0x34] sm:$0xf0] }
  0x20   :  { %670 = vmatpush.bf16.msra.mxu2 %v1210_v30  ;;  %v1181_v30 = vld [vmem:[%s1597_s0 + $0x1c] sm:$0xf]  ;;  %v885_v34 = vor.u32 %v1185_v29, %v884_v28 }
  0x21   :  { %689 = vmatpush.bf16.msra.mxu3 %v1218_v31  ;;  %633 = vmatmul.bf16.vlgmr.msra.gmra.mxu0 %v861_v42  ;;  %v886_v31 = vld [vmem:[%s1597_s0 + $0x38] sm:$0xf0] }
  0x22   :  { %701 = vmatpush.bf16.msrb.mxu0 %v1233_v41  ;;  %652 = vmatmul.bf16.vlgmr.msra.gmra.mxu1 %v865_v43  ;;  %v889_v35 = vor.u32 %v1181_v30, %v886_v31  ;;  %v1193_v41 = vld [vmem:[%s1597_s0 + $0x74] sm:$0xf0]  ;;  %v1189_v42 = vld [vmem:[%s1597_s0 + $0x5c] sm:$0xf] }
  0x23   :  { %671 = vmatmul.bf16.vlgmr.msra.gmra.mxu2 %v869_v44  ;;  %720 = vmatpush.bf16.msrb.mxu1 %v1241_v46  ;;  %v918_v43 = vld [vmem:[%s1597_s0 + $0x78] sm:$0xf0]  ;;  %v909_v44 = vor.u32 %v1192_v37, %v908_v36 }
  0x24   :  { %739 = vmatpush.bf16.msrb.mxu2 %v1249_v40  ;;  %690 = vmatmul.bf16.vlgmr.msra.gmra.mxu3 %v873_v45  ;;  %v916_v40 = vld [vmem:[%s1597_s0 + $0x58] sm:$0xf]  ;;  %v913_v45 = vor.u32 %v1188_v38, %v910_v39 }
  0x25   :  { %758 = vmatpush.bf16.msrb.mxu3 %v1257_v47  ;;  %v917_v46 = vor.u32 %v1193_v41, %v916_v40  ;;  %v921_v47 = vor.u32 %v1189_v42, %v918_v43 }
  0x26   :  { %702 = vmatpush.bf16.msrb.mxu0 %v1232_v49 }
  0x27   :  { %721 = vmatpush.bf16.msrb.mxu1 %v1240_v50 }
  0x28   :  { %740 = vmatpush.bf16.msrb.mxu2 %v1248_v48 }
  0x29   :  { %759 = vmatpush.bf16.msrb.mxu3 %v1256_v51 }
  0x2a   :  { %703 = vmatpush.bf16.msrb.mxu0 %v1231_v53 }
  0x2b   :  { %722 = vmatpush.bf16.msrb.mxu1 %v1239_v54 }
  0x2c   :  { %741 = vmatpush.bf16.msrb.mxu2 %v1247_v52 }
  0x2d   :  { %760 = vmatpush.bf16.msrb.mxu3 %v1255_v55 }
  0x2e   :  { %704 = vmatpush.bf16.msrb.mxu0 %v1230_v57 }
  0x2f   :  { %723 = vmatpush.bf16.msrb.mxu1 %v1238_v58 }
  0x30   :  { %742 = vmatpush.bf16.msrb.mxu2 %v1246_v56 }
  0x31   :  { %761 = vmatpush.bf16.msrb.mxu3 %v1254_v59  ;;  %638 = vmatmul.bf16.gmra.mxu0 %v893_v6 }
  0x32   :  { %705 = vmatpush.bf16.msrb.mxu0 %v1229_v5  ;;  %657 = vmatmul.bf16.gmra.mxu1 %v897_v7 }
  0x33   :  { %676 = vmatmul.bf16.gmra.mxu2 %v901_v8  ;;  %724 = vmatpush.bf16.msrb.mxu1 %v1237_v10 }
  0x34   :  { %743 = vmatpush.bf16.msrb.mxu2 %v1245_v4  ;;  %695 = vmatmul.bf16.gmra.mxu3 %v905_v9 }
  0x35   :  { %762 = vmatpush.bf16.msrb.mxu3 %v1253_v11 }
  0x36   :  { %706 = vmatpush.bf16.msrb.mxu0 %v1228_v13 }
  0x37   :  { %725 = vmatpush.bf16.msrb.mxu1 %v1236_v14 }
  0x38   :  { %744 = vmatpush.bf16.msrb.mxu2 %v1244_v12 }
  0x39   :  { %763 = vmatpush.bf16.msrb.mxu3 %v1252_v15 }
  0x3a   :  { %707 = vmatpush.bf16.msrb.mxu0 %v1227_v17 }
  0x3b   :  { %726 = vmatpush.bf16.msrb.mxu1 %v1235_v18 }
  0x3c   :  { %745 = vmatpush.bf16.msrb.mxu2 %v1243_v16 }
  0x3d   :  { %764 = vmatpush.bf16.msrb.mxu3 %v1251_v19 }
  0x3e   :  { %708 = vmatpush.bf16.msrb.mxu0 %v1226_v21 }
  0x3f   :  { %727 = vmatpush.bf16.msrb.mxu1 %v1234_v22 }
  0x40   :  { %746 = vmatpush.bf16.msrb.mxu2 %v1242_v20 }
  0x41   :  { %765 = vmatpush.bf16.msrb.mxu3 %v1250_v23  ;;  %709 = vmatmul.bf16.vlgmr.msrb.gmra.mxu0 %v877_v32 }
  0x42   :  { %728 = vmatmul.bf16.vlgmr.msrb.gmra.mxu1 %v881_v33 }
  0x43   :  { %747 = vmatmul.bf16.vlgmr.msrb.gmra.mxu2 %v885_v34 }
  0x44   :  { %766 = vmatmul.bf16.vlgmr.msrb.gmra.mxu3 %v889_v35 }
  0x51   :  { %714 = vmatmul.bf16.gmra.mxu0 %v909_v44 }
  0x52   :  { %733 = vmatmul.bf16.gmra.mxu1 %v913_v45 }
  0x53   :  { %752 = vmatmul.bf16.gmra.mxu2 %v917_v46 }
  0x54   :  { %771 = vmatmul.bf16.gmra.mxu3 %v921_v47 }
  0x9e   :  { %v634_v48 = vpop.f32.mrf.mxu0 }
  0x9f   :  { %v653_v49 = vpop.f32.mrf.mxu1 }
  0xa0   :  { %v654_v7 = vadd.f32 %v653_v49, %v634_v48 }
  0xa6   :  { %v672_v50 = vpop.f32.mrf.mxu2  ;;  %v636_v52 = vpop.f32.mrf.mxu0 }
  0xa7   :  { %v691_v51 = vpop.f32.mrf.mxu3  ;;  %v655_v53 = vpop.f32.mrf.mxu1  ;;  %v673_v10 = vadd.f32 %v672_v50, %v654_v7 }
  0xa8   :  { %v656_v3 = vadd.f32 %v655_v53, %v636_v52 }
  0xa9   :  { %v692_v14 = vadd.f32 %v691_v51, %v673_v10 }
  0xae   :  { %v674_v54 = vpop.f32.mrf.mxu2  ;;  %v639_v56 = vpop.f32.mrf.mxu0 }
  0xaf   :  { %v693_v55 = vpop.f32.mrf.mxu3  ;;  %v658_v57 = vpop.f32.mrf.mxu1  ;;  %v675_v8 = vadd.f32 %v674_v54, %v656_v3 }
  0xb0   :  { %v659_v9 = vadd.f32 %v658_v57, %v639_v56 }
  0xb1   :  { %v694_v12 = vadd.f32 %v693_v55, %v675_v8 }
  0xb6   :  { %v677_v58 = vpop.f32.mrf.mxu2  ;;  %v641_v60 = vpop.f32.mrf.mxu0 }
  0xb7   :  { %v696_v59 = vpop.f32.mrf.mxu3  ;;  %v660_v61 = vpop.f32.mrf.mxu1  ;;  %v678_v11 = vadd.f32 %v677_v58, %v659_v9 }
  0xb8   :  { %v661_v19 = vadd.f32 %v660_v61, %v641_v60 }
  0xb9   :  { %v697_v15 = vadd.f32 %v696_v59, %v678_v11 }
  0xbe   :  { %v679_v62 = vpop.f32.mrf.mxu2  ;;  %v710_v0 = vpop.f32.mrf.mxu0 }
  0xbf   :  { %v698_v63 = vpop.f32.mrf.mxu3  ;;  %v729_v1 = vpop.f32.mrf.mxu1  ;;  %v711_v20 = vadd.f32 %v710_v0, %v692_v14  ;;  %v680_v23 = vadd.f32 %v679_v62, %v661_v19 }
  0xc1   :  { %v730_v25 = vadd.f32 %v729_v1, %v711_v20  ;;  %v699_v29 = vadd.f32 %v698_v63, %v680_v23 }
  0xc6   :  { %v748_v2 = vpop.f32.mrf.mxu2  ;;  %v712_v5 = vpop.f32.mrf.mxu0 }
  0xc7   :  { %v767_v4 = vpop.f32.mrf.mxu3  ;;  %v731_v6 = vpop.f32.mrf.mxu1  ;;  %v713_v16 = vadd.f32 %v712_v5, %v694_v12  ;;  %v749_v30 = vadd.f32 %v748_v2, %v730_v25 }
  0xc9   :  { %v732_v24 = vadd.f32 %v731_v6, %v713_v16  ;;  %v768_v36 = vadd.f32 %v767_v4, %v749_v30 }
  0xcb   :  { %v786_v42 = vmul.f32 %v768_v36, %v768_v36 }
  0xce   :  { %v750_v13 = vpop.f32.mrf.mxu2  ;;  %v715_v18 = vpop.f32.mrf.mxu0 }
  0xcf   :  { %v769_v17 = vpop.f32.mrf.mxu3  ;;  %v716_v21 = vadd.f32 %v715_v18, %v697_v15  ;;  %v734_v22 = vpop.f32.mrf.mxu1  ;;  %v751_v26 = vadd.f32 %v750_v13, %v732_v24  ;;  %v804_v13 = vld [vmem:[%s1598_s2] sm:$0x1] }
  0xd1   :  { %v735_v27 = vadd.f32 %v734_v22, %v716_v21  ;;  %v770_v34 = vadd.f32 %v769_v17, %v751_v26  ;;  %v817_v17 = vld [vmem:[%s1599_s3] sm:$0x1] }
  0xd3   :  { %v787_v39 = vmul.f32 %v770_v34, %v770_v34  ;;  %v777_v43 = vadd.f32 %v770_v34, %v768_v36 }
  0xd5   :  { %v790_v47 = vadd.f32 %v787_v39, %v786_v42 }
  0xd6   :  { %v753_v28 = vpop.f32.mrf.mxu2  ;;  %v717_v33 = vpop.f32.mrf.mxu0 }
  0xd7   :  { %v754_v31 = vadd.f32 %v753_v28, %v735_v27  ;;  %v772_v32 = vpop.f32.mrf.mxu3  ;;  %v718_v35 = vadd.f32 %v717_v33, %v699_v29  ;;  %v736_v38 = vpop.f32.mrf.mxu1 }
  0xd9   :  { %v773_v37 = vadd.f32 %v772_v32, %v754_v31  ;;  %v737_v40 = vadd.f32 %v736_v38, %v718_v35 }
  0xdb   :  { %v788_v44 = vmul.f32 %v773_v37, %v773_v37  ;;  %v778_v48 = vadd.f32 %v777_v43, %v773_v37 }
  0xdd   :  { %v791_v50 = vadd.f32 %v790_v47, %v788_v44 }
  0xde   :  { %v755_v41 = vpop.f32.mrf.mxu2 }
  0xdf   :  { %v756_v45 = vadd.f32 %v755_v41, %v737_v40  ;;  %v774_v46 = vpop.f32.mrf.mxu3 }
  0xe1   :  { %v775_v49 = vadd.f32 %v774_v46, %v756_v45 }
  0xe3   :  { %v779_v51 = vadd.f32 %v778_v48, %v775_v49  ;;  %v789_v52 = vmul.f32 %v775_v49, %v775_v49 }
  0xe5   :  { %v780_v53 = vrot.slane %v779_v51, 4  ;;  %v792_v54 = vadd.f32 %v791_v50, %v789_v52 }
  0xe7   :  { %v781_v55 = vadd.f32 %v780_v53, %v779_v51  ;;  %v793_v56 = vrot.slane %v792_v54, 4 }
  0xe9   :  { %v782_v57 = vrot.slane %v781_v55, 2  ;;  %v794_v58 = vadd.f32 %v793_v56, %v792_v54 }
  0xeb   :  { %v783_v59 = vadd.f32 %v782_v57, %v781_v55  ;;  %v795_v60 = vrot.slane %v794_v58, 2 }
  0xed   :  { %v784_v61 = vrot.slane %v783_v59, 1  ;;  %v796_v62 = vadd.f32 %v795_v60, %v794_v58 }
  0xef   :  { %v785_v63 = vadd.f32 %v784_v61, %v783_v59  ;;  %v797_v0 = vrot.slane %v796_v62, 1 }
  0xf1   :  { %v798_v1 = vadd.f32 %v797_v0, %v796_v62  ;;  %v799_v2 = vmul.f32 0.03125, %v785_v63 }
  0xf3   :  { %v800_v3 = vmul.f32 0.03125, %v798_v1  ;;  %v801_v4 = vmul.f32 %v799_v2, %v799_v2 }
  0xf5   :  { %v802_v5 = vsub.f32 %v800_v3, %v801_v4 }
  0xf7   :  { %v803_v6 = vmax.f32 %v802_v5, 0.0 }
  0xf9   :  { %v805_v7 = vadd.f32 1e-05, %v803_v6 }
  0xfb   :  { %1269 = vrsqrt.f32 %v805_v7  ;;  %vm812_vm1 = vweird.f32 %v805_v7 }
 0x101   :  { %v1270_v8 = vpop.eup %1269 }
 0x102   :  { %v807_v9 = vmul.f32 %v1270_v8, %v805_v7  ;;  %vm813_vm0 = vweird.f32 %v1270_v8 }
 0x103   :  { %vm814_vm2 = vmor %vm812_vm1, %vm813_vm0 }
 0x104   :  { %v808_v10 = vmul.f32 %v1270_v8, %v807_v9 }
 0x106   :  { %v809_v11 = vmul.f32 0.5, %v808_v10 }
 0x108   :  { %v810_v12 = vsub.f32 1.5, %v809_v11 }
 0x10a   :  { %v811_v14 = vmul.f32 %v1270_v8, %v810_v12 }
 0x10c   :  { %v815_v15 = vsel %vm814_vm2, %v1270_v8, %v811_v14 }
 0x10d   :  { %v816_v16 = vmul.f32 %v815_v15, %v804_v13 }
 0x10f   :  { %v818_v18 = vmul.f32 %v816_v16, %v799_v2  ;;  %v821_v19 = vperm.slane %v816_v16, 0 }
 0x111   :  { %v819_v20 = vsub.f32 %v817_v17, %v818_v18  ;;  %v823_v21 = vmul.f32 %v821_v19, %v768_v36  ;;  %v824_v22 = vmul.f32 %v821_v19, %v770_v34  ;;  %v825_v23 = vmul.f32 %v821_v19, %v773_v37 }
 0x112   :  { %v826_v24 = vmul.f32 %v821_v19, %v775_v49 }
 0x113   :  { %v828_v25 = vperm.slane %v819_v20, 0 }
 0x115   :  { %v830_v26 = vadd.f32 %v828_v25, %v823_v21  ;;  %v831_v27 = vadd.f32 %v828_v25, %v824_v22  ;;  %v832_v28 = vadd.f32 %v828_v25, %v825_v23  ;;  %v833_v29 = vadd.f32 %v828_v25, %v826_v24 }
 0x117   :  { %vm834_vm3 = vcmp.gt.f32.partialorder %v830_v26, 0.0  ;;  %vm835_vm4 = vcmp.gt.f32.partialorder %v831_v27, 0.0  ;;  %vm836_vm5 = vcmp.gt.f32.partialorder %v832_v28, 0.0  ;;  %vm837_vm6 = vcmp.gt.f32.partialorder %v833_v29, 0.0 }
 0x118   :  { %v838_v30 = vmul.f32 0.2, %v830_v26  ;;  %v839_v31 = vmul.f32 0.2, %v831_v27  ;;  %v840_v32 = vmul.f32 0.2, %v832_v28 }
 0x119   :  { %v841_v33 = vmul.f32 0.2, %v833_v29 }
 0x11a   :  { %v842_v35 = vsel %vm834_vm3, %v830_v26, %v838_v30  ;;  %v843_v38 = vsel %vm835_vm4, %v831_v27, %v839_v31  ;;  %v844_v39 = vsel %vm836_vm5, %v832_v28, %v840_v32 }
 0x11b   :  { %v845_v36 = vsel %vm837_vm6, %v833_v29, %v841_v33  ;;  %v1261_v34 = vpack.c.bf16 %v843_v38, %v842_v35 }
 0x11c   :  { %v1266_v37 = vpack.c.bf16 %v845_v36, %v844_v39 }
 0x11d   :  { %1262 = vst [vmem:[%s1600_s4] sm:$0xff] %v1261_v34  }
 0x11e   :  { %1268 = vst [vmem:[%s1600_s4 + $0x8] sm:$0xff] %v1266_v37  }

// kernel: convd_forward.7
= control target key start
LH: loop header
LB: loop body
LE: loop exit
PB: predicated region body
PF: predicated region fallthrough
CT: control target
= control target key end

     0   :  { %vm2015_vm0 = vcmask 1041408   ;;  %vm2082_vm6 = vcmask 1040384   ;;  %vm2210_vm13 = vcmask 1024   ;;  %s5270_s1 = inlined_call_operand.vmem [shape: bf16[2048,256], index: 1, kind: input, shape index: {}]   ;;  %s5271_s0 = inlined_call_operand.vmem [shape: bf16[2,2048], index: 0, kind: input, shape index: {}]   ;;  %s5272_s4 = inlined_call_operand.vmem [shape: f32[256,1], index: 4, kind: input, shape index: {}]   ;;  %s5273_s5 = inlined_call_operand.<no memory space> [shape: f32[1,1], index: 5, kind: input, shape index: {}]   ;;  %s5274_s2 = inlined_call_operand.vmem [shape: f32[1,256], index: 2, kind: input, shape index: {}]   ;;  %s5275_s3 = inlined_call_operand.vmem [shape: f32[1,256], index: 3, kind: input, shape index: {}]   ;;  %s5276_s6 = inlined_call_operand.vmem [shape: f32[2,1], index: 6, kind: output, shape index: {}]  }
   0x1   :  { %v2274_v0 = vld [vmem:[%s5270_s1 + $0x70] sm:$0xf]  ;;  %v3256_v1 = vld [vmem:[%s5270_s1 + $0x74] sm:$0xf0]  ;;  %v2266_v11 = vld [vmem:[%s5270_s1 + $0x60] sm:$0xf] }
   0x2   :  { %v2338_v2 = vld [vmem:[%s5270_s1 + $0xf0] sm:$0xf]  ;;  %v2275_v3 = vor.u32 %v3256_v1, %v2274_v0  ;;  %v3272_v4 = vld [vmem:[%s5270_s1 + $0xf4] sm:$0xf0]  ;;  %v3254_v13 = vld [vmem:[%s5270_s1 + $0x64] sm:$0xf0] }
   0x3   :  { %v2402_v5 = vld [vmem:[%s5270_s1 + $0x170] sm:$0xf]  ;;  %v3288_v6 = vld [vmem:[%s5270_s1 + $0x174] sm:$0xf0]  ;;  %v2339_v7 = vor.u32 %v3272_v4, %v2338_v2  ;;  %v2330_v14 = vld [vmem:[%s5270_s1 + $0xe0] sm:$0xf]  ;;  %v2267_v16 = vor.u32 %v3254_v13, %v2266_v11 }
   0x4   :  { %v2403_v8 = vor.u32 %v3288_v6, %v2402_v5  ;;  %v2466_v9 = vld [vmem:[%s5270_s1 + $0x1f0] sm:$0xf]  ;;  %v3304_v10 = vld [vmem:[%s5270_s1 + $0x1f4] sm:$0xf0]  ;;  %1599 = vmatpush.bf16.msra.mxu0 %v2275_v3  ;;  %v3270_v15 = vld [vmem:[%s5270_s1 + $0xe4] sm:$0xf0] }
   0x5   :  { %v2467_v12 = vor.u32 %v3304_v10, %v2466_v9  ;;  %1612 = vmatpush.bf16.msra.mxu1 %v2339_v7  ;;  %v2331_v17 = vor.u32 %v3270_v15, %v2330_v14  ;;  %v2394_v18 = vld [vmem:[%s5270_s1 + $0x160] sm:$0xf]  ;;  %v3286_v19 = vld [vmem:[%s5270_s1 + $0x164] sm:$0xf0]  ;;  %v2258_v23 = vld [vmem:[%s5270_s1 + $0x50] sm:$0xf] }
   0x6   :  { %1625 = vmatpush.bf16.msra.mxu2 %v2403_v8  ;;  %v2458_v20 = vld [vmem:[%s5270_s1 + $0x1e0] sm:$0xf]  ;;  %v2395_v21 = vor.u32 %v3286_v19, %v2394_v18  ;;  %v3302_v22 = vld [vmem:[%s5270_s1 + $0x1e4] sm:$0xf0]  ;;  %v3252_v24 = vld [vmem:[%s5270_s1 + $0x54] sm:$0xf0] }
   0x7   :  { %1638 = vmatpush.bf16.msra.mxu3 %v2467_v12  ;;  %v2459_v25 = vor.u32 %v3302_v22, %v2458_v20  ;;  %v2322_v26 = vld [vmem:[%s5270_s1 + $0xd0] sm:$0xf]  ;;  %v3268_v27 = vld [vmem:[%s5270_s1 + $0xd4] sm:$0xf0]  ;;  %v2259_v29 = vor.u32 %v3252_v24, %v2258_v23  ;;  %v2250_v35 = vld [vmem:[%s5270_s1 + $0x40] sm:$0xf] }
   0x8   :  { %v2386_v28 = vld [vmem:[%s5270_s1 + $0x150] sm:$0xf]  ;;  %1600 = vmatpush.bf16.msra.mxu0 %v2267_v16  ;;  %v3284_v30 = vld [vmem:[%s5270_s1 + $0x154] sm:$0xf0]  ;;  %v2323_v33 = vor.u32 %v3268_v27, %v2322_v26  ;;  %v3250_v36 = vld [vmem:[%s5270_s1 + $0x44] sm:$0xf0] }
   0x9   :  { %v2450_v31 = vld [vmem:[%s5270_s1 + $0x1d0] sm:$0xf]  ;;  %v3300_v32 = vld [vmem:[%s5270_s1 + $0x1d4] sm:$0xf0]  ;;  %1613 = vmatpush.bf16.msra.mxu1 %v2331_v17  ;;  %v2387_v34 = vor.u32 %v3284_v30, %v2386_v28  ;;  %v2314_v37 = vld [vmem:[%s5270_s1 + $0xc0] sm:$0xf]  ;;  %v2251_v44 = vor.u32 %v3250_v36, %v2250_v35 }
   0xa   :  { %1626 = vmatpush.bf16.msra.mxu2 %v2395_v21  ;;  %v2451_v38 = vor.u32 %v3300_v32, %v2450_v31  ;;  %v3266_v39 = vld [vmem:[%s5270_s1 + $0xc4] sm:$0xf0]  ;;  %v2378_v40 = vld [vmem:[%s5270_s1 + $0x140] sm:$0xf]  ;;  %v2242_v47 = vld [vmem:[%s5270_s1 + $0x30] sm:$0xf] }
   0xb   :  { %1639 = vmatpush.bf16.msra.mxu3 %v2459_v25  ;;  %v3282_v41 = vld [vmem:[%s5270_s1 + $0x144] sm:$0xf0]  ;;  %v2442_v42 = vld [vmem:[%s5270_s1 + $0x1c0] sm:$0xf]  ;;  %v2315_v45 = vor.u32 %v3266_v39, %v2314_v37  ;;  %v3248_v48 = vld [vmem:[%s5270_s1 + $0x34] sm:$0xf0] }
   0xc   :  { %v3298_v43 = vld [vmem:[%s5270_s1 + $0x1c4] sm:$0xf0]  ;;  %1601 = vmatpush.bf16.msra.mxu0 %v2259_v29  ;;  %v2379_v46 = vor.u32 %v3282_v41, %v2378_v40  ;;  %v2306_v49 = vld [vmem:[%s5270_s1 + $0xb0] sm:$0xf]  ;;  %v3264_v51 = vld [vmem:[%s5270_s1 + $0xb4] sm:$0xf0]  ;;  %v2243_v56 = vor.u32 %v3248_v48, %v2242_v47 }
   0xd   :  { %1614 = vmatpush.bf16.msra.mxu1 %v2323_v33  ;;  %v2443_v50 = vor.u32 %v3298_v43, %v2442_v42  ;;  %v2370_v52 = vld [vmem:[%s5270_s1 + $0x130] sm:$0xf]  ;;  %v3280_v53 = vld [vmem:[%s5270_s1 + $0x134] sm:$0xf0]  ;;  %v2307_v57 = vor.u32 %v3264_v51, %v2306_v49  ;;  %v2234_v59 = vld [vmem:[%s5270_s1 + $0x20] sm:$0xf] }
   0xe   :  { %1627 = vmatpush.bf16.msra.mxu2 %v2387_v34  ;;  %v2434_v54 = vld [vmem:[%s5270_s1 + $0x1b0] sm:$0xf]  ;;  %v3296_v55 = vld [vmem:[%s5270_s1 + $0x1b4] sm:$0xf0]  ;;  %v2371_v58 = vor.u32 %v3280_v53, %v2370_v52  ;;  %v3246_v60 = vld [vmem:[%s5270_s1 + $0x24] sm:$0xf0] }
   0xf   :  { %1640 = vmatpush.bf16.msra.mxu3 %v2451_v38  ;;  %v2298_v61 = vld [vmem:[%s5270_s1 + $0xa0] sm:$0xf]  ;;  %v2435_v62 = vor.u32 %v3296_v55, %v2434_v54  ;;  %v3262_v63 = vld [vmem:[%s5270_s1 + $0xa4] sm:$0xf0]  ;;  %v2235_v4 = vor.u32 %v3246_v60, %v2234_v59  ;;  %v2226_v7 = vld [vmem:[%s5270_s1 + $0x10] sm:$0xf] }
  0x10   :  { %1602 = vmatpush.bf16.msra.mxu0 %v2251_v44  ;;  %v2362_v0 = vld [vmem:[%s5270_s1 + $0x120] sm:$0xf]  ;;  %v3278_v1 = vld [vmem:[%s5270_s1 + $0x124] sm:$0xf0]  ;;  %v2299_v5 = vor.u32 %v3262_v63, %v2298_v61  ;;  %v3244_v8 = vld [vmem:[%s5270_s1 + $0x14] sm:$0xf0] }
  0x11   :  { %1615 = vmatpush.bf16.msra.mxu1 %v2315_v45  ;;  %v2426_v2 = vld [vmem:[%s5270_s1 + $0x1a0] sm:$0xf]  ;;  %v3294_v3 = vld [vmem:[%s5270_s1 + $0x1a4] sm:$0xf0]  ;;  %v2363_v6 = vor.u32 %v3278_v1, %v2362_v0  ;;  %v2290_v9 = vld [vmem:[%s5270_s1 + $0x90] sm:$0xf]  ;;  %v2227_v16 = vor.u32 %v3244_v8, %v2226_v7 }
  0x12   :  { %1628 = vmatpush.bf16.msra.mxu2 %v2379_v46  ;;  %v2427_v10 = vor.u32 %v3294_v3, %v2426_v2  ;;  %v3260_v11 = vld [vmem:[%s5270_s1 + $0x94] sm:$0xf0]  ;;  %v2354_v12 = vld [vmem:[%s5270_s1 + $0x110] sm:$0xf]  ;;  %v2218_v17 = vld [vmem:[%s5270_s1] sm:$0xf] }
  0x13   :  { %1641 = vmatpush.bf16.msra.mxu3 %v2443_v50  ;;  %v3276_v13 = vld [vmem:[%s5270_s1 + $0x114] sm:$0xf0]  ;;  %v2418_v14 = vld [vmem:[%s5270_s1 + $0x190] sm:$0xf]  ;;  %v3242_v18 = vld [vmem:[%s5270_s1 + $0x4] sm:$0xf0]  ;;  %v2291_v19 = vor.u32 %v3260_v11, %v2290_v9 }
  0x14   :  { %1603 = vmatpush.bf16.msra.mxu0 %v2243_v56  ;;  %v3292_v15 = vld [vmem:[%s5270_s1 + $0x194] sm:$0xf0]  ;;  %v2355_v20 = vor.u32 %v3276_v13, %v2354_v12  ;;  %v2282_v21 = vld [vmem:[%s5270_s1 + $0x80] sm:$0xf]  ;;  %v3258_v22 = vld [vmem:[%s5270_s1 + $0x84] sm:$0xf0]  ;;  %v2219_v31 = vor.u32 %v3242_v18, %v2218_v17 }
  0x15   :  { %1616 = vmatpush.bf16.msra.mxu1 %v2307_v57  ;;  %v2346_v23 = vld [vmem:[%s5270_s1 + $0x100] sm:$0xf]  ;;  %v2419_v24 = vor.u32 %v3292_v15, %v2418_v14  ;;  %v3274_v25 = vld [vmem:[%s5270_s1 + $0x104] sm:$0xf0]  ;;  %v2530_v28 = vld [vmem:[%s5270_s1 + $0x270] sm:$0xf]  ;;  %v2283_v35 = vor.u32 %v3258_v22, %v2282_v21 }
  0x16   :  { %1629 = vmatpush.bf16.msra.mxu2 %v2371_v58  ;;  %v2410_v26 = vld [vmem:[%s5270_s1 + $0x180] sm:$0xf]  ;;  %v3290_v27 = vld [vmem:[%s5270_s1 + $0x184] sm:$0xf0]  ;;  %v3320_v29 = vld [vmem:[%s5270_s1 + $0x274] sm:$0xf0]  ;;  %v2347_v36 = vor.u32 %v3274_v25, %v2346_v23 }
  0x17   :  { %1642 = vmatpush.bf16.msra.mxu3 %v2435_v62  ;;  %v2594_v30 = vld [vmem:[%s5270_s1 + $0x2f0] sm:$0xf]  ;;  %v3336_v32 = vld [vmem:[%s5270_s1 + $0x2f4] sm:$0xf0]  ;;  %v2411_v39 = vor.u32 %v3290_v27, %v2410_v26  ;;  %v2531_v40 = vor.u32 %v3320_v29, %v2530_v28  ;;  %v2522_v43 = vld [vmem:[%s5270_s1 + $0x260] sm:$0xf] }
  0x18   :  { %1604 = vmatpush.bf16.msra.mxu0 %v2235_v4  ;;  %v2658_v33 = vld [vmem:[%s5270_s1 + $0x370] sm:$0xf]  ;;  %v3352_v34 = vld [vmem:[%s5270_s1 + $0x374] sm:$0xf0]  ;;  %v2595_v41 = vor.u32 %v3336_v32, %v2594_v30  ;;  %v3318_v44 = vld [vmem:[%s5270_s1 + $0x264] sm:$0xf0] }
  0x19   :  { %1617 = vmatpush.bf16.msra.mxu1 %v2299_v5  ;;  %v2722_v37 = vld [vmem:[%s5270_s1 + $0x3f0] sm:$0xf]  ;;  %v3368_v38 = vld [vmem:[%s5270_s1 + $0x3f4] sm:$0xf0]  ;;  %v2659_v42 = vor.u32 %v3352_v34, %v2658_v33  ;;  %v2586_v45 = vld [vmem:[%s5270_s1 + $0x2e0] sm:$0xf]  ;;  %v2523_v52 = vor.u32 %v3318_v44, %v2522_v43 }
  0x1a   :  { %1630 = vmatpush.bf16.msra.mxu2 %v2363_v6  ;;  %v2723_v46 = vor.u32 %v3368_v38, %v2722_v37  ;;  %v3334_v47 = vld [vmem:[%s5270_s1 + $0x2e4] sm:$0xf0]  ;;  %v2650_v48 = vld [vmem:[%s5270_s1 + $0x360] sm:$0xf]  ;;  %v2514_v53 = vld [vmem:[%s5270_s1 + $0x250] sm:$0xf] }
  0x1b   :  { %1643 = vmatpush.bf16.msra.mxu3 %v2427_v10  ;;  %v3350_v49 = vld [vmem:[%s5270_s1 + $0x364] sm:$0xf0]  ;;  %v2714_v50 = vld [vmem:[%s5270_s1 + $0x3e0] sm:$0xf]  ;;  %v3316_v54 = vld [vmem:[%s5270_s1 + $0x254] sm:$0xf0]  ;;  %v2587_v55 = vor.u32 %v3334_v47, %v2586_v45 }
  0x1c   :  { %1605 = vmatpush.bf16.msra.mxu0 %v2227_v16  ;;  %v3366_v51 = vld [vmem:[%s5270_s1 + $0x3e4] sm:$0xf0]  ;;  %v2651_v56 = vor.u32 %v3350_v49, %v2650_v48  ;;  %v2578_v57 = vld [vmem:[%s5270_s1 + $0x2d0] sm:$0xf]  ;;  %v3332_v58 = vld [vmem:[%s5270_s1 + $0x2d4] sm:$0xf0]  ;;  %v2515_v1 = vor.u32 %v3316_v54, %v2514_v53 }
  0x1d   :  { %1618 = vmatpush.bf16.msra.mxu1 %v2291_v19  ;;  %v25_v59 = vld [vmem:[%s5271_s0] sm:$0xff]  ;;  %v2715_v60 = vor.u32 %v3366_v51, %v2714_v50  ;;  %v2642_v61 = vld [vmem:[%s5270_s1 + $0x350] sm:$0xf]  ;;  %v3348_v62 = vld [vmem:[%s5270_s1 + $0x354] sm:$0xf0]  ;;  %v2579_v2 = vor.u32 %v3332_v58, %v2578_v57 }
  0x1e   :  { %1631 = vmatpush.bf16.msra.mxu2 %v2355_v20  ;;  %284 = vst [vmem:[#allocation1] ss:$9 sm:$0xff] %v25_v59  ;;  %v2706_v63 = vld [vmem:[%s5270_s1 + $0x3d0] sm:$0xf]  ;;  %v3364_v0 = vld [vmem:[%s5270_s1 + $0x3d4] sm:$0xf0]  ;;  %v2643_v3 = vor.u32 %v3348_v62, %v2642_v61 }
  0x1f   :  { %1644 = vmatpush.bf16.msra.mxu3 %v2419_v24  ;;  %v2506_v4 = vld [vmem:[%s5270_s1 + $0x240] sm:$0xf]  ;;  %v3314_v5 = vld [vmem:[%s5270_s1 + $0x244] sm:$0xf0]  ;;  %v2707_v7 = vor.u32 %v3364_v0, %v2706_v63  ;;  %v2498_v13 = vld [vmem:[%s5270_s1 + $0x230] sm:$0xf] }
  0x20   :  { %1606 = vmatpush.bf16.msra.mxu0 %v2219_v31  ;;  %v2570_v6 = vld [vmem:[%s5270_s1 + $0x2c0] sm:$0xf]  ;;  %v3330_v8 = vld [vmem:[%s5270_s1 + $0x2c4] sm:$0xf0]  ;;  %v2507_v14 = vor.u32 %v3314_v5, %v2506_v4  ;;  %v3312_v15 = vld [vmem:[%s5270_s1 + $0x234] sm:$0xf0] }
  0x21   :  { %1619 = vmatpush.bf16.msra.mxu1 %v2283_v35  ;;  %v2634_v9 = vld [vmem:[%s5270_s1 + $0x340] sm:$0xf]  ;;  %v3346_v10 = vld [vmem:[%s5270_s1 + $0x344] sm:$0xf0]  ;;  %v2562_v16 = vld [vmem:[%s5270_s1 + $0x2b0] sm:$0xf]  ;;  %v2571_v18 = vor.u32 %v3330_v8, %v2570_v6  ;;  %v2499_v29 = vor.u32 %v3312_v15, %v2498_v13 }
  0x22   :  { %1632 = vmatpush.bf16.msra.mxu2 %v2347_v36  ;;  %v2698_v11 = vld [vmem:[%s5270_s1 + $0x3c0] sm:$0xf]  ;;  %v3362_v12 = vld [vmem:[%s5270_s1 + $0x3c4] sm:$0xf0]  ;;  %v3328_v17 = vld [vmem:[%s5270_s1 + $0x2b4] sm:$0xf0]  ;;  %v2635_v19 = vor.u32 %v3346_v10, %v2634_v9 }
  0x23   :  { %1645 = vmatpush.bf16.msra.mxu3 %v2411_v39  ;;  %v2699_v23 = vor.u32 %v3362_v12, %v2698_v11  ;;  %v2626_v24 = vld [vmem:[%s5270_s1 + $0x330] sm:$0xf]  ;;  %v3344_v25 = vld [vmem:[%s5270_s1 + $0x334] sm:$0xf0]  ;;  %v2563_v30 = vor.u32 %v3328_v17, %v2562_v16  ;;  %v2490_v32 = vld [vmem:[%s5270_s1 + $0x220] sm:$0xf] }
  0x24   :  { %1651 = vmatpush.bf16.msrb.mxu0 %v2531_v40  ;;  %v2690_v27 = vld [vmem:[%s5270_s1 + $0x3b0] sm:$0xf]  ;;  %v3360_v28 = vld [vmem:[%s5270_s1 + $0x3b4] sm:$0xf0]  ;;  %v2627_v31 = vor.u32 %v3344_v25, %v2626_v24  ;;  %v3310_v33 = vld [vmem:[%s5270_s1 + $0x224] sm:$0xf0] }
  0x25   :  { %1664 = vmatpush.bf16.msrb.mxu1 %v2595_v41  ;;  %v3852_v20 = vld [vmem:[#allocation1 + $0x12] sm:$0xff]  ;;  %v3854_v21 = vld [vmem:[#allocation1] sm:$0xff]  ;;  %v3865_v26 = vld [vmem:[#allocation1 + $0x9] sm:$0xff]  ;;  %v2691_v35 = vor.u32 %v3360_v28, %v2690_v27  ;;  %v2491_v41 = vor.u32 %v3310_v33, %v2490_v32 }
  0x26   :  { %1677 = vmatpush.bf16.msrb.mxu2 %v2659_v42  ;;  %v3856_v22 = vld [vmem:[#allocation1 + $0x1b] sm:$0xff]  ;;  %1607 = vmatmul.bf16.vlgmr.msra.gmra.mxu0 %v3854_v21  ;;  %v3326_v36 = vld [vmem:[%s5270_s1 + $0x2a4] sm:$0xf0]  ;;  %v2482_v42 = vld [vmem:[%s5270_s1 + $0x210] sm:$0xf] }
  0x27   :  { %1690 = vmatpush.bf16.msrb.mxu3 %v2723_v46  ;;  %1633 = vmatmul.bf16.vlgmr.msra.gmra.mxu2 %v3852_v20  ;;  %v2554_v34 = vld [vmem:[%s5270_s1 + $0x2a0] sm:$0xf]  ;;  %v3342_v38 = vld [vmem:[%s5270_s1 + $0x324] sm:$0xf0]  ;;  %v3308_v46 = vld [vmem:[%s5270_s1 + $0x214] sm:$0xf0] }
  0x28   :  { %1652 = vmatpush.bf16.msrb.mxu0 %v2523_v52  ;;  %1646 = vmatmul.bf16.vlgmr.msra.gmra.mxu3 %v3856_v22  ;;  %v2618_v37 = vld [vmem:[%s5270_s1 + $0x320] sm:$0xf]  ;;  %v3358_v40 = vld [vmem:[%s5270_s1 + $0x3a4] sm:$0xf0]  ;;  %v2555_v44 = vor.u32 %v3326_v36, %v2554_v34  ;;  %v2546_v47 = vld [vmem:[%s5270_s1 + $0x290] sm:$0xf] }
  0x29   :  { %1665 = vmatpush.bf16.msrb.mxu1 %v2587_v55  ;;  %v2682_v39 = vld [vmem:[%s5270_s1 + $0x3a0] sm:$0xf]  ;;  %v26_v43 = vld [vmem:[%s5271_s0 + $0x8] sm:$0xff]  ;;  %v2619_v45 = vor.u32 %v3342_v38, %v2618_v37  ;;  %v3324_v48 = vld [vmem:[%s5270_s1 + $0x294] sm:$0xf0] }
  0x2a   :  { %1678 = vmatpush.bf16.msrb.mxu2 %v2651_v56  ;;  %1620 = vmatmul.bf16.vlgmr.msra.gmra.mxu1 %v3865_v26  ;;  %v2683_v49 = vor.u32 %v3358_v40, %v2682_v39  ;;  %v2610_v50 = vld [vmem:[%s5270_s1 + $0x310] sm:$0xf]  ;;  %v3340_v51 = vld [vmem:[%s5270_s1 + $0x314] sm:$0xf0]  ;;  %v2474_v54 = vld [vmem:[%s5270_s1 + $0x200] sm:$0xf]  ;;  %v2483_v56 = vor.u32 %v3308_v46, %v2482_v42  ;;  %v2547_v62 = vor.u32 %v3324_v48, %v2546_v47 }
  0x2b   :  { %1691 = vmatpush.bf16.msrb.mxu3 %v2715_v60  ;;  %v2674_v52 = vld [vmem:[%s5270_s1 + $0x390] sm:$0xf]  ;;  %v3356_v53 = vld [vmem:[%s5270_s1 + $0x394] sm:$0xf0]  ;;  %v3306_v55 = vld [vmem:[%s5270_s1 + $0x204] sm:$0xf0]  ;;  %v2611_v63 = vor.u32 %v3340_v51, %v2610_v50 }
  0x2c   :  { %1653 = vmatpush.bf16.msrb.mxu0 %v2515_v1  ;;  %v2538_v57 = vld [vmem:[%s5270_s1 + $0x280] sm:$0xf]  ;;  %v3322_v58 = vld [vmem:[%s5270_s1 + $0x284] sm:$0xf0]  ;;  %v3945_v61 = vld [vmem:[#allocation1 + $0x36] sm:$0xff]  ;;  %v2475_v9 = vor.u32 %v3306_v55, %v2474_v54 }
  0x2d   :  { %1666 = vmatpush.bf16.msrb.mxu1 %v2579_v2  ;;  %v2602_v59 = vld [vmem:[%s5270_s1 + $0x300] sm:$0xf]  ;;  %v3338_v60 = vld [vmem:[%s5270_s1 + $0x304] sm:$0xf0]  ;;  %v3951_v2 = vld [vmem:[#allocation1 + $0x2d] sm:$0xff]  ;;  %v2539_v13 = vor.u32 %v3322_v58, %v2538_v57 }
  0x2e   :  { %1679 = vmatpush.bf16.msrb.mxu2 %v2643_v3  ;;  %v3947_v0 = vld [vmem:[#allocation1 + $0x24] sm:$0xff]  ;;  %v2675_v3 = vor.u32 %v3356_v53, %v2674_v52  ;;  %v2666_v4 = vld [vmem:[%s5270_s1 + $0x380] sm:$0xf]  ;;  %v2786_v6 = vld [vmem:[%s5270_s1 + $0x470] sm:$0xf] }
  0x2f   :  { %1692 = vmatpush.bf16.msrb.mxu3 %v2707_v7  ;;  %v3949_v1 = vld [vmem:[#allocation1 + $0x3f] sm:$0xff]  ;;  %v3354_v5 = vld [vmem:[%s5270_s1 + $0x384] sm:$0xf0]  ;;  %v3384_v7 = vld [vmem:[%s5270_s1 + $0x474] sm:$0xf0] }
  0x30   :  { %1654 = vmatpush.bf16.msrb.mxu0 %v2507_v14  ;;  %294 = vst [vmem:[#allocation1] ss:$9 sm:$0xff] %v26_v43  ;;  %v2850_v8 = vld [vmem:[%s5270_s1 + $0x4f0] sm:$0xf]  ;;  %v3400_v10 = vld [vmem:[%s5270_s1 + $0x4f4] sm:$0xf0]  ;;  %v2603_v14 = vor.u32 %v3338_v60, %v2602_v59  ;;  %v2667_v17 = vor.u32 %v3354_v5, %v2666_v4 }
  0x31   :  { %1667 = vmatpush.bf16.msrb.mxu1 %v2571_v18  ;;  %v2914_v11 = vld [vmem:[%s5270_s1 + $0x570] sm:$0xf]  ;;  %v3416_v12 = vld [vmem:[%s5270_s1 + $0x574] sm:$0xf0]  ;;  %v2787_v18 = vor.u32 %v3384_v7, %v2786_v6  ;;  %v2778_v24 = vld [vmem:[%s5270_s1 + $0x460] sm:$0xf] }
  0x32   :  { %1680 = vmatpush.bf16.msrb.mxu2 %v2635_v19  ;;  %v2978_v15 = vld [vmem:[%s5270_s1 + $0x5f0] sm:$0xf]  ;;  %v3432_v16 = vld [vmem:[%s5270_s1 + $0x5f4] sm:$0xf0]  ;;  %v2851_v19 = vor.u32 %v3400_v10, %v2850_v8  ;;  %v3382_v25 = vld [vmem:[%s5270_s1 + $0x464] sm:$0xf0] }
  0x33   :  { %1693 = vmatpush.bf16.msrb.mxu3 %v2699_v23  ;;  %v2915_v23 = vor.u32 %v3416_v12, %v2914_v11  ;;  %v2842_v27 = vld [vmem:[%s5270_s1 + $0x4e0] sm:$0xf]  ;;  %v2979_v28 = vor.u32 %v3432_v16, %v2978_v15  ;;  %v3430_v33 = vld [vmem:[%s5270_s1 + $0x5e4] sm:$0xf0]  ;;  %v2779_v34 = vor.u32 %v3382_v25, %v2778_v24  ;;  %v2770_v37 = vld [vmem:[%s5270_s1 + $0x450] sm:$0xf] }
  0x34   :  { %1655 = vmatpush.bf16.msrb.mxu0 %v2499_v29  ;;  %v3398_v29 = vld [vmem:[%s5270_s1 + $0x4e4] sm:$0xf0]  ;;  %v2970_v32 = vld [vmem:[%s5270_s1 + $0x5e0] sm:$0xf]  ;;  %v3380_v38 = vld [vmem:[%s5270_s1 + $0x454] sm:$0xf0] }
  0x35   :  { %1668 = vmatpush.bf16.msrb.mxu1 %v2563_v30  ;;  %v2906_v30 = vld [vmem:[%s5270_s1 + $0x560] sm:$0xf]  ;;  %v2834_v39 = vld [vmem:[%s5270_s1 + $0x4d0] sm:$0xf]  ;;  %v2971_v40 = vor.u32 %v3430_v33, %v2970_v32  ;;  %v3412_v43 = vld [vmem:[%s5270_s1 + $0x554] sm:$0xf0]  ;;  %v2771_v46 = vor.u32 %v3380_v38, %v2770_v37 }
  0x36   :  { %1681 = vmatpush.bf16.msrb.mxu2 %v2627_v31  ;;  %v3414_v31 = vld [vmem:[%s5270_s1 + $0x564] sm:$0xf0]  ;;  %v2898_v42 = vld [vmem:[%s5270_s1 + $0x550] sm:$0xf]  ;;  %v2826_v51 = vld [vmem:[%s5270_s1 + $0x4c0] sm:$0xf] }
  0x37   :  { %1694 = vmatpush.bf16.msrb.mxu3 %v2691_v35  ;;  %v2843_v35 = vor.u32 %v3398_v29, %v2842_v27  ;;  %v2907_v36 = vor.u32 %v3414_v31, %v2906_v30  ;;  %v2899_v48 = vor.u32 %v3412_v43, %v2898_v42  ;;  %v3378_v50 = vld [vmem:[%s5270_s1 + $0x444] sm:$0xf0]  ;;  %v2890_v54 = vld [vmem:[%s5270_s1 + $0x540] sm:$0xf]  ;;  %v3392_v5 = vld [vmem:[%s5270_s1 + $0x4b4] sm:$0xf0] }
  0x38   :  { %1656 = vmatpush.bf16.msrb.mxu0 %v2491_v41  ;;  %v3396_v41 = vld [vmem:[%s5270_s1 + $0x4d4] sm:$0xf0]  ;;  %v3394_v53 = vld [vmem:[%s5270_s1 + $0x4c4] sm:$0xf0]  ;;  %v2882_v6 = vld [vmem:[%s5270_s1 + $0x530] sm:$0xf] }
  0x39   :  { %1669 = vmatpush.bf16.msrb.mxu1 %v2555_v44  ;;  %v2962_v44 = vld [vmem:[%s5270_s1 + $0x5d0] sm:$0xf]  ;;  %v2835_v47 = vor.u32 %v3396_v41, %v2834_v39  ;;  %v3410_v55 = vld [vmem:[%s5270_s1 + $0x544] sm:$0xf0]  ;;  %v2827_v59 = vor.u32 %v3394_v53, %v2826_v51  ;;  %v3408_v7 = vld [vmem:[%s5270_s1 + $0x534] sm:$0xf0] }
  0x3a   :  { %1682 = vmatpush.bf16.msrb.mxu2 %v2619_v45  ;;  %v3428_v45 = vld [vmem:[%s5270_s1 + $0x5d4] sm:$0xf0]  ;;  %v3426_v57 = vld [vmem:[%s5270_s1 + $0x5c4] sm:$0xf0]  ;;  %v2891_v60 = vor.u32 %v3410_v55, %v2890_v54  ;;  %v2946_v8 = vld [vmem:[%s5270_s1 + $0x5b0] sm:$0xf]  ;;  %v2883_v12 = vor.u32 %v3408_v7, %v2882_v6 }
  0x3b   :  { %1695 = vmatpush.bf16.msrb.mxu3 %v2683_v49  ;;  %v2762_v49 = vld [vmem:[%s5270_s1 + $0x440] sm:$0xf]  ;;  %v2963_v52 = vor.u32 %v3428_v45, %v2962_v44  ;;  %v3422_v24 = vld [vmem:[%s5270_s1 + $0x5a4] sm:$0xf0]  ;;  %v2738_v29 = vld [vmem:[%s5270_s1 + $0x410] sm:$0xf] }
  0x3c   :  { %1657 = vmatpush.bf16.msrb.mxu0 %v2483_v56  ;;  %v2954_v56 = vld [vmem:[%s5270_s1 + $0x5c0] sm:$0xf]  ;;  %v2763_v58 = vor.u32 %v3378_v50, %v2762_v49  ;;  %v3372_v30 = vld [vmem:[%s5270_s1 + $0x414] sm:$0xf0]  ;;  %v2802_v31 = vld [vmem:[%s5270_s1 + $0x490] sm:$0xf] }
  0x3d   :  { %1670 = vmatpush.bf16.msrb.mxu1 %v2547_v62  ;;  %v2754_v62 = vld [vmem:[%s5270_s1 + $0x430] sm:$0xf]  ;;  %v2955_v4 = vor.u32 %v3426_v57, %v2954_v56  ;;  %v2810_v15 = vld [vmem:[%s5270_s1 + $0x4a0] sm:$0xf]  ;;  %v3388_v33 = vld [vmem:[%s5270_s1 + $0x494] sm:$0xf0]  ;;  %v2739_v38 = vor.u32 %v3372_v30, %v2738_v29 }
  0x3e   :  { %1683 = vmatpush.bf16.msrb.mxu2 %v2611_v63  ;;  %v3376_v63 = vld [vmem:[%s5270_s1 + $0x434] sm:$0xf0]  ;;  %v2730_v39 = vld [vmem:[%s5270_s1 + $0x400] sm:$0xf]  ;;  %v2803_v41 = vor.u32 %v3388_v33, %v2802_v31  ;;  %v3386_v44 = vld [vmem:[%s5270_s1 + $0x484] sm:$0xf0] }
  0x3f   :  { %1696 = vmatpush.bf16.msrb.mxu3 %v2675_v3  ;;  %v2818_v3 = vld [vmem:[%s5270_s1 + $0x4b0] sm:$0xf]  ;;  %v2755_v10 = vor.u32 %v3376_v63, %v2754_v62  ;;  %v3420_v37 = vld [vmem:[%s5270_s1 + $0x594] sm:$0xf0]  ;;  %v2794_v43 = vld [vmem:[%s5270_s1 + $0x480] sm:$0xf] }
  0x40   :  { %1658 = vmatpush.bf16.msrb.mxu0 %v2475_v9  ;;  %v3424_v9 = vld [vmem:[%s5270_s1 + $0x5b4] sm:$0xf0]  ;;  %v2819_v11 = vor.u32 %v3392_v5, %v2818_v3  ;;  %v2858_v45 = vld [vmem:[%s5270_s1 + $0x500] sm:$0xf]  ;;  %v3418_v49 = vld [vmem:[%s5270_s1 + $0x584] sm:$0xf0]  ;;  %v2795_v57 = vor.u32 %v3386_v44, %v2794_v43 }
  0x41   :  { %1671 = vmatpush.bf16.msrb.mxu1 %v2539_v13  ;;  %v2746_v13 = vld [vmem:[%s5270_s1 + $0x420] sm:$0xf]  ;;  %v2947_v16 = vor.u32 %v3424_v9, %v2946_v8  ;;  %v3042_v50 = vld [vmem:[%s5270_s1 + $0x670] sm:$0xf]  ;;  %v3448_v51 = vld [vmem:[%s5270_s1 + $0x674] sm:$0xf0] }
  0x42   :  { %1684 = vmatpush.bf16.msrb.mxu2 %v2603_v14  ;;  %v3374_v14 = vld [vmem:[%s5270_s1 + $0x424] sm:$0xf0]  ;;  %v3464_v54 = vld [vmem:[%s5270_s1 + $0x6f4] sm:$0xf0]  ;;  %v3170_v55 = vld [vmem:[%s5270_s1 + $0x770] sm:$0xf]  ;;  %v3043_v63 = vor.u32 %v3448_v51, %v3042_v50 }
  0x43   :  { %1697 = vmatpush.bf16.msrb.mxu3 %v2667_v17  ;;  %1659 = vmatmul.bf16.vlgmr.msrb.gmra.mxu0 %v3947_v0  ;;  %v3390_v17 = vld [vmem:[%s5270_s1 + $0x4a4] sm:$0xf0]  ;;  %v2747_v25 = vor.u32 %v3374_v14, %v2746_v13  ;;  %v3480_v56 = vld [vmem:[%s5270_s1 + $0x774] sm:$0xf0]  ;;  %v3034_v5 = vld [vmem:[%s5270_s1 + $0x660] sm:$0xf] }
  0x44   :  { %1703 = vmatpush.bf16.msra.mxu0 %v2787_v18  ;;  %1672 = vmatmul.bf16.vlgmr.msrb.gmra.mxu1 %v3951_v2  ;;  %v2874_v18 = vld [vmem:[%s5270_s1 + $0x520] sm:$0xf]  ;;  %v2811_v27 = vor.u32 %v3390_v17, %v2810_v15  ;;  %v3446_v6 = vld [vmem:[%s5270_s1 + $0x664] sm:$0xf0]  ;;  %v297_v15 = vld [vmem:[#allocation1 + $0x12] sm:$0xff] }
  0x45   :  { %1716 = vmatpush.bf16.msra.mxu1 %v2851_v19  ;;  %1685 = vmatmul.bf16.vlgmr.msrb.gmra.mxu2 %v3945_v61  ;;  %v3406_v19 = vld [vmem:[%s5270_s1 + $0x524] sm:$0xf0]  ;;  %v3098_v7 = vld [vmem:[%s5270_s1 + $0x6e0] sm:$0xf]  ;;  %v3460_v29 = vld [vmem:[%s5270_s1 + $0x6d4] sm:$0xf0] }
  0x46   :  { %1729 = vmatpush.bf16.msra.mxu2 %v2915_v23  ;;  %1698 = vmatmul.bf16.vlgmr.msrb.gmra.mxu3 %v3949_v1  ;;  %v2938_v23 = vld [vmem:[%s5270_s1 + $0x5a0] sm:$0xf]  ;;  %v3462_v9 = vld [vmem:[%s5270_s1 + $0x6e4] sm:$0xf0]  ;;  %v3154_v30 = vld [vmem:[%s5270_s1 + $0x750] sm:$0xf] }
  0x47   :  { %1742 = vmatpush.bf16.msra.mxu3 %v2979_v28  ;;  %v2875_v28 = vor.u32 %v3406_v19, %v2874_v18  ;;  %v2939_v32 = vor.u32 %v3422_v24, %v2938_v23  ;;  %v3226_v13 = vld [vmem:[%s5270_s1 + $0x7e0] sm:$0xf]  ;;  %v3494_v14 = vld [vmem:[%s5270_s1 + $0x7e4] sm:$0xf0]  ;;  %v3035_v18 = vor.u32 %v3446_v6, %v3034_v5  ;;  %v3099_v19 = vor.u32 %v3462_v9, %v3098_v7  ;;  %v3026_v24 = vld [vmem:[%s5270_s1 + $0x650] sm:$0xf] }
  0x48   :  { %1704 = vmatpush.bf16.msra.mxu0 %v2779_v34  ;;  %v2866_v34 = vld [vmem:[%s5270_s1 + $0x510] sm:$0xf]  ;;  %v298_v17 = vld [vmem:[#allocation1 + $0x1b] sm:$0xff]  ;;  %v3474_v43 = vld [vmem:[%s5270_s1 + $0x744] sm:$0xf0] }
  0x49   :  { %1717 = vmatpush.bf16.msra.mxu1 %v2843_v35  ;;  %v3404_v35 = vld [vmem:[%s5270_s1 + $0x514] sm:$0xf0]  ;;  %v3210_v44 = vld [vmem:[%s5270_s1 + $0x7c0] sm:$0xf]  ;;  %v3074_v51 = vld [vmem:[%s5270_s1 + $0x6b0] sm:$0xf] }
  0x4a   :  { %1730 = vmatpush.bf16.msra.mxu2 %v2907_v36  ;;  %v2930_v36 = vld [vmem:[%s5270_s1 + $0x590] sm:$0xf]  ;;  %v2867_v42 = vor.u32 %v3404_v35, %v2866_v34  ;;  %v3476_v31 = vld [vmem:[%s5270_s1 + $0x754] sm:$0xf0]  ;;  %v3454_v5 = vld [vmem:[%s5270_s1 + $0x6a4] sm:$0xf0] }
  0x4b   :  { %1743 = vmatpush.bf16.msra.mxu3 %v2971_v40  ;;  %v3370_v40 = vld [vmem:[%s5270_s1 + $0x404] sm:$0xf0]  ;;  %v3492_v33 = vld [vmem:[%s5270_s1 + $0x7d4] sm:$0xf0]  ;;  %v3130_v6 = vld [vmem:[%s5270_s1 + $0x720] sm:$0xf] }
  0x4c   :  { %1705 = vmatpush.bf16.msra.mxu0 %v2771_v46  ;;  %v2931_v46 = vor.u32 %v3420_v37, %v2930_v36  ;;  %v2731_v53 = vor.u32 %v3370_v40, %v2730_v39  ;;  %v3155_v36 = vor.u32 %v3476_v31, %v3154_v30  ;;  %v3018_v37 = vld [vmem:[%s5270_s1 + $0x640] sm:$0xf]  ;;  %v3440_v50 = vld [vmem:[%s5270_s1 + $0x634] sm:$0xf0]  ;;  %v3470_v7 = vld [vmem:[%s5270_s1 + $0x724] sm:$0xf0] }
  0x4d   :  { %1718 = vmatpush.bf16.msra.mxu1 %v2835_v47  ;;  %v3402_v47 = vld [vmem:[%s5270_s1 + $0x504] sm:$0xf0]  ;;  %v3082_v39 = vld [vmem:[%s5270_s1 + $0x6c0] sm:$0xf] }
  0x4e   :  { %1731 = vmatpush.bf16.msra.mxu2 %v2899_v48  ;;  %v2922_v48 = vld [vmem:[%s5270_s1 + $0x580] sm:$0xf]  ;;  %v3486_v9 = vld [vmem:[%s5270_s1 + $0x7a4] sm:$0xf0] }
  0x4f   :  { %1744 = vmatpush.bf16.msra.mxu3 %v2963_v52  ;;  %v3106_v52 = vld [vmem:[%s5270_s1 + $0x6f0] sm:$0xf]  ;;  %v2923_v62 = vor.u32 %v3418_v49, %v2922_v48  ;;  %v3050_v31 = vld [vmem:[%s5270_s1 + $0x680] sm:$0xf] }
  0x50   :  { %1706 = vmatpush.bf16.msra.mxu0 %v2763_v58  ;;  %v2859_v58 = vor.u32 %v3402_v47, %v2858_v45  ;;  %v3107_v3 = vor.u32 %v3464_v54, %v3106_v52  ;;  %v3490_v45 = vld [vmem:[%s5270_s1 + $0x7c4] sm:$0xf0]  ;;  %v3010_v49 = vld [vmem:[%s5270_s1 + $0x630] sm:$0xf] }
  0x51   :  { %1719 = vmatpush.bf16.msra.mxu1 %v2827_v59  ;;  %v3234_v59 = vld [vmem:[%s5270_s1 + $0x7f0] sm:$0xf]  ;;  %v3211_v52 = vor.u32 %v3490_v45, %v3210_v44  ;;  %v2404_v44 = vld [vmem:[%s5270_s1 + $0x178] sm:$0xf0] }
  0x52   :  { %1732 = vmatpush.bf16.msra.mxu2 %v2891_v60  ;;  %v3496_v60 = vld [vmem:[%s5270_s1 + $0x7f4] sm:$0xf0]  ;;  %v3138_v54 = vld [vmem:[%s5270_s1 + $0x730] sm:$0xf] }
  0x53   :  { %1745 = vmatpush.bf16.msra.mxu3 %v2955_v4  ;;  %v3171_v4 = vor.u32 %v3480_v56, %v3170_v55  ;;  %v3235_v8 = vor.u32 %v3496_v60, %v3234_v59  ;;  %v3472_v55 = vld [vmem:[%s5270_s1 + $0x734] sm:$0xf0]  ;;  %v3202_v56 = vld [vmem:[%s5270_s1 + $0x7b0] sm:$0xf] }
  0x54   :  { %1707 = vmatpush.bf16.msra.mxu0 %v2755_v10  ;;  %v3162_v10 = vld [vmem:[%s5270_s1 + $0x760] sm:$0xf]  ;;  %v3139_v60 = vor.u32 %v3472_v55, %v3138_v54  ;;  %v2268_v54 = vld [vmem:[%s5270_s1 + $0x68] sm:$0xf0]  ;;  %v3269_v55 = vld [vmem:[%s5270_s1 + $0xe4] sm:$0xf] }
  0x55   :  { %1720 = vmatpush.bf16.msra.mxu1 %v2819_v11  ;;  %v3478_v11 = vld [vmem:[%s5270_s1 + $0x764] sm:$0xf0] }
  0x56   :  { %1733 = vmatpush.bf16.msra.mxu2 %v2883_v12  ;;  %v295_v12 = vld [vmem:[#allocation1] sm:$0xff]  ;;  %v3163_v23 = vor.u32 %v3478_v11, %v3162_v10 }
  0x57   :  { %1746 = vmatpush.bf16.msra.mxu3 %v2947_v16  ;;  %v296_v16 = vld [vmem:[#allocation1 + $0x9] sm:$0xff] }
  0x58   :  { %1708 = vmatpush.bf16.msra.mxu0 %v2747_v25  ;;  %v3444_v25 = vld [vmem:[%s5270_s1 + $0x654] sm:$0xf0] }
  0x59   :  { %1721 = vmatpush.bf16.msra.mxu1 %v2811_v27  ;;  %v3090_v27 = vld [vmem:[%s5270_s1 + $0x6d0] sm:$0xf]  ;;  %v3027_v34 = vor.u32 %v3444_v25, %v3026_v24  ;;  %v3484_v24 = vld [vmem:[%s5270_s1 + $0x794] sm:$0xf0] }
  0x5a   :  { %1734 = vmatpush.bf16.msra.mxu2 %v2875_v28  ;;  %v3227_v28 = vor.u32 %v3494_v14, %v3226_v13  ;;  %v3091_v35 = vor.u32 %v3460_v29, %v3090_v27  ;;  %v2994_v13 = vld [vmem:[%s5270_s1 + $0x610] sm:$0xf]  ;;  %v3436_v14 = vld [vmem:[%s5270_s1 + $0x614] sm:$0xf0]  ;;  %v2986_v27 = vld [vmem:[%s5270_s1 + $0x600] sm:$0xf] }
  0x5b   :  { %1747 = vmatpush.bf16.msra.mxu3 %v2939_v32  ;;  %v3218_v32 = vld [vmem:[%s5270_s1 + $0x7d0] sm:$0xf]  ;;  %v2995_v25 = vor.u32 %v3436_v14, %v2994_v13  ;;  %v2324_v13 = vld [vmem:[%s5270_s1 + $0xd8] sm:$0xf0]  ;;  %v3283_v14 = vld [vmem:[%s5270_s1 + $0x154] sm:$0xf] }
  0x5c   :  { %1709 = vmatpush.bf16.msra.mxu0 %v2739_v38  ;;  %v3442_v38 = vld [vmem:[%s5270_s1 + $0x644] sm:$0xf0]  ;;  %v3219_v40 = vor.u32 %v3492_v33, %v3218_v32  ;;  %v3114_v33 = vld [vmem:[%s5270_s1 + $0x700] sm:$0xf] }
  0x5d   :  { %1722 = vmatpush.bf16.msra.mxu1 %v2803_v41  ;;  %v3458_v41 = vld [vmem:[%s5270_s1 + $0x6c4] sm:$0xf0] }
  0x5e   :  { %1735 = vmatpush.bf16.msra.mxu2 %v2867_v42  ;;  %v3146_v42 = vld [vmem:[%s5270_s1 + $0x740] sm:$0xf]  ;;  %v3083_v47 = vor.u32 %v3458_v41, %v3082_v39  ;;  %v3450_v32 = vld [vmem:[%s5270_s1 + $0x684] sm:$0xf0]  ;;  %v2276_v39 = vld [vmem:[%s5270_s1 + $0x78] sm:$0xf0] }
  0x5f   :  { %1748 = vmatpush.bf16.msra.mxu3 %v2931_v46  ;;  %v3019_v46 = vor.u32 %v3442_v38, %v3018_v37  ;;  %v3147_v48 = vor.u32 %v3474_v43, %v3146_v42  ;;  %v3482_v37 = vld [vmem:[%s5270_s1 + $0x784] sm:$0xf0]  ;;  %v3255_v38 = vld [vmem:[%s5270_s1 + $0x74] sm:$0xf]  ;;  %v2340_v42 = vld [vmem:[%s5270_s1 + $0xf8] sm:$0xf0]  ;;  %v3051_v45 = vor.u32 %v3450_v32, %v3050_v31 }
  0x60   :  { %1710 = vmatpush.bf16.msra.mxu0 %v2731_v53  ;;  %v3456_v53 = vld [vmem:[%s5270_s1 + $0x6b4] sm:$0xf0]  ;;  %v3287_v43 = vld [vmem:[%s5270_s1 + $0x174] sm:$0xf]  ;;  %v2380_v31 = vld [vmem:[%s5270_s1 + $0x148] sm:$0xf0] }
  0x61   :  { %1723 = vmatpush.bf16.msra.mxu1 %v2795_v57  ;;  %v3488_v57 = vld [vmem:[%s5270_s1 + $0x7b4] sm:$0xf0]  ;;  %v3075_v59 = vor.u32 %v3456_v53, %v3074_v51  ;;  %v3253_v53 = vld [vmem:[%s5270_s1 + $0x64] sm:$0xf] }
  0x62   :  { %1736 = vmatpush.bf16.msra.mxu2 %v2859_v58  ;;  %v3011_v58 = vor.u32 %v3440_v50, %v3010_v49  ;;  %v2279_v50 = vor.u32 %v3255_v38, %v2276_v39  ;;  %v3297_v32 = vld [vmem:[%s5270_s1 + $0x1c4] sm:$0xf]  ;;  %v2244_v38 = vld [vmem:[%s5270_s1 + $0x38] sm:$0xf0]  ;;  %v3263_v39 = vld [vmem:[%s5270_s1 + $0xb4] sm:$0xf] }
  0x63   :  { %1749 = vmatpush.bf16.msra.mxu3 %v2923_v62  ;;  %1711 = vmatmul.bf16.vlgmr.msra.gmra.mxu0 %v295_v12  ;;  %v3002_v62 = vld [vmem:[%s5270_s1 + $0x620] sm:$0xf]  ;;  %v3131_v12 = vor.u32 %v3470_v7, %v3130_v6  ;;  %v2271_v6 = vor.u32 %v3253_v53, %v2268_v54  ;;  %v2300_v53 = vld [vmem:[%s5270_s1 + $0xa8] sm:$0xf0]  ;;  %v3277_v54 = vld [vmem:[%s5270_s1 + $0x124] sm:$0xf] }
  0x64   :  { %1755 = vmatpush.bf16.msrb.mxu0 %v3043_v63  ;;  %1724 = vmatmul.bf16.vlgmr.msra.gmra.mxu1 %v296_v16  ;;  %v3438_v63 = vld [vmem:[%s5270_s1 + $0x624] sm:$0xf0] }
  0x65   :  { %1768 = vmatpush.bf16.msrb.mxu1 %v3107_v3  ;;  %1737 = vmatmul.bf16.vlgmr.msra.gmra.mxu2 %v297_v15  ;;  %v3066_v3 = vld [vmem:[%s5270_s1 + $0x6a0] sm:$0xf]  ;;  %v3003_v10 = vor.u32 %v3438_v63, %v3002_v62  ;;  %v3058_v15 = vld [vmem:[%s5270_s1 + $0x690] sm:$0xf]  ;;  %v3301_v62 = vld [vmem:[%s5270_s1 + $0x1e4] sm:$0xf] }
  0x66   :  { %1781 = vmatpush.bf16.msrb.mxu2 %v3171_v4  ;;  %1750 = vmatmul.bf16.vlgmr.msra.gmra.mxu3 %v298_v17  ;;  %v3203_v4 = vor.u32 %v3488_v57, %v3202_v56  ;;  %v3067_v11 = vor.u32 %v3454_v5, %v3066_v3  ;;  %v3452_v17 = vld [vmem:[%s5270_s1 + $0x694] sm:$0xf0]  ;;  %v2332_v57 = vld [vmem:[%s5270_s1 + $0xe8] sm:$0xf0]  ;;  %v302_v5 = vld [vmem:[#allocation1 + $0x3f] sm:$0xff] }
  0x67   :  { %1794 = vmatpush.bf16.msrb.mxu3 %v3235_v8  ;;  %v3194_v8 = vld [vmem:[%s5270_s1 + $0x7a0] sm:$0xf]  ;;  %v3059_v29 = vor.u32 %v3452_v17, %v3058_v15  ;;  %v2460_v63 = vld [vmem:[%s5270_s1 + $0x1e8] sm:$0xf0]  ;;  %v301_v3 = vld [vmem:[#allocation1 + $0x36] sm:$0xff]  ;;  %v2335_v7 = vor.u32 %v3269_v55, %v2332_v57 }
  0x68   :  { %1756 = vmatpush.bf16.msrb.mxu0 %v3035_v18  ;;  %v3195_v16 = vor.u32 %v3486_v9, %v3194_v8  ;;  %v3122_v18 = vld [vmem:[%s5270_s1 + $0x710] sm:$0xf]  ;;  %v3251_v9 = vld [vmem:[%s5270_s1 + $0x54] sm:$0xf]  ;;  %v2388_v15 = vld [vmem:[%s5270_s1 + $0x158] sm:$0xf0] }
  0x69   :  { %1769 = vmatpush.bf16.msrb.mxu1 %v3099_v19  ;;  %v3468_v19 = vld [vmem:[%s5270_s1 + $0x714] sm:$0xf0]  ;;  %v2452_v17 = vld [vmem:[%s5270_s1 + $0x1d8] sm:$0xf0]  ;;  %v2364_v55 = vld [vmem:[%s5270_s1 + $0x128] sm:$0xf0] }
  0x6a   :  { %1782 = vmatpush.bf16.msrb.mxu2 %v3163_v23  ;;  %v3186_v23 = vld [vmem:[%s5270_s1 + $0x790] sm:$0xf]  ;;  %v3123_v30 = vor.u32 %v3468_v19, %v3122_v18  ;;  %v2428_v57 = vld [vmem:[%s5270_s1 + $0x1a8] sm:$0xf0] }
  0x6b   :  { %1795 = vmatpush.bf16.msrb.mxu3 %v3227_v28  ;;  %v3434_v28 = vld [vmem:[%s5270_s1 + $0x604] sm:$0xf0] }
  0x6c   :  { %1757 = vmatpush.bf16.msrb.mxu0 %v3027_v34  ;;  %v3187_v34 = vor.u32 %v3484_v24, %v3186_v23  ;;  %v2987_v41 = vor.u32 %v3434_v28, %v2986_v27  ;;  %v2391_v23 = vor.u32 %v3283_v14, %v2388_v15  ;;  %v3249_v24 = vld [vmem:[%s5270_s1 + $0x44] sm:$0xf] }
  0x6d   :  { %1770 = vmatpush.bf16.msrb.mxu1 %v3091_v35  ;;  %v3466_v35 = vld [vmem:[%s5270_s1 + $0x704] sm:$0xf0]  ;;  %v3265_v27 = vld [vmem:[%s5270_s1 + $0xc4] sm:$0xf] }
  0x6e   :  { %1783 = vmatpush.bf16.msrb.mxu2 %v3155_v36  ;;  %v3178_v36 = vld [vmem:[%s5270_s1 + $0x780] sm:$0xf]  ;;  %v3257_v15 = vld [vmem:[%s5270_s1 + $0x84] sm:$0xf] }
  0x6f   :  { %1796 = vmatpush.bf16.msrb.mxu3 %v3219_v40  ;;  %v3271_v40 = vld [vmem:[%s5270_s1 + $0xf4] sm:$0xf]  ;;  %v3179_v49 = vor.u32 %v3482_v37, %v3178_v36 }
  0x70   :  { %1758 = vmatpush.bf16.msrb.mxu0 %v3019_v46  ;;  %v3115_v46 = vor.u32 %v3466_v35, %v3114_v33  ;;  %v2343_v51 = vor.u32 %v3271_v40, %v2340_v42  ;;  %v2444_v33 = vld [vmem:[%s5270_s1 + $0x1c8] sm:$0xf0]  ;;  %v3247_v37 = vld [vmem:[%s5270_s1 + $0x34] sm:$0xf] }
  0x71   :  { %1771 = vmatpush.bf16.msrb.mxu1 %v3083_v47  ;;  %v3303_v47 = vld [vmem:[%s5270_s1 + $0x1f4] sm:$0xf]  ;;  %v2447_v40 = vor.u32 %v3297_v32, %v2444_v33  ;;  %v2660_v32 = vld [vmem:[%s5270_s1 + $0x378] sm:$0xf0] }
  0x72   :  { %1784 = vmatpush.bf16.msrb.mxu2 %v3147_v48  ;;  %v2468_v48 = vld [vmem:[%s5270_s1 + $0x1f8] sm:$0xf0]  ;;  %v3279_v42 = vld [vmem:[%s5270_s1 + $0x134] sm:$0xf] }
  0x73   :  { %1797 = vmatpush.bf16.msrb.mxu3 %v3211_v52  ;;  %v2407_v52 = vor.u32 %v3287_v43, %v2404_v44  ;;  %v2471_v56 = vor.u32 %v3303_v47, %v2468_v48  ;;  %v2372_v43 = vld [vmem:[%s5270_s1 + $0x138] sm:$0xf0]  ;;  %v3295_v44 = vld [vmem:[%s5270_s1 + $0x1b4] sm:$0xf] }
  0x74   :  { %1759 = vmatpush.bf16.msrb.mxu0 %v3011_v58  ;;  %v3285_v58 = vld [vmem:[%s5270_s1 + $0x164] sm:$0xf]  ;;  %v2375_v48 = vor.u32 %v3279_v42, %v2372_v43  ;;  %v2524_v42 = vld [vmem:[%s5270_s1 + $0x268] sm:$0xf0] }
  0x75   :  { %1772 = vmatpush.bf16.msrb.mxu1 %v3075_v59  ;;  %v2396_v59 = vld [vmem:[%s5270_s1 + $0x168] sm:$0xf0]  ;;  %v3333_v43 = vld [vmem:[%s5270_s1 + $0x2e4] sm:$0xf] }
  0x76   :  { %1785 = vmatpush.bf16.msrb.mxu2 %v3139_v60  ;;  %v299_v60 = vld [vmem:[#allocation1 + $0x24] sm:$0xff]  ;;  %v2399_v8 = vor.u32 %v3285_v58, %v2396_v59 }
  0x77   :  { %1798 = vmatpush.bf16.msrb.mxu3 %v3203_v4  ;;  %v300_v4 = vld [vmem:[#allocation1 + $0x2d] sm:$0xff] }
  0x78   :  { %1760 = vmatpush.bf16.msrb.mxu0 %v3003_v10  ;;  %v2260_v10 = vld [vmem:[%s5270_s1 + $0x58] sm:$0xf0] }
  0x79   :  { %1773 = vmatpush.bf16.msrb.mxu1 %v3067_v11  ;;  %v3267_v11 = vld [vmem:[%s5270_s1 + $0xd4] sm:$0xf]  ;;  %v2263_v18 = vor.u32 %v3251_v9, %v2260_v10  ;;  %v2420_v9 = vld [vmem:[%s5270_s1 + $0x198] sm:$0xf0] }
  0x7a   :  { %1786 = vmatpush.bf16.msrb.mxu2 %v3131_v12  ;;  %v2463_v12 = vor.u32 %v3301_v62, %v2460_v63  ;;  %v2327_v19 = vor.u32 %v3267_v11, %v2324_v13  ;;  %v3243_v62 = vld [vmem:[%s5270_s1 + $0x14] sm:$0xf]  ;;  %v2228_v63 = vld [vmem:[%s5270_s1 + $0x18] sm:$0xf0]  ;;  %v3241_v11 = vld [vmem:[%s5270_s1 + $0x4] sm:$0xf] }
  0x7b   :  { %1799 = vmatpush.bf16.msrb.mxu3 %v3195_v16  ;;  %v3299_v16 = vld [vmem:[%s5270_s1 + $0x1d4] sm:$0xf]  ;;  %v2231_v10 = vor.u32 %v3243_v62, %v2228_v63  ;;  %v2708_v62 = vld [vmem:[%s5270_s1 + $0x3d8] sm:$0xf0] }
  0x7c   :  { %1761 = vmatpush.bf16.msrb.mxu0 %v2995_v25  ;;  %v2252_v25 = vld [vmem:[%s5270_s1 + $0x48] sm:$0xf0]  ;;  %v2455_v28 = vor.u32 %v3299_v16, %v2452_v17  ;;  %v3273_v17 = vld [vmem:[%s5270_s1 + $0x104] sm:$0xf] }
  0x7d   :  { %1774 = vmatpush.bf16.msrb.mxu1 %v3059_v29  ;;  %v2316_v29 = vld [vmem:[%s5270_s1 + $0xc8] sm:$0xf0] }
  0x7e   :  { %1787 = vmatpush.bf16.msrb.mxu2 %v3123_v30  ;;  %v3281_v30 = vld [vmem:[%s5270_s1 + $0x144] sm:$0xf]  ;;  %v2319_v35 = vor.u32 %v3265_v27, %v2316_v29  ;;  %v2284_v16 = vld [vmem:[%s5270_s1 + $0x88] sm:$0xf0]  ;;  %v2532_v27 = vld [vmem:[%s5270_s1 + $0x278] sm:$0xf0] }
  0x7f   :  { %1800 = vmatpush.bf16.msrb.mxu3 %v3187_v34  ;;  %v2255_v34 = vor.u32 %v3249_v24, %v2252_v25  ;;  %v2383_v36 = vor.u32 %v3281_v30, %v2380_v31  ;;  %v2412_v24 = vld [vmem:[%s5270_s1 + $0x188] sm:$0xf0]  ;;  %v3319_v25 = vld [vmem:[%s5270_s1 + $0x274] sm:$0xf]  ;;  %v2596_v30 = vld [vmem:[%s5270_s1 + $0x2f8] sm:$0xf0]  ;;  %v2287_v33 = vor.u32 %v3257_v15, %v2284_v16 }
  0x80   :  { %1762 = vmatpush.bf16.msrb.mxu0 %v2987_v41  ;;  %v2308_v41 = vld [vmem:[%s5270_s1 + $0xb8] sm:$0xf0]  ;;  %v3351_v31 = vld [vmem:[%s5270_s1 + $0x374] sm:$0xf] }
  0x81   :  { %1775 = vmatpush.bf16.msrb.mxu1 %v3051_v45  ;;  %v2436_v45 = vld [vmem:[%s5270_s1 + $0x1b8] sm:$0xf0]  ;;  %v2311_v47 = vor.u32 %v3263_v39, %v2308_v41  ;;  %v3317_v41 = vld [vmem:[%s5270_s1 + $0x264] sm:$0xf]  ;;  %v3327_v15 = vld [vmem:[%s5270_s1 + $0x2b4] sm:$0xf] }
  0x82   :  { %1788 = vmatpush.bf16.msrb.mxu2 %v3115_v46  ;;  %v2247_v46 = vor.u32 %v3247_v37, %v2244_v38  ;;  %v2535_v38 = vor.u32 %v3319_v25, %v2532_v27 }
  0x83   :  { %1801 = vmatpush.bf16.msrb.mxu3 %v3179_v49  ;;  %1763 = vmatmul.bf16.vlgmr.msrb.gmra.mxu0 %v299_v60  ;;  %v3245_v49 = vld [vmem:[%s5270_s1 + $0x24] sm:$0xf]  ;;  %v2367_v60 = vor.u32 %v3277_v54, %v2364_v55  ;;  %v2516_v54 = vld [vmem:[%s5270_s1 + $0x258] sm:$0xf0]  ;;  %v3331_v55 = vld [vmem:[%s5270_s1 + $0x2d4] sm:$0xf] }
  0x84   :  { %1807 = vmatpush.bf16.msra.mxu0 %v2279_v50  ;;  %1776 = vmatmul.bf16.vlgmr.msrb.gmra.mxu1 %v300_v4  ;;  %v2236_v50 = vld [vmem:[%s5270_s1 + $0x28] sm:$0xf0] }
  0x85   :  { %1820 = vmatpush.bf16.msra.mxu1 %v2343_v51  ;;  %1789 = vmatmul.bf16.vlgmr.msrb.gmra.mxu2 %v301_v3  ;;  %v3261_v51 = vld [vmem:[%s5270_s1 + $0xa4] sm:$0xf]  ;;  %v2239_v58 = vor.u32 %v3245_v49, %v2236_v50  ;;  %v3259_v3 = vld [vmem:[%s5270_s1 + $0x94] sm:$0xf]  ;;  %v2716_v49 = vld [vmem:[%s5270_s1 + $0x3e8] sm:$0xf0]  ;;  %v2527_v50 = vor.u32 %v3317_v41, %v2524_v42 }
  0x86   :  { %1833 = vmatpush.bf16.msra.mxu2 %v2407_v52  ;;  %1802 = vmatmul.bf16.vlgmr.msrb.gmra.mxu3 %v302_v5  ;;  %v2439_v52 = vor.u32 %v3295_v44, %v2436_v45  ;;  %v2303_v59 = vor.u32 %v3261_v51, %v2300_v53  ;;  %v2292_v5 = vld [vmem:[%s5270_s1 + $0x98] sm:$0xf0]  ;;  %v2588_v45 = vld [vmem:[%s5270_s1 + $0x2e8] sm:$0xf0]  ;;  %v3315_v53 = vld [vmem:[%s5270_s1 + $0x254] sm:$0xf] }
  0x87   :  { %1846 = vmatpush.bf16.msra.mxu3 %v2471_v56  ;;  %v3293_v56 = vld [vmem:[%s5270_s1 + $0x1a4] sm:$0xf]  ;;  %v2295_v13 = vor.u32 %v3259_v3, %v2292_v5  ;;  %v2591_v51 = vor.u32 %v3333_v43, %v2588_v45  ;;  %v2519_v63 = vor.u32 %v3315_v53, %v2516_v54  ;;  %v2508_v5 = vld [vmem:[%s5270_s1 + $0x248] sm:$0xf0]  ;;  %v3307_v42 = vld [vmem:[%s5270_s1 + $0x214] sm:$0xf] }
  0x88   :  { %1808 = vmatpush.bf16.msra.mxu0 %v2271_v6  ;;  %v2431_v4 = vor.u32 %v3293_v56, %v2428_v57  ;;  %v3275_v6 = vld [vmem:[%s5270_s1 + $0x114] sm:$0xf]  ;;  %v2580_v57 = vld [vmem:[%s5270_s1 + $0x2d8] sm:$0xf0]  ;;  %v3305_v54 = vld [vmem:[%s5270_s1 + $0x204] sm:$0xf] }
  0x89   :  { %1821 = vmatpush.bf16.msra.mxu1 %v2335_v7  ;;  %v2356_v7 = vld [vmem:[%s5270_s1 + $0x118] sm:$0xf0]  ;;  %v2583_v3 = vor.u32 %v3331_v55, %v2580_v57  ;;  %v2476_v55 = vld [vmem:[%s5270_s1 + $0x208] sm:$0xf0] }
  0x8a   :  { %1834 = vmatpush.bf16.msra.mxu2 %v2399_v8  ;;  %v3291_v8 = vld [vmem:[%s5270_s1 + $0x194] sm:$0xf]  ;;  %v2359_v14 = vor.u32 %v3275_v6, %v2356_v7  ;;  %v3345_v6 = vld [vmem:[%s5270_s1 + $0x344] sm:$0xf]  ;;  %v2636_v7 = vld [vmem:[%s5270_s1 + $0x348] sm:$0xf0] }
  0x8b   :  { %1847 = vmatpush.bf16.msra.mxu3 %v2463_v12  ;;  %v2220_v12 = vld [vmem:[%s5270_s1 + $0x8] sm:$0xf0]  ;;  %v2484_v43 = vld [vmem:[%s5270_s1 + $0x218] sm:$0xf0] }
  0x8c   :  { %1809 = vmatpush.bf16.msra.mxu0 %v2263_v18  ;;  %v2423_v18 = vor.u32 %v3291_v8, %v2420_v9  ;;  %v2223_v29 = vor.u32 %v3241_v11, %v2220_v12  ;;  %v3361_v8 = vld [vmem:[%s5270_s1 + $0x3c4] sm:$0xf]  ;;  %v2700_v9 = vld [vmem:[%s5270_s1 + $0x3c8] sm:$0xf0]  ;;  %v2639_v12 = vor.u32 %v3345_v6, %v2636_v7  ;;  %v2487_v53 = vor.u32 %v3307_v42, %v2484_v43  ;;  %v3399_v6 = vld [vmem:[%s5270_s1 + $0x4f4] sm:$0xf] }
  0x8d   :  { %1822 = vmatpush.bf16.msra.mxu1 %v2327_v19  ;;  %v2348_v19 = vld [vmem:[%s5270_s1 + $0x108] sm:$0xf0]  ;;  %v2703_v16 = vor.u32 %v3361_v8, %v2700_v9  ;;  %v2479_v7 = vor.u32 %v3305_v54, %v2476_v55  ;;  %v2852_v8 = vld [vmem:[%s5270_s1 + $0x4f8] sm:$0xf0]  ;;  %v3415_v9 = vld [vmem:[%s5270_s1 + $0x574] sm:$0xf] }
  0x8e   :  { %1835 = vmatpush.bf16.msra.mxu2 %v2391_v23  ;;  %v3289_v23 = vld [vmem:[%s5270_s1 + $0x184] sm:$0xf]  ;;  %v3395_v42 = vld [vmem:[%s5270_s1 + $0x4d4] sm:$0xf]  ;;  %v2892_v54 = vld [vmem:[%s5270_s1 + $0x548] sm:$0xf0] }
  0x8f   :  { %1848 = vmatpush.bf16.msra.mxu3 %v2455_v28  ;;  %v3335_v28 = vld [vmem:[%s5270_s1 + $0x2f4] sm:$0xf]  ;;  %v2415_v37 = vor.u32 %v3289_v23, %v2412_v24  ;;  %v2692_v24 = vld [vmem:[%s5270_s1 + $0x3b8] sm:$0xf0]  ;;  %v3425_v55 = vld [vmem:[%s5270_s1 + $0x5c4] sm:$0xf] }
  0x90   :  { %1810 = vmatpush.bf16.msra.mxu0 %v2255_v34  ;;  %v2351_v34 = vor.u32 %v3273_v17, %v2348_v19  ;;  %v2599_v39 = vor.u32 %v3335_v28, %v2596_v30  ;;  %v2564_v17 = vld [vmem:[%s5270_s1 + $0x2b8] sm:$0xf0]  ;;  %v3359_v23 = vld [vmem:[%s5270_s1 + $0x3b4] sm:$0xf]  ;;  %v2492_v30 = vld [vmem:[%s5270_s1 + $0x228] sm:$0xf0] }
  0x91   :  { %1823 = vmatpush.bf16.msra.mxu1 %v2319_v35  ;;  %v3367_v35 = vld [vmem:[%s5270_s1 + $0x3f4] sm:$0xf]  ;;  %v2628_v19 = vld [vmem:[%s5270_s1 + $0x338] sm:$0xf0]  ;;  %v2567_v27 = vor.u32 %v3327_v15, %v2564_v17 }
  0x92   :  { %1836 = vmatpush.bf16.msra.mxu2 %v2383_v36  ;;  %v2724_v36 = vld [vmem:[%s5270_s1 + $0x3f8] sm:$0xf0]  ;;  %v3431_v15 = vld [vmem:[%s5270_s1 + $0x5f4] sm:$0xf] }
  0x93   :  { %1849 = vmatpush.bf16.msra.mxu3 %v2447_v40  ;;  %v2663_v40 = vor.u32 %v3351_v31, %v2660_v32  ;;  %v2727_v44 = vor.u32 %v3367_v35, %v2724_v36  ;;  %v3325_v31 = vld [vmem:[%s5270_s1 + $0x2a4] sm:$0xf]  ;;  %v2695_v32 = vor.u32 %v3359_v23, %v2692_v24  ;;  %v2620_v35 = vld [vmem:[%s5270_s1 + $0x328] sm:$0xf0]  ;;  %v2855_v23 = vor.u32 %v3399_v6, %v2852_v8  ;;  %v3423_v6 = vld [vmem:[%s5270_s1 + $0x5b4] sm:$0xf] }
  0x94   :  { %1811 = vmatpush.bf16.msra.mxu0 %v2247_v46  ;;  %v3349_v46 = vld [vmem:[%s5270_s1 + $0x364] sm:$0xf] }
  0x95   :  { %1824 = vmatpush.bf16.msra.mxu1 %v2311_v47  ;;  %v2652_v47 = vld [vmem:[%s5270_s1 + $0x368] sm:$0xf0]  ;;  %v3357_v36 = vld [vmem:[%s5270_s1 + $0x3a4] sm:$0xf] }
  0x96   :  { %1837 = vmatpush.bf16.msra.mxu2 %v2375_v48  ;;  %v3365_v48 = vld [vmem:[%s5270_s1 + $0x3e4] sm:$0xf] }
  0x97   :  { %1850 = vmatpush.bf16.msra.mxu3 %v2439_v52  ;;  %v2655_v52 = vor.u32 %v3349_v46, %v2652_v47  ;;  %v2719_v56 = vor.u32 %v3365_v48, %v2716_v49  ;;  %v2548_v47 = vld [vmem:[%s5270_s1 + $0x298] sm:$0xf0]  ;;  %v3339_v48 = vld [vmem:[%s5270_s1 + $0x314] sm:$0xf] }
  0x98   :  { %1812 = vmatpush.bf16.msra.mxu0 %v2239_v58  ;;  %v3347_v58 = vld [vmem:[%s5270_s1 + $0x354] sm:$0xf]  ;;  %v2612_v49 = vld [vmem:[%s5270_s1 + $0x318] sm:$0xf0] }
  0x99   :  { %1825 = vmatpush.bf16.msra.mxu1 %v2303_v59  ;;  %v2644_v59 = vld [vmem:[%s5270_s1 + $0x358] sm:$0xf0]  ;;  %v2615_v57 = vor.u32 %v3339_v48, %v2612_v49 }
  0x9a   :  { %1838 = vmatpush.bf16.msra.mxu2 %v2367_v60  ;;  %v3363_v60 = vld [vmem:[%s5270_s1 + $0x3d4] sm:$0xf] }
  0x9b   :  { %1851 = vmatpush.bf16.msra.mxu3 %v2431_v4  ;;  %v3313_v4 = vld [vmem:[%s5270_s1 + $0x244] sm:$0xf] }
  0x9c   :  { %1813 = vmatpush.bf16.msra.mxu0 %v2231_v10  ;;  %v2511_v10 = vor.u32 %v3313_v4, %v2508_v5  ;;  %v2668_v4 = vld [vmem:[%s5270_s1 + $0x388] sm:$0xf0] }
  0x9d   :  { %1826 = vmatpush.bf16.msra.mxu1 %v2295_v13  ;;  %v3311_v13 = vld [vmem:[%s5270_s1 + $0x234] sm:$0xf] }
  0x9e   :  { %1839 = vmatpush.bf16.msra.mxu2 %v2359_v14  ;;  %v2500_v14 = vld [vmem:[%s5270_s1 + $0x238] sm:$0xf0] }
  0x9f   :  { %1852 = vmatpush.bf16.msra.mxu3 %v2423_v18  ;;  %v3343_v18 = vld [vmem:[%s5270_s1 + $0x334] sm:$0xf]  ;;  %v2503_v25 = vor.u32 %v3311_v13, %v2500_v14 }
  0xa0   :  { %1814 = vmatpush.bf16.msra.mxu0 %v2223_v29  ;;  %v2631_v28 = vor.u32 %v3343_v18, %v2628_v19  ;;  %v3309_v29 = vld [vmem:[%s5270_s1 + $0x224] sm:$0xf] }
  0xa1   :  { %1827 = vmatpush.bf16.msra.mxu1 %v2287_v33  ;;  %v2556_v33 = vld [vmem:[%s5270_s1 + $0x2a8] sm:$0xf0] }
  0xa2   :  { %1840 = vmatpush.bf16.msra.mxu2 %v2351_v34  ;;  %v3341_v34 = vld [vmem:[%s5270_s1 + $0x324] sm:$0xf] }
  0xa3   :  { %1853 = vmatpush.bf16.msra.mxu3 %v2415_v37  ;;  %1815 = vmatmul.bf16.vlgmr.msra.gmra.mxu0 %v3854_v21  ;;  %v3329_v21 = vld [vmem:[%s5270_s1 + $0x2c4] sm:$0xf]  ;;  %v2684_v37 = vld [vmem:[%s5270_s1 + $0x3a8] sm:$0xf0]  ;;  %v2623_v41 = vor.u32 %v3341_v34, %v2620_v35 }
  0xa4   :  { %1859 = vmatpush.bf16.msrb.mxu0 %v2535_v38  ;;  %1828 = vmatmul.bf16.vlgmr.msra.gmra.mxu1 %v3865_v26  ;;  %v2572_v26 = vld [vmem:[%s5270_s1 + $0x2c8] sm:$0xf0]  ;;  %v2495_v38 = vor.u32 %v3309_v29, %v2492_v30  ;;  %v2687_v46 = vor.u32 %v3357_v36, %v2684_v37 }
  0xa5   :  { %1872 = vmatpush.bf16.msrb.mxu1 %v2599_v39  ;;  %1841 = vmatmul.bf16.vlgmr.msra.gmra.mxu2 %v3852_v20  ;;  %v2647_v20 = vor.u32 %v3347_v58, %v2644_v59  ;;  %v2575_v11 = vor.u32 %v3329_v21, %v2572_v26  ;;  %v1608_v39 = vpop.f32.mrf.mxu0  ;;  %v3321_v58 = vld [vmem:[%s5270_s1 + $0x284] sm:$0xf]  ;;  %v2540_v59 = vld [vmem:[%s5270_s1 + $0x288] sm:$0xf0]  ;;  %v2788_v26 = vld [vmem:[%s5270_s1 + $0x478] sm:$0xf0] }
  0xa6   :  { %1885 = vmatpush.bf16.msrb.mxu2 %v2663_v40  ;;  %1854 = vmatmul.bf16.vlgmr.msra.gmra.mxu3 %v3856_v22  ;;  %v2711_v22 = vor.u32 %v3363_v60, %v2708_v62  ;;  %v2559_v40 = vor.u32 %v3325_v31, %v2556_v33  ;;  %v3337_v60 = vld [vmem:[%s5270_s1 + $0x304] sm:$0xf]  ;;  %v2543_v13 = vor.u32 %v3321_v58, %v2540_v59  ;;  %v2844_v30 = vld [vmem:[%s5270_s1 + $0x4e8] sm:$0xf0] }
  0xa7   :  { %1898 = vmatpush.bf16.msrb.mxu3 %v2727_v44  ;;  %v3323_v44 = vld [vmem:[%s5270_s1 + $0x294] sm:$0xf]  ;;  %v1621_v45 = vpop.f32.mrf.mxu1  ;;  %v3413_v31 = vld [vmem:[%s5270_s1 + $0x564] sm:$0xf]  ;;  %v2972_v34 = vld [vmem:[%s5270_s1 + $0x5e8] sm:$0xf0] }
  0xa8   :  { %1860 = vmatpush.bf16.msrb.mxu0 %v2527_v50  ;;  %v1622_v50 = vadd.f32 %v1621_v45, %v1608_v39  ;;  %v3429_v33 = vld [vmem:[%s5270_s1 + $0x5e4] sm:$0xf]  ;;  %v3411_v45 = vld [vmem:[%s5270_s1 + $0x554] sm:$0xf] }
  0xa9   :  { %1873 = vmatpush.bf16.msrb.mxu1 %v2591_v51  ;;  %v3355_v51 = vld [vmem:[%s5270_s1 + $0x394] sm:$0xf]  ;;  %v2975_v43 = vor.u32 %v3429_v33, %v2972_v34  ;;  %v2740_v34 = vld [vmem:[%s5270_s1 + $0x418] sm:$0xf0] }
  0xaa   :  { %1886 = vmatpush.bf16.msrb.mxu2 %v2655_v52  ;;  %v2676_v52 = vld [vmem:[%s5270_s1 + $0x398] sm:$0xf0]  ;;  %v1634_v62 = vpop.f32.mrf.mxu2  ;;  %v3371_v33 = vld [vmem:[%s5270_s1 + $0x414] sm:$0xf] }
  0xab   :  { %1899 = vmatpush.bf16.msrb.mxu3 %v2719_v56  ;;  %v2551_v56 = vor.u32 %v3323_v44, %v2548_v47  ;;  %v1635_v5 = vadd.f32 %v1634_v62, %v1622_v50  ;;  %v1647_v21 = vpop.f32.mrf.mxu3  ;;  %v2836_v44 = vld [vmem:[%s5270_s1 + $0x4d8] sm:$0xf0]  ;;  %v3375_v62 = vld [vmem:[%s5270_s1 + $0x434] sm:$0xf] }
  0xac   :  { %1861 = vmatpush.bf16.msrb.mxu0 %v2519_v63  ;;  %v2679_v63 = vor.u32 %v3355_v51, %v2676_v52  ;;  %v2964_v47 = vld [vmem:[%s5270_s1 + $0x5d8] sm:$0xf0]  ;;  %v2839_v49 = vor.u32 %v3395_v42, %v2836_v44  ;;  %v3393_v51 = vld [vmem:[%s5270_s1 + $0x4c4] sm:$0xf] }
  0xad   :  { %1874 = vmatpush.bf16.msrb.mxu1 %v2583_v3  ;;  %v2604_v3 = vld [vmem:[%s5270_s1 + $0x308] sm:$0xf0]  ;;  %v2932_v42 = vld [vmem:[%s5270_s1 + $0x598] sm:$0xf0]  ;;  %v3369_v44 = vld [vmem:[%s5270_s1 + $0x404] sm:$0xf] }
  0xae   :  { %1887 = vmatpush.bf16.msrb.mxu2 %v2647_v20  ;;  %v3353_v20 = vld [vmem:[%s5270_s1 + $0x384] sm:$0xf]  ;;  %v2607_v14 = vor.u32 %v3337_v60, %v2604_v3  ;;  %v3391_v3 = vld [vmem:[%s5270_s1 + $0x4b4] sm:$0xf] }
  0xaf   :  { %1900 = vmatpush.bf16.msrb.mxu3 %v2711_v22  ;;  %v3383_v22 = vld [vmem:[%s5270_s1 + $0x474] sm:$0xf]  ;;  %v1623_v17 = vpop.f32.mrf.mxu1  ;;  %v2671_v18 = vor.u32 %v3353_v20, %v2668_v4 }
  0xb0   :  { %1862 = vmatpush.bf16.msrb.mxu0 %v2511_v10  ;;  %v2916_v10 = vld [vmem:[%s5270_s1 + $0x578] sm:$0xf0]  ;;  %v2791_v19 = vor.u32 %v3383_v22, %v2788_v26  ;;  %v3407_v22 = vld [vmem:[%s5270_s1 + $0x534] sm:$0xf]  ;;  %v2812_v17 = vld [vmem:[%s5270_s1 + $0x4a8] sm:$0xf0] }
  0xb1   :  { %1875 = vmatpush.bf16.msrb.mxu1 %v2575_v11  ;;  %v4753_v11 = vadd.f32 %v1647_v21, %v1635_v5  ;;  %v2919_v24 = vor.u32 %v3415_v9, %v2916_v10  ;;  %v2820_v21 = vld [vmem:[%s5270_s1 + $0x4b8] sm:$0xf0] }
  0xb2   :  { %1888 = vmatpush.bf16.msrb.mxu2 %v2639_v12  ;;  %v1610_v12 = vpop.f32.mrf.mxu0  ;;  %v1636_v35 = vpop.f32.mrf.mxu2  ;;  %v2884_v26 = vld [vmem:[%s5270_s1 + $0x538] sm:$0xf0]  ;;  %v2823_v10 = vor.u32 %v3391_v3, %v2820_v21 }
  0xb3   :  { %1901 = vmatpush.bf16.msrb.mxu3 %v2703_v16  ;;  %v2980_v16 = vld [vmem:[%s5270_s1 + $0x5f8] sm:$0xf0]  ;;  %v1649_v37 = vpop.f32.mrf.mxu3  ;;  %v3373_v12 = vld [vmem:[%s5270_s1 + $0x424] sm:$0xf]  ;;  %v3387_v35 = vld [vmem:[%s5270_s1 + $0x494] sm:$0xf] }
  0xb4   :  { %1863 = vmatpush.bf16.msrb.mxu0 %v2503_v25  ;;  %v3381_v25 = vld [vmem:[%s5270_s1 + $0x464] sm:$0xf]  ;;  %v2983_v29 = vor.u32 %v3431_v15, %v2980_v16  ;;  %v3236_v3 = vld [vmem:[%s5270_s1 + $0x7f8] sm:$0xf0] }
  0xb5   :  { %1876 = vmatpush.bf16.msrb.mxu1 %v2567_v27  ;;  %v2780_v27 = vld [vmem:[%s5270_s1 + $0x468] sm:$0xf0] }
  0xb6   :  { %1889 = vmatpush.bf16.msrb.mxu2 %v2631_v28  ;;  %v3397_v28 = vld [vmem:[%s5270_s1 + $0x4e4] sm:$0xf]  ;;  %v2783_v36 = vor.u32 %v3381_v25, %v2780_v27  ;;  %v2940_v27 = vld [vmem:[%s5270_s1 + $0x5a8] sm:$0xf0] }
  0xb7   :  { %1902 = vmatpush.bf16.msrb.mxu3 %v2695_v32  ;;  %v2908_v32 = vld [vmem:[%s5270_s1 + $0x568] sm:$0xf0]  ;;  %v3421_v25 = vld [vmem:[%s5270_s1 + $0x5a4] sm:$0xf] }
  0xb8   :  { %1864 = vmatpush.bf16.msrb.mxu0 %v2495_v38  ;;  %v2847_v38 = vor.u32 %v3397_v28, %v2844_v30  ;;  %v2911_v39 = vor.u32 %v3413_v31, %v2908_v32  ;;  %v2943_v37 = vor.u32 %v3421_v25, %v2940_v27  ;;  %v3475_v25 = vld [vmem:[%s5270_s1 + $0x754] sm:$0xf]  ;;  %v3156_v27 = vld [vmem:[%s5270_s1 + $0x758] sm:$0xf0] }
  0xb9   :  { %1877 = vmatpush.bf16.msrb.mxu1 %v2559_v40  ;;  %v3379_v40 = vld [vmem:[%s5270_s1 + $0x454] sm:$0xf] }
  0xba   :  { %1890 = vmatpush.bf16.msrb.mxu2 %v2623_v41  ;;  %v2772_v41 = vld [vmem:[%s5270_s1 + $0x458] sm:$0xf0] }
  0xbb   :  { %1903 = vmatpush.bf16.msrb.mxu3 %v2687_v46  ;;  %v2900_v46 = vld [vmem:[%s5270_s1 + $0x558] sm:$0xf0]  ;;  %v2775_v48 = vor.u32 %v3379_v40, %v2772_v41  ;;  %v3419_v41 = vld [vmem:[%s5270_s1 + $0x594] sm:$0xf] }
  0xbc   :  { %1865 = vmatpush.bf16.msrb.mxu0 %v2487_v53  ;;  %v2903_v50 = vor.u32 %v3411_v45, %v2900_v46  ;;  %v3409_v53 = vld [vmem:[%s5270_s1 + $0x544] sm:$0xf]  ;;  %v2868_v40 = vld [vmem:[%s5270_s1 + $0x518] sm:$0xf0]  ;;  %v2732_v45 = vld [vmem:[%s5270_s1 + $0x408] sm:$0xf0] }
  0xbd   :  { %1878 = vmatpush.bf16.msrb.mxu1 %v2551_v56  ;;  %v2956_v56 = vld [vmem:[%s5270_s1 + $0x5c8] sm:$0xf0]  ;;  %v2895_v60 = vor.u32 %v3409_v53, %v2892_v54  ;;  %v3447_v53 = vld [vmem:[%s5270_s1 + $0x674] sm:$0xf]  ;;  %v3044_v54 = vld [vmem:[%s5270_s1 + $0x678] sm:$0xf0] }
  0xbe   :  { %1891 = vmatpush.bf16.msrb.mxu2 %v2615_v57  ;;  %v2959_v5 = vor.u32 %v3425_v55, %v2956_v56  ;;  %v3463_v55 = vld [vmem:[%s5270_s1 + $0x6f4] sm:$0xf]  ;;  %v2735_v56 = vor.u32 %v3369_v44, %v2732_v45  ;;  %v3489_v45 = vld [vmem:[%s5270_s1 + $0x7c4] sm:$0xf] }
  0xbf   :  { %1904 = vmatpush.bf16.msrb.mxu3 %v2679_v63  ;;  %v2756_v63 = vld [vmem:[%s5270_s1 + $0x438] sm:$0xf0] }
  0xc0   :  { %1866 = vmatpush.bf16.msrb.mxu0 %v2479_v7  ;;  %v1660_v58 = vpop.f32.mrf.mxu0  ;;  %v2948_v7 = vld [vmem:[%s5270_s1 + $0x5b8] sm:$0xf0]  ;;  %v2759_v9 = vor.u32 %v3375_v62, %v2756_v63  ;;  %v3495_v63 = vld [vmem:[%s5270_s1 + $0x7f4] sm:$0xf] }
  0xc1   :  { %1879 = vmatpush.bf16.msrb.mxu1 %v2543_v13  ;;  %v1661_v20 = vadd.f32 %v1660_v58, %v4753_v11  ;;  %v1673_v4 = vpop.f32.mrf.mxu1  ;;  %v2887_v11 = vor.u32 %v3407_v22, %v2884_v26  ;;  %v2748_v13 = vld [vmem:[%s5270_s1 + $0x428] sm:$0xf0]  ;;  %v2951_v16 = vor.u32 %v3423_v6, %v2948_v7  ;;  %v3479_v58 = vld [vmem:[%s5270_s1 + $0x774] sm:$0xf]  ;;  %v3445_v22 = vld [vmem:[%s5270_s1 + $0x664] sm:$0xf]  ;;  %v3239_v7 = vor.u32 %v3495_v63, %v3236_v3 }
  0xc2   :  { %1892 = vmatpush.bf16.msrb.mxu2 %v2607_v14  ;;  %v3389_v14 = vld [vmem:[%s5270_s1 + $0x4a4] sm:$0xf]  ;;  %v2751_v28 = vor.u32 %v3373_v12, %v2748_v13  ;;  %v3036_v26 = vld [vmem:[%s5270_s1 + $0x668] sm:$0xf0] }
  0xc3   :  { %1905 = vmatpush.bf16.msrb.mxu3 %v2671_v18  ;;  %1867 = vmatmul.bf16.vlgmr.msrb.gmra.mxu0 %v3947_v0  ;;  %v3377_v0 = vld [vmem:[%s5270_s1 + $0x444] sm:$0xf]  ;;  %v1674_v8 = vadd.f32 %v1673_v4, %v1661_v20  ;;  %v2815_v31 = vor.u32 %v3389_v14, %v2812_v17  ;;  %v3047_v4 = vor.u32 %v3447_v53, %v3044_v54  ;;  %v3228_v12 = vld [vmem:[%s5270_s1 + $0x7e8] sm:$0xf0]  ;;  %v3028_v17 = vld [vmem:[%s5270_s1 + $0x658] sm:$0xf0] }
  0xc4   :  { %1911 = vmatpush.bf16.msra.mxu0 %v2791_v19  ;;  %1880 = vmatmul.bf16.vlgmr.msrb.gmra.mxu1 %v3951_v2  ;;  %v2828_v2 = vld [vmem:[%s5270_s1 + $0x4c8] sm:$0xf0]  ;;  %v3405_v18 = vld [vmem:[%s5270_s1 + $0x524] sm:$0xf]  ;;  %v3039_v13 = vor.u32 %v3445_v22, %v3036_v26  ;;  %v3471_v53 = vld [vmem:[%s5270_s1 + $0x734] sm:$0xf] }
  0xc5   :  { %1924 = vmatpush.bf16.msra.mxu1 %v2855_v23  ;;  %1893 = vmatmul.bf16.vlgmr.msrb.gmra.mxu2 %v3945_v61  ;;  %v3427_v61 = vld [vmem:[%s5270_s1 + $0x5d4] sm:$0xf]  ;;  %v2831_v59 = vor.u32 %v3393_v51, %v2828_v2  ;;  %v2876_v19 = vld [vmem:[%s5270_s1 + $0x528] sm:$0xf0]  ;;  %v3417_v51 = vld [vmem:[%s5270_s1 + $0x584] sm:$0xf] }
  0xc6   :  { %1937 = vmatpush.bf16.msra.mxu2 %v2919_v24  ;;  %1906 = vmatmul.bf16.vlgmr.msrb.gmra.mxu3 %v3949_v1  ;;  %v2764_v1 = vld [vmem:[%s5270_s1 + $0x448] sm:$0xf0]  ;;  %v2967_v52 = vor.u32 %v3427_v61, %v2964_v47  ;;  %v2879_v32 = vor.u32 %v3405_v18, %v2876_v19  ;;  %v3385_v47 = vld [vmem:[%s5270_s1 + $0x484] sm:$0xf]  ;;  %v3459_v18 = vld [vmem:[%s5270_s1 + $0x6d4] sm:$0xf] }
  0xc7   :  { %1950 = vmatpush.bf16.msra.mxu3 %v2983_v29  ;;  %v2767_v57 = vor.u32 %v3377_v0, %v2764_v1  ;;  %v2935_v0 = vor.u32 %v3419_v41, %v2932_v42  ;;  %v2860_v1 = vld [vmem:[%s5270_s1 + $0x508] sm:$0xf0]  ;;  %v3461_v6 = vld [vmem:[%s5270_s1 + $0x6e4] sm:$0xf]  ;;  %v3140_v54 = vld [vmem:[%s5270_s1 + $0x738] sm:$0xf0] }
  0xc8   :  { %1912 = vmatpush.bf16.msra.mxu0 %v2783_v36  ;;  %v1686_v15 = vpop.f32.mrf.mxu2  ;;  %v1662_v30 = vpop.f32.mrf.mxu0  ;;  %v3506_v19 = vld [vmem:[#allocation1] sm:$0xff]  ;;  %v3084_v41 = vld [vmem:[%s5270_s1 + $0x6c8] sm:$0xf0] }
  0xc9   :  { %1925 = vmatpush.bf16.msra.mxu1 %v2847_v38  ;;  %v1687_v23 = vadd.f32 %v1686_v15, %v1674_v8  ;;  %v1699_v24 = vpop.f32.mrf.mxu3  ;;  %v1675_v36 = vpop.f32.mrf.mxu1  ;;  %v2804_v38 = vld [vmem:[%s5270_s1 + $0x498] sm:$0xf0]  ;;  %v3100_v8 = vld [vmem:[%s5270_s1 + $0x6e8] sm:$0xf0]  ;;  %v3473_v42 = vld [vmem:[%s5270_s1 + $0x744] sm:$0xf] }
  0xca   :  { %1938 = vmatpush.bf16.msra.mxu2 %v2911_v39  ;;  %v3403_v39 = vld [vmem:[%s5270_s1 + $0x514] sm:$0xf]  ;;  %v2807_v46 = vor.u32 %v3387_v35, %v2804_v38  ;;  %v3103_v14 = vor.u32 %v3461_v6, %v3100_v8  ;;  %v3508_v30 = vld [vmem:[#allocation1 + $0x9] sm:$0xff]  ;;  %v3159_v36 = vor.u32 %v3475_v25, %v3156_v27  ;;  %v3453_v63 = vld [vmem:[%s5270_s1 + $0x6a4] sm:$0xf] }
  0xcb   :  { %1951 = vmatpush.bf16.msra.mxu3 %v2975_v43  ;;  %v4886_v29 = vadd.f32 %v1699_v24, %v1687_v23  ;;  %v2743_v43 = vor.u32 %v3371_v33, %v2740_v34  ;;  %v2871_v61 = vor.u32 %v3403_v39, %v2868_v40  ;;  %v3092_v24 = vld [vmem:[%s5270_s1 + $0x6d8] sm:$0xf0]  ;;  %v3020_v38 = vld [vmem:[%s5270_s1 + $0x648] sm:$0xf0]  ;;  %v3457_v39 = vld [vmem:[%s5270_s1 + $0x6c4] sm:$0xf] }
  0xcc   :  { %1913 = vmatpush.bf16.msra.mxu0 %v2775_v48  ;;  %v2796_v48 = vld [vmem:[%s5270_s1 + $0x488] sm:$0xf0]  ;;  %v3509_v33 = vld [vmem:[#allocation1 + $0x1b] sm:$0xff]  ;;  %v3095_v35 = vor.u32 %v3459_v18, %v3092_v24  ;;  %v3485_v6 = vld [vmem:[%s5270_s1 + $0x7a4] sm:$0xf] }
  0xcd   :  { %1926 = vmatpush.bf16.msra.mxu1 %v2839_v49  ;;  %v3401_v49 = vld [vmem:[%s5270_s1 + $0x504] sm:$0xf]  ;;  %v3060_v18 = vld [vmem:[%s5270_s1 + $0x698] sm:$0xf0]  ;;  %v3483_v24 = vld [vmem:[%s5270_s1 + $0x794] sm:$0xf] }
  0xce   :  { %1939 = vmatpush.bf16.msra.mxu2 %v2903_v50  ;;  %v2863_v62 = vor.u32 %v3401_v49, %v2860_v1  ;;  %v3087_v49 = vor.u32 %v3457_v39, %v3084_v41  ;;  %v3012_v1 = vld [vmem:[%s5270_s1 + $0x638] sm:$0xf0]  ;;  %v3481_v39 = vld [vmem:[%s5270_s1 + $0x784] sm:$0xf] }
  0xcf   :  { %1952 = vmatpush.bf16.msra.mxu3 %v2967_v52  ;;  %v2924_v52 = vld [vmem:[%s5270_s1 + $0x588] sm:$0xf0]  ;;  %v3188_v25 = vld [vmem:[%s5270_s1 + $0x798] sm:$0xf0] }
  0xd0   :  { %1914 = vmatpush.bf16.msra.mxu0 %v2767_v57  ;;  %v1688_v50 = vpop.f32.mrf.mxu2  ;;  %v3108_v57 = vld [vmem:[%s5270_s1 + $0x6f8] sm:$0xf0]  ;;  %v2927_v20 = vor.u32 %v3417_v51, %v2924_v52  ;;  %v3455_v51 = vld [vmem:[%s5270_s1 + $0x6b4] sm:$0xf] }
  0xd1   :  { %1927 = vmatpush.bf16.msra.mxu1 %v2831_v59  ;;  %v1701_v2 = vpop.f32.mrf.mxu3  ;;  %v3172_v59 = vld [vmem:[%s5270_s1 + $0x778] sm:$0xf0] }
  0xd2   :  { %1940 = vmatpush.bf16.msra.mxu2 %v2895_v60  ;;  %v2799_v60 = vor.u32 %v3385_v47, %v2796_v48  ;;  %v3175_v21 = vor.u32 %v3479_v58, %v3172_v59  ;;  %v3076_v2 = vld [vmem:[%s5270_s1 + $0x6b8] sm:$0xf0]  ;;  %v3143_v59 = vor.u32 %v3471_v53, %v3140_v54 }
  0xd3   :  { %1953 = vmatpush.bf16.msra.mxu3 %v2959_v5  ;;  %v3111_v5 = vor.u32 %v3463_v55, %v3108_v57  ;;  %v3487_v55 = vld [vmem:[%s5270_s1 + $0x7b4] sm:$0xf]  ;;  %v3079_v58 = vor.u32 %v3455_v51, %v3076_v2 }
  0xd4   :  { %1915 = vmatpush.bf16.msra.mxu0 %v2759_v9  ;;  %v3477_v9 = vld [vmem:[%s5270_s1 + $0x764] sm:$0xf] }
  0xd5   :  { %1928 = vmatpush.bf16.msra.mxu1 %v2823_v10  ;;  %v3164_v10 = vld [vmem:[%s5270_s1 + $0x768] sm:$0xf0] }
  0xd6   :  { %1941 = vmatpush.bf16.msra.mxu2 %v2887_v11  ;;  %v3493_v11 = vld [vmem:[%s5270_s1 + $0x7e4] sm:$0xf]  ;;  %v3167_v15 = vor.u32 %v3477_v9, %v3164_v10 }
  0xd7   :  { %1954 = vmatpush.bf16.msra.mxu3 %v2951_v16  ;;  %v3443_v16 = vld [vmem:[%s5270_s1 + $0x654] sm:$0xf]  ;;  %v3231_v23 = vor.u32 %v3493_v11, %v3228_v12 }
  0xd8   :  { %1916 = vmatpush.bf16.msra.mxu0 %v2751_v28  ;;  %v3507_v28 = vld [vmem:[#allocation1 + $0x12] sm:$0xff]  ;;  %v3031_v34 = vor.u32 %v3443_v16, %v3028_v17 }
  0xd9   :  { %1929 = vmatpush.bf16.msra.mxu1 %v2815_v31  ;;  %v3491_v31 = vld [vmem:[%s5270_s1 + $0x7d4] sm:$0xf] }
  0xda   :  { %1942 = vmatpush.bf16.msra.mxu2 %v2879_v32  ;;  %v3220_v32 = vld [vmem:[%s5270_s1 + $0x7d8] sm:$0xf0]  ;;  %v3451_v16 = vld [vmem:[%s5270_s1 + $0x694] sm:$0xf] }
  0xdb   :  { %1955 = vmatpush.bf16.msra.mxu3 %v2943_v37  ;;  %v3441_v37 = vld [vmem:[%s5270_s1 + $0x644] sm:$0xf]  ;;  %v3223_v40 = vor.u32 %v3491_v31, %v3220_v32  ;;  %v2988_v32 = vld [vmem:[%s5270_s1 + $0x608] sm:$0xf0] }
  0xdc   :  { %1917 = vmatpush.bf16.msra.mxu0 %v2743_v43  ;;  %v3148_v43 = vld [vmem:[%s5270_s1 + $0x748] sm:$0xf0]  ;;  %v3023_v47 = vor.u32 %v3441_v37, %v3020_v38  ;;  %v3433_v31 = vld [vmem:[%s5270_s1 + $0x604] sm:$0xf] }
  0xdd   :  { %1930 = vmatpush.bf16.msra.mxu1 %v2807_v46  ;;  %v3212_v46 = vld [vmem:[%s5270_s1 + $0x7c8] sm:$0xf0]  ;;  %v3151_v50 = vor.u32 %v3473_v42, %v3148_v43  ;;  %v2991_v42 = vor.u32 %v3433_v31, %v2988_v32 }
  0xde   :  { %1943 = vmatpush.bf16.msra.mxu2 %v2871_v61  ;;  %v3116_v37 = vld [vmem:[%s5270_s1 + $0x708] sm:$0xf0] }
  0xdf   :  { %1956 = vmatpush.bf16.msra.mxu3 %v2935_v0  ;;  %v3439_v0 = vld [vmem:[%s5270_s1 + $0x634] sm:$0xf] }
  0xe0   :  { %1918 = vmatpush.bf16.msra.mxu0 %v2735_v56  ;;  %v1712_v44 = vpop.f32.mrf.mxu0  ;;  %v3204_v56 = vld [vmem:[%s5270_s1 + $0x7b8] sm:$0xf0]  ;;  %v3015_v57 = vor.u32 %v3439_v0, %v3012_v1 }
  0xe1   :  { %1931 = vmatpush.bf16.msra.mxu1 %v2799_v60  ;;  %v1713_v61 = vadd.f32 %v1712_v44, %v4886_v29  ;;  %v1725_v48 = vpop.f32.mrf.mxu1  ;;  %v3215_v29 = vor.u32 %v3489_v45, %v3212_v46  ;;  %v3437_v60 = vld [vmem:[%s5270_s1 + $0x624] sm:$0xf]  ;;  %v3207_v3 = vor.u32 %v3487_v55, %v3204_v56 }
  0xe2   :  { %1944 = vmatpush.bf16.msra.mxu2 %v2863_v62  ;;  %v3004_v62 = vld [vmem:[%s5270_s1 + $0x628] sm:$0xf0]  ;;  %v3510_v46 = vld [vmem:[#allocation1 + $0x24] sm:$0xff] }
  0xe3   :  { %1957 = vmatpush.bf16.msra.mxu3 %v2927_v20  ;;  %1919 = vmatmul.bf16.vlgmr.msra.gmra.mxu0 %v3506_v19  ;;  %v1726_v52 = vadd.f32 %v1725_v48, %v1713_v61  ;;  %v3007_v9 = vor.u32 %v3437_v60, %v3004_v62  ;;  %v3467_v19 = vld [vmem:[%s5270_s1 + $0x714] sm:$0xf]  ;;  %v3513_v48 = vld [vmem:[#allocation1 + $0x3f] sm:$0xff] }
  0xe4   :  { %1963 = vmatpush.bf16.msrb.mxu0 %v3047_v4  ;;  %1932 = vmatmul.bf16.vlgmr.msra.gmra.mxu1 %v3508_v30  ;;  %v3068_v4 = vld [vmem:[%s5270_s1 + $0x6a8] sm:$0xf0] }
  0xe5   :  { %1976 = vmatpush.bf16.msrb.mxu1 %v3111_v5  ;;  %1945 = vmatmul.bf16.vlgmr.msra.gmra.mxu2 %v3507_v28  ;;  %v3469_v5 = vld [vmem:[%s5270_s1 + $0x724] sm:$0xf]  ;;  %v3071_v12 = vor.u32 %v3453_v63, %v3068_v4  ;;  %v3063_v28 = vor.u32 %v3451_v16, %v3060_v18  ;;  %v3511_v61 = vld [vmem:[#allocation1 + $0x2d] sm:$0xff] }
  0xe6   :  { %1989 = vmatpush.bf16.msrb.mxu2 %v3175_v21  ;;  %1958 = vmatmul.bf16.vlgmr.msra.gmra.mxu3 %v3509_v33  ;;  %v3132_v21 = vld [vmem:[%s5270_s1 + $0x728] sm:$0xf0]  ;;  %v3449_v33 = vld [vmem:[%s5270_s1 + $0x684] sm:$0xf] }
  0xe7   :  { %2002 = vmatpush.bf16.msrb.mxu3 %v3239_v7  ;;  %v3196_v7 = vld [vmem:[%s5270_s1 + $0x7a8] sm:$0xf0] }
  0xe8   :  { %1964 = vmatpush.bf16.msrb.mxu0 %v3039_v13  ;;  %v1738_v20 = vpop.f32.mrf.mxu2  ;;  %v1714_v8 = vpop.f32.mrf.mxu0  ;;  %v3135_v13 = vor.u32 %v3469_v5, %v3132_v21  ;;  %v3199_v17 = vor.u32 %v3485_v6, %v3196_v7 }
  0xe9   :  { %1977 = vmatpush.bf16.msrb.mxu1 %v3103_v14  ;;  %v1739_v22 = vadd.f32 %v1738_v20, %v1726_v52  ;;  %v1751_v26 = vpop.f32.mrf.mxu3  ;;  %v1727_v10 = vpop.f32.mrf.mxu1  ;;  %v3435_v14 = vld [vmem:[%s5270_s1 + $0x614] sm:$0xf] }
  0xea   :  { %1990 = vmatpush.bf16.msrb.mxu2 %v3167_v15  ;;  %v2996_v15 = vld [vmem:[%s5270_s1 + $0x618] sm:$0xf0] }
  0xeb   :  { %2003 = vmatpush.bf16.msrb.mxu3 %v3231_v23  ;;  %v1752_v11 = vadd.f32 %v1751_v26, %v1739_v22  ;;  %v3124_v23 = vld [vmem:[%s5270_s1 + $0x718] sm:$0xf0]  ;;  %v2999_v27 = vor.u32 %v3435_v14, %v2996_v15 }
  0xec   :  { %1965 = vmatpush.bf16.msrb.mxu0 %v3031_v34  ;;  %v3127_v30 = vor.u32 %v3467_v19, %v3124_v23  ;;  %v3191_v34 = vor.u32 %v3483_v24, %v3188_v25 }
  0xed   :  { %1978 = vmatpush.bf16.msrb.mxu1 %v3095_v35  ;;  %v3052_v35 = vld [vmem:[%s5270_s1 + $0x688] sm:$0xf0] }
  0xee   :  { %1991 = vmatpush.bf16.msrb.mxu2 %v3159_v36  ;;  %v3465_v36 = vld [vmem:[%s5270_s1 + $0x704] sm:$0xf]  ;;  %v3055_v43 = vor.u32 %v3449_v33, %v3052_v35 }
  0xef   :  { %2004 = vmatpush.bf16.msrb.mxu3 %v3223_v40  ;;  %v3180_v40 = vld [vmem:[%s5270_s1 + $0x788] sm:$0xf0]  ;;  %v3119_v44 = vor.u32 %v3465_v36, %v3116_v37 }
  0xf0   :  { %1966 = vmatpush.bf16.msrb.mxu0 %v3023_v47  ;;  %v1740_v38 = vpop.f32.mrf.mxu2  ;;  %v3183_v45 = vor.u32 %v3481_v39, %v3180_v40  ;;  %v3512_v47 = vld [vmem:[#allocation1 + $0x36] sm:$0xff] }
  0xf1   :  { %1979 = vmatpush.bf16.msrb.mxu1 %v3087_v49  ;;  %v1753_v41 = vpop.f32.mrf.mxu3 }
  0xf2   :  { %1992 = vmatpush.bf16.msrb.mxu2 %v3151_v50 }
  0xf3   :  { %2005 = vmatpush.bf16.msrb.mxu3 %v3215_v29 }
  0xf4   :  { %1967 = vmatpush.bf16.msrb.mxu0 %v3015_v57 }
  0xf5   :  { %1980 = vmatpush.bf16.msrb.mxu1 %v3079_v58 }
  0xf6   :  { %1993 = vmatpush.bf16.msrb.mxu2 %v3143_v59 }
  0xf7   :  { %2006 = vmatpush.bf16.msrb.mxu3 %v3207_v3 }
  0xf8   :  { %1968 = vmatpush.bf16.msrb.mxu0 %v3007_v9 }
  0xf9   :  { %1981 = vmatpush.bf16.msrb.mxu1 %v3071_v12 }
  0xfa   :  { %1994 = vmatpush.bf16.msrb.mxu2 %v3135_v13 }
  0xfb   :  { %2007 = vmatpush.bf16.msrb.mxu3 %v3199_v17 }
  0xfc   :  { %1969 = vmatpush.bf16.msrb.mxu0 %v2999_v27 }
  0xfd   :  { %1982 = vmatpush.bf16.msrb.mxu1 %v3063_v28 }
  0xfe   :  { %1995 = vmatpush.bf16.msrb.mxu2 %v3127_v30 }
  0xff   :  { %2008 = vmatpush.bf16.msrb.mxu3 %v3191_v34 }
 0x100   :  { %1970 = vmatpush.bf16.msrb.mxu0 %v2991_v42  ;;  %v1764_v49 = vpop.f32.mrf.mxu0 }
 0x101   :  { %1983 = vmatpush.bf16.msrb.mxu1 %v3055_v43  ;;  %v1765_v50 = vadd.f32 %v1764_v49, %v1752_v11  ;;  %v1777_v0 = vpop.f32.mrf.mxu1 }
 0x102   :  { %1996 = vmatpush.bf16.msrb.mxu2 %v3119_v44 }
 0x103   :  { %2009 = vmatpush.bf16.msrb.mxu3 %v3183_v45  ;;  %1971 = vmatmul.bf16.vlgmr.msrb.gmra.mxu0 %v3510_v46  ;;  %v1778_v1 = vadd.f32 %v1777_v0, %v1765_v50 }
 0x104   :  { %1984 = vmatmul.bf16.vlgmr.msrb.gmra.mxu1 %v3511_v61 }
 0x105   :  { %1997 = vmatmul.bf16.vlgmr.msrb.gmra.mxu2 %v3512_v47 }
 0x106   :  { %2010 = vmatmul.bf16.vlgmr.msrb.gmra.mxu3 %v3513_v48 }
 0x108   :  { %v1790_v51 = vpop.f32.mrf.mxu2  ;;  %v1766_v2 = vpop.f32.mrf.mxu0 }
 0x109   :  { %v1791_v29 = vadd.f32 %v1790_v51, %v1778_v1  ;;  %v1803_v52 = vpop.f32.mrf.mxu3  ;;  %v1779_v53 = vpop.f32.mrf.mxu1 }
 0x10b   :  { %v5129_v54 = vadd.f32 %v1803_v52, %v1791_v29 }
 0x10d   :  { %v2016_v15 = vsel %vm2015_vm0, %v5129_v54, 0.0  ;;  %v2030_v16 = vmul.f32 %v5129_v54, %v5129_v54 }
 0x10e   :  { %v2017_v25 = vrot.slane %v2016_v15, 4 }
 0x10f   :  { %v2032_v27 = vsel %vm2015_vm0, %v2030_v16, 0.0  ;;  %v2142_v16 = vld [vmem:[%s5272_s4 + $0xd8] sm:$0xff] }
 0x110   :  { %v1792_v55 = vpop.f32.mrf.mxu2  ;;  %v2018_v30 = vadd.f32 %v2017_v25, %v2016_v15  ;;  %v2033_v31 = vrot.slane %v2032_v27, 4  ;;  %v2126_v15 = vld [vmem:[%s5272_s4 + $0x58] sm:$0xff] }
 0x111   :  { %v1805_v56 = vpop.f32.mrf.mxu3 }
 0x112   :  { %v2019_v35 = vrot.slane %v2018_v30, 2  ;;  %v2034_v36 = vadd.f32 %v2033_v31, %v2032_v27 }
 0x114   :  { %v2020_v38 = vadd.f32 %v2019_v35, %v2018_v30  ;;  %v2035_v39 = vrot.slane %v2034_v36, 2  ;;  %v2140_v30 = vld [vmem:[%s5272_s4 + $0xc8] sm:$0xff] }
 0x116   :  { %v2021_v42 = vrot.slane %v2020_v38, 1  ;;  %v2036_v43 = vadd.f32 %v2035_v39, %v2034_v36 }
 0x118   :  { %v2022_v46 = vadd.f32 %v2021_v42, %v2020_v38  ;;  %v2037_v61 = vrot.slane %v2036_v43, 1  ;;  %v2138_v38 = vld [vmem:[%s5272_s4 + $0xb8] sm:$0xff] }
 0x11a   :  { %v2038_v49 = vadd.f32 %v2037_v61, %v2036_v43  ;;  %v5136_v50 = vmul.f32 0.5, %v2022_v46  ;;  %v2119_v61 = vld [vmem:[%s5272_s4 + $0x20] sm:$0xff] }
 0x11c   :  { %v2048_v2 = vmul.f32 0.5, %v2038_v49  ;;  %v2050_v53 = vmul.f32 %v5136_v50, %v5136_v50  ;;  %v2118_v49 = vld [vmem:[%s5272_s4 + $0x18] sm:$0xff] }
 0x120   :  { %v1816_v57 = vpop.f32.mrf.mxu0 }
 0x121   :  { %v1829_v58 = vpop.f32.mrf.mxu1 }
 0x122   :  { %v1830_v59 = vadd.f32 %v1829_v58, %v1816_v57  ;;  %v2130_v57 = vld [vmem:[%s5272_s4 + $0x78] sm:$0xff] }
 0x123   :  { %v2146_v58 = vld [vmem:[%s5272_s4 + $0xf8] sm:$0xff]  ;;  %2151 = vmatpush.msra.mxu0 %v2130_v57 }
 0x124   :  { %2171 = vmatpush.msra.mxu1 %v2146_v58 }
 0x128   :  { %v1842_v60 = vpop.f32.mrf.mxu2  ;;  %v1818_v20 = vpop.f32.mrf.mxu0 }
 0x129   :  { %v1843_v62 = vadd.f32 %v1842_v60, %v1830_v59  ;;  %v1855_v63 = vpop.f32.mrf.mxu3  ;;  %v1831_v4 = vpop.f32.mrf.mxu1  ;;  %v2145_v20 = vld [vmem:[%s5272_s4 + $0xf0] sm:$0xff] }
 0x12a   :  { %2172 = vmatpush.msra.mxu1 %v2145_v20 }
 0x12b   :  { %v1856_v3 = vadd.f32 %v1855_v63, %v1843_v62  ;;  %v2052_v62 = vsub.f32 %v2048_v2, %v2050_v53  ;;  %v2132_v2 = vld [vmem:[%s5272_s4 + $0x88] sm:$0xff]  ;;  %v2115_v53 = vld [vmem:[%s5272_s4] sm:$0xff] }
 0x130   :  { %v1844_v5 = vpop.f32.mrf.mxu2 }
 0x131   :  { %v1857_v21 = vpop.f32.mrf.mxu3 }
 0x140   :  { %v1868_v22 = vpop.f32.mrf.mxu0 }
 0x141   :  { %v1881_v26 = vpop.f32.mrf.mxu1  ;;  %v1869_v14 = vadd.f32 %v1868_v22, %v1856_v3  ;;  %v2129_v3 = vld [vmem:[%s5272_s4 + $0x70] sm:$0xff] }
 0x142   :  { %2152 = vmatpush.msra.mxu0 %v2129_v3 }
 0x143   :  { %v1882_v23 = vadd.f32 %v1881_v26, %v1869_v14  ;;  %v2128_v26 = vld [vmem:[%s5272_s4 + $0x68] sm:$0xff] }
 0x144   :  { %2153 = vmatpush.msra.mxu0 %v2128_v26 }
 0x148   :  { %v1894_v6 = vpop.f32.mrf.mxu2  ;;  %v1870_v8 = vpop.f32.mrf.mxu0 }
 0x149   :  { %v1907_v7 = vpop.f32.mrf.mxu3  ;;  %v1883_v9 = vpop.f32.mrf.mxu1  ;;  %v1895_v28 = vadd.f32 %v1894_v6, %v1882_v23  ;;  %v2144_v6 = vld [vmem:[%s5272_s4 + $0xe8] sm:$0xff]  ;;  %v2054_v8 = vmax.f32 %v2052_v62, 0.0  ;;  %v2125_v23 = vld [vmem:[%s5272_s4 + $0x50] sm:$0xff] }
 0x14a   :  { %2173 = vmatpush.msra.mxu1 %v2144_v6 }
 0x14b   :  { %v1908_v34 = vadd.f32 %v1907_v7, %v1895_v28  ;;  %v2124_v28 = vld [vmem:[%s5272_s4 + $0x48] sm:$0xff] }
 0x150   :  { %v1896_v10 = vpop.f32.mrf.mxu2 }
 0x151   :  { %v1909_v11 = vpop.f32.mrf.mxu3 }
 0x152   :  { %v2127_v11 = vld [vmem:[%s5272_s4 + $0x60] sm:$0xff] }
 0x153   :  { %2154 = vmatpush.msra.mxu0 %v2127_v11 }
 0x155   :  { %2155 = vmatpush.msra.mxu0 %v2126_v15  ;;  %v2086_v15 = vld [vmem:[%s5275_s3] sm:$0x3] }
 0x157   :  { %2156 = vmatpush.msra.mxu0 %v2125_v23 }
 0x159   :  { %2157 = vmatpush.msra.mxu0 %v2124_v28 }
 0x160   :  { %v1920_v12 = vpop.f32.mrf.mxu0 }
 0x161   :  { %v1933_v13 = vpop.f32.mrf.mxu1  ;;  %v1921_v37 = vadd.f32 %v1920_v12, %v1908_v34  ;;  %v2143_v12 = vld [vmem:[%s5272_s4 + $0xe0] sm:$0xff] }
 0x162   :  { %2174 = vmatpush.msra.mxu1 %v2143_v12  ;;  %v2139_v34 = vld [vmem:[%s5272_s4 + $0xc0] sm:$0xff] }
 0x163   :  { %v1934_v40 = vadd.f32 %v1933_v13, %v1921_v37  ;;  %v2122_v37 = vld [vmem:[%s5272_s4 + $0x38] sm:$0xff] }
 0x164   :  { %2175 = vmatpush.msra.mxu1 %v2142_v16 }
 0x168   :  { %v1946_v17 = vpop.f32.mrf.mxu2  ;;  %v1922_v19 = vpop.f32.mrf.mxu0 }
 0x169   :  { %v1959_v18 = vpop.f32.mrf.mxu3  ;;  %v1935_v24 = vpop.f32.mrf.mxu1  ;;  %v1947_v41 = vadd.f32 %v1946_v17, %v1934_v40  ;;  %v5177_v17 = vadd.f32 1e-05, %v2054_v8  ;;  %v2121_v40 = vld [vmem:[%s5272_s4 + $0x30] sm:$0xff] }
 0x16a   :  { %v2141_v24 = vld [vmem:[%s5272_s4 + $0xd0] sm:$0xff] }
 0x16b   :  { %v1960_v44 = vadd.f32 %v1959_v18, %v1947_v41  ;;  %2176 = vmatpush.msra.mxu1 %v2141_v24  ;;  %3498 = vrsqrt.f32 %v5177_v17  ;;  %v2137_v41 = vld [vmem:[%s5272_s4 + $0xb0] sm:$0xff]  ;;  %vm2065_vm5 = vweird.f32 %v5177_v17 }
 0x16d   :  { %2177 = vmatpush.msra.mxu1 %v2140_v30 }
 0x16f   :  { %2178 = vmatpush.msra.mxu1 %v2139_v34 }
 0x170   :  { %v1948_v32 = vpop.f32.mrf.mxu2 }
 0x171   :  { %v1961_v33 = vpop.f32.mrf.mxu3  ;;  %2179 = vmatpush.msra.mxu1 %v2138_v38  ;;  %v3499_v42 = vpop.eup %3498 }
 0x172   :  { %v2123_v33 = vld [vmem:[%s5272_s4 + $0x40] sm:$0xff]  ;;  %vm2066_vm2 = vweird.f32 %v3499_v42 }
 0x173   :  { %2158 = vmatpush.msra.mxu0 %v2123_v33  ;;  %2180 = vmatpush.msra.mxu1 %v2137_v41  ;;  %vm2067_vm7 = vmor %vm2065_vm5, %vm2066_vm2 }
 0x175   :  { %2159 = vmatpush.msra.mxu0 %v2122_v37 }
 0x177   :  { %2160 = vmatpush.msra.mxu0 %v2121_v40 }
 0x180   :  { %v1972_v45 = vpop.f32.mrf.mxu0 }
 0x181   :  { %v1985_v47 = vpop.f32.mrf.mxu1  ;;  %v1973_v48 = vadd.f32 %v1972_v45, %v1960_v44  ;;  %v2120_v44 = vld [vmem:[%s5272_s4 + $0x28] sm:$0xff] }
 0x182   :  { %v2136_v45 = vld [vmem:[%s5272_s4 + $0xa8] sm:$0xff]  ;;  %2161 = vmatpush.msra.mxu0 %v2120_v44 }
 0x183   :  { %v1986_v0 = vadd.f32 %v1985_v47, %v1973_v48  ;;  %2181 = vmatpush.msra.mxu1 %v2136_v45  ;;  %v2135_v47 = vld [vmem:[%s5272_s4 + $0xa0] sm:$0xff]  ;;  %v2060_v48 = vmul.f32 %v3499_v42, %v5177_v17 }
 0x184   :  { %2162 = vmatpush.msra.mxu0 %v2119_v61 }
 0x185   :  { %2182 = vmatpush.msra.mxu1 %v2135_v47 }
 0x186   :  { %2163 = vmatpush.msra.mxu0 %v2118_v49 }
 0x188   :  { %v1998_v1 = vpop.f32.mrf.mxu2  ;;  %v1974_v52 = vpop.f32.mrf.mxu0 }
 0x189   :  { %v1999_v51 = vadd.f32 %v1998_v1, %v1986_v0  ;;  %v2011_v29 = vpop.f32.mrf.mxu3  ;;  %v1987_v55 = vpop.f32.mrf.mxu1  ;;  %v2134_v0 = vld [vmem:[%s5272_s4 + $0x98] sm:$0xff]  ;;  %v2117_v1 = vld [vmem:[%s5272_s4 + $0x10] sm:$0xff]  ;;  %v2061_v52 = vmul.f32 %v3499_v42, %v2060_v48 }
 0x18a   :  { %2183 = vmatpush.msra.mxu1 %v2134_v0  ;;  %2164 = vmatpush.msra.mxu0 %v2117_v1  ;;  %v2131_v55 = vld [vmem:[%s5272_s4 + $0x80] sm:$0xff] }
 0x18b   :  { %v5140_v56 = vadd.f32 %v2011_v29, %v1999_v51  ;;  %v2133_v51 = vld [vmem:[%s5272_s4 + $0x90] sm:$0xff]  ;;  %v2116_v29 = vld [vmem:[%s5272_s4 + $0x8] sm:$0xff]  ;;  %v2062_v58 = vmul.f32 0.5, %v2061_v52 }
 0x18c   :  { %2184 = vmatpush.msra.mxu1 %v2133_v51  ;;  %2165 = vmatpush.msra.mxu0 %v2116_v29 }
 0x18d   :  { %v2023_v59 = vsel %vm2015_vm0, %v5140_v56, 0.0  ;;  %v2031_v60 = vmul.f32 %v5140_v56, %v5140_v56 }
 0x18e   :  { %v2024_v63 = vrot.slane %v2023_v59, 4  ;;  %2185 = vmatpush.msra.mxu1 %v2132_v2  ;;  %2166 = vmatpush.msra.mxu0 %v2115_v53 }
 0x18f   :  { %v2039_v4 = vsel %vm2015_vm0, %v2031_v60, 0.0  ;;  %v11_v60 = vstv %s5273_s5 }
 0x190   :  { %v2025_v5 = vadd.f32 %v2024_v63, %v2023_v59  ;;  %v2040_v21 = vrot.slane %v2039_v4, 4  ;;  %v2000_v22 = vpop.f32.mrf.mxu2  ;;  %2186 = vmatpush.msra.mxu1 %v2131_v55  ;;  %12 = vst [vmem:[#allocation2] sm:$0x1] %v11_v60  ;;  %v2063_v63 = vsub.f32 1.5, %v2062_v58 }
 0x191   :  { %v2013_v7 = vpop.f32.mrf.mxu3  ;;  %v2056_v22 = vld [vmem:[%s5274_s2] sm:$0x3] }
 0x192   :  { %v2026_v9 = vrot.slane %v2025_v5, 2  ;;  %v2041_v10 = vadd.f32 %v2040_v21, %v2039_v4  ;;  %v2064_v4 = vmul.f32 %v3499_v42, %v2063_v63 }
 0x194   :  { %v2027_v13 = vadd.f32 %v2026_v9, %v2025_v5  ;;  %v2042_v14 = vrot.slane %v2041_v10, 2  ;;  %v2068_v6 = vsel %vm2067_vm7, %v3499_v42, %v2064_v4 }
 0x196   :  { %v2028_v18 = vrot.slane %v2027_v13, 1  ;;  %v2043_v19 = vadd.f32 %v2042_v14, %v2041_v10 }
 0x198   :  { %v2029_v25 = vadd.f32 %v2028_v18, %v2027_v13  ;;  %v2044_v27 = vrot.slane %v2043_v19, 1 }
 0x19a   :  { %v2045_v31 = vadd.f32 %v2044_v27, %v2043_v19  ;;  %v5192_v32 = vmul.f32 0.5, %v2029_v25 }
 0x19c   :  { %v2049_v35 = vmul.f32 0.5, %v2045_v31  ;;  %v2051_v36 = vmul.f32 %v5192_v32, %v5192_v32 }
 0x19e   :  { %v2053_v39 = vsub.f32 %v2049_v35, %v2051_v36 }
 0x1a0   :  { %v2055_v43 = vmax.f32 %v2053_v39, 0.0 }
 0x1a2   :  { %v2058_v46 = vadd.f32 1e-05, %v2055_v43 }
 0x1a4   :  { %3500 = vrsqrt.f32 %v2058_v46  ;;  %vm2075_vm3 = vweird.f32 %v2058_v46 }
 0x1aa   :  { %v3501_v57 = vpop.eup %3500 }
 0x1ab   :  { %v2070_v59 = vmul.f32 %v3501_v57, %v2058_v46  ;;  %vm2076_vm1 = vweird.f32 %v3501_v57 }
 0x1ac   :  { %vm2077_vm4 = vmor %vm2075_vm3, %vm2076_vm1 }
 0x1ad   :  { %v2071_v62 = vmul.f32 %v3501_v57, %v2070_v59 }
 0x1af   :  { %v2072_v3 = vmul.f32 0.5, %v2071_v62 }
 0x1b1   :  { %v2073_v20 = vsub.f32 1.5, %v2072_v3 }
 0x1b3   :  { %v2074_v5 = vmul.f32 %v3501_v57, %v2073_v20 }
 0x1b5   :  { %v2078_v21 = vsel %vm2077_vm4, %v3501_v57, %v2074_v5 }
 0x1b6   :  { %v2081_v26 = vrot.slane %v2078_v21, 7 }
 0x1b8   :  { %v2083_v7 = vsel %vm2082_vm6, %v2068_v6, %v2081_v26 }
 0x1b9   :  { %v2085_v8 = vmul.f32 %v2083_v7, %v2056_v22 }
 0x1bb   :  { %v2088_v9 = vperm.slane %v2085_v8, 0  ;;  %v2089_v10 = vperm.slane %v2085_v8, 1 }
 0x1bd   :  { %v2092_v11 = vmul.f32 %v2088_v9, %v5136_v50  ;;  %v2093_v12 = vmul.f32 %v2089_v10, %v5192_v32  ;;  %v2101_v13 = vmul.f32 %v2089_v10, %v5140_v56  ;;  %v2100_v14 = vmul.f32 %v2088_v9, %v5129_v54  ;;  %v3497_v54 = vld [vmem:[#allocation2] ss:$0 sm:$0xff] }
 0x1bf   :  { %v2096_v16 = vrot.slane %v2093_v12, 7 }
 0x1c1   :  { %v2097_v17 = vsel %vm2082_vm6, %v2092_v11, %v2096_v16 }
 0x1c2   :  { %v2099_v18 = vsub.f32 %v2086_v15, %v2097_v17 }
 0x1c4   :  { %v2104_v19 = vperm.slane %v2099_v18, 1  ;;  %v2103_v23 = vperm.slane %v2099_v18, 0 }
 0x1c6   :  { %v2108_v24 = vadd.f32 %v2104_v19, %v2101_v13  ;;  %v2107_v25 = vadd.f32 %v2103_v23, %v2100_v14 }
 0x1c8   :  { %vm2109_vm8 = vcmp.gt.f32.partialorder %v2107_v25, 0.0  ;;  %v2111_v50 = vmul.f32 0.2, %v2107_v25  ;;  %vm2110_vm9 = vcmp.gt.f32.partialorder %v2108_v24, 0.0  ;;  %v2112_v27 = vmul.f32 0.2, %v2108_v24 }
 0x1ca   :  { %v2113_v28 = vsel %vm2109_vm8, %v2107_v25, %v2111_v50  ;;  %v2114_v56 = vsel %vm2110_vm9, %v2108_v24, %v2112_v27 }
 0x1cb   :  { %2167 = vmatmul.f32.vlgmr.msra.gmra.mxu0 %v2113_v28  ;;  %2187 = vmatmul.f32.vlgmr.msra.gmra.mxu1 %v2114_v56 }
 0x248   :  { %v2168_v30 = vpop.f32.mrf.mxu0  ;;  %v2188_v32 = vpop.f32.mrf.mxu1 }
 0x249   :  { %v2169_v31 = vadd.f32 %v3497_v54, %v2168_v30 }
 0x24b   :  { %v2189_v33 = vadd.f32 %v2188_v32, %v2169_v31 }
 0x24d   :  { %v3240_v34 = vmul.f32 -1.442695, %v2189_v33 }
 0x24f   :  { %3502 = vpow2.f32 %v3240_v34 }
 0x255   :  { %v3503_v35 = vpop.eup %3502 }
 0x256   :  { %v2194_v36 = vadd.f32 1.0, %v3503_v35 }
 0x258   :  { %3504 = vrcp.f32 %v2194_v36  ;;  %v2206_v40 = vand.u32 2147483648, %v2194_v36  ;;  %v2204_v42 = vand.u32 2147483647, %v2194_v36  ;;  %vm2200_vm11 = vweird.f32 %v2194_v36 }
 0x25a   :  { %v2207_v44 = vor.u32 1.1754944e-38, %v2206_v40  ;;  %vm2205_vm14 = vcmp.eq.f32.partialorder %v2204_v42, 8.507059e+37 }
 0x25e   :  { %v3505_v37 = vpop.eup %3504 }
 0x25f   :  { %v2196_v38 = vmul.f32 %v3505_v37, %v2194_v36  ;;  %vm2201_vm10 = vweird.f32 %v3505_v37 }
 0x260   :  { %vm2202_vm12 = vmor %vm2200_vm11, %vm2201_vm10 }
 0x261   :  { %v2197_v39 = vsub.f32 1.0, %v2196_v38 }
 0x263   :  { %v2198_v41 = vmul.f32 %v3505_v37, %v2197_v39 }
 0x265   :  { %v2199_v43 = vadd.f32 %v3505_v37, %v2198_v41 }
 0x267   :  { %v2203_v45 = vsel %vm2202_vm12, %v3505_v37, %v2199_v43 }
 0x268   :  { %v2208_v46 = vsel %vm2205_vm14, %v2207_v44, %v2203_v45 }
 0x269   :  { %2211 = vst.msk [vmem:[%s5276_s6] sm:$0x3] %vm2210_vm13, %v2208_v46 }

</bundles_post_ra>
